<compile_context>
chip_gen: v7x
topology: tpu7x:2x2x1
jax: 0.10.0
libtpu: 0.0.40
codegen_flags: <defaults>
</compile_context>

<pallas_src>
import functools

import jax
import jax.numpy as jnp
from jax.experimental import pallas as pl
from jax.experimental.pallas import tpu as pltpu


# ------------------------------ Pallas kernel ------------------------------ #

def _basic_block_kernel(x_ref, w1_ref, b1_ref, w2_ref, b2_ref, o_ref,
                        xpad_ref, hpad_ref, *, H, W):
    """Fused BasicBlock forward for one batch element (NHWC).

    x_ref   : (1, H, W, Cin)      f32   input tile (also the residual)
    w1_ref  : (3, 3, Cin, Cmid)   bf16  conv1 weight with BN1 scale folded in
    b1_ref  : (1, Cmid)           f32   folded BN1 bias
    w2_ref  : (3, 3, Cmid, Cout)  bf16  conv2 weight with BN2 scale folded in
    b2_ref  : (1, Cout)           f32   folded BN2 bias
    o_ref   : (1, H, W, Cout)     f32   output tile
    xpad_ref: VMEM (H+2, W+16, Cin)  f32 scratch (zero halo for conv1)
    hpad_ref: VMEM (H+2, W+16, Cmid) f32 scratch (zero halo for conv2)
    """
    Cmid = w1_ref.shape[-1]
    Cout = w2_ref.shape[-1]

    # Physical column layout of the padded scratch (sublane axis, width W+16):
    #   [0 .. 6]       unused (zero)
    #   [7]            left zero-halo column        (logical padded col 0)
    #   [8 .. 8+W-1]   image interior               (sublane-tile aligned)
    #   [8+W]          right zero-halo column
    #   [8+W+1 .. ]    unused (zero)
    col0 = 7  # physical column of logical padded column 0

    x = x_ref[0]                                   # (H, W, Cin) f32

    def conv3x3(pad_ref, interior, w):
        """'same' 3x3 conv: 9 bf16 MXU dots, f32 accumulation."""
        c_in = interior.shape[-1]
        c_out = w.shape[-1]
        # Re-zero every grid step (scratch persists across steps / cores);
        # the halo ring stays zero, which implements 'same' padding.
        pad_ref[...] = jnp.zeros_like(pad_ref)
        pad_ref[1:H + 1, col0 + 1:col0 + 1 + W, :] = interior
        xp = pad_ref[...]                          # (H+2, W+16, c_in)
        acc = jnp.zeros((H * W, c_out), jnp.float32)
        for dy in range(3):
            for dx in range(3):
                patch = xp[dy:dy + H, col0 + dx:col0 + dx + W, :]
                acc += jnp.dot(
                    patch.reshape(H * W, c_in).astype(jnp.bfloat16),
                    w[dy, dx],                     # (c_in, c_out) bf16
                    preferred_element_type=jnp.float32)
        return acc                                 # (H*W, c_out) f32

    # conv1 + bn1 (scale folded into w1) + relu
    h = conv3x3(xpad_ref, x, w1_ref[...]) + b1_ref[...]
    h = jnp.maximum(h, 0.0)                        # (H*W, Cmid) f32

    # conv2 + bn2 (scale folded into w2) + residual + relu
    y = conv3x3(hpad_ref, h.reshape(H, W, Cmid), w2_ref[...]) + b2_ref[...]
    y = y + x.reshape(H * W, Cout)                 # residual (Cin == Cout)
    y = jnp.maximum(y, 0.0)
    o_ref[...] = y.reshape(1, H, W, Cout)


# -------------------------------- wrappers --------------------------------- #

def _fused_basic_block_nhwc(x_nhwc, w1_hwio, b1, w2_hwio, b2):
    """One pallas_call for the whole BasicBlock. NHWC in / NHWC out."""
    N, H, W, Cin = x_nhwc.shape
    Cmid = w1_hwio.shape[-1]
    Cout = w2_hwio.shape[-1]
    assert w1_hwio.shape[:3] == (3, 3, Cin), "conv1 must be 3x3, HWIO layout"
    assert w2_hwio.shape[:3] == (3, 3, Cmid), "conv2 must be 3x3, HWIO layout"
    assert Cin == Cout, "identity residual requires in_channels == out_channels"

    kernel = functools.partial(_basic_block_kernel, H=H, W=W)

    flops = 2 * N * H * W * 9 * (Cin * Cmid + Cmid * Cout)
    bytes_accessed = (
        4 * N * H * W * (Cin + Cout)                    # f32 activations in/out
        + 2 * (w1_hwio.size + w2_hwio.size)             # bf16 weights
        + 4 * (b1.size + b2.size))                      # f32 biases

    return pl.pallas_call(
        kernel,
        out_shape=jax.ShapeDtypeStruct((N, H, W, Cout), jnp.float32),
        grid=(N,),
        in_specs=[
            pl.BlockSpec((1, H, W, Cin), lambda n: (n, 0, 0, 0)),
            pl.BlockSpec((3, 3, Cin, Cmid), lambda n: (0, 0, 0, 0)),
            pl.BlockSpec((1, Cmid), lambda n: (0, 0)),
            pl.BlockSpec((3, 3, Cmid, Cout), lambda n: (0, 0, 0, 0)),
            pl.BlockSpec((1, Cout), lambda n: (0, 0)),
        ],
        out_specs=pl.BlockSpec((1, H, W, Cout), lambda n: (n, 0, 0, 0)),
        scratch_shapes=[
            pltpu.VMEM((H + 2, W + 16, Cin), jnp.float32),   # padded x halo
            pltpu.VMEM((H + 2, W + 16, Cmid), jnp.float32),  # padded h halo
        ],
        compiler_params=pltpu.CompilerParams(
            dimension_semantics=("parallel",)),
        cost_estimate=pl.CostEstimate(
            flops=int(flops), transcendentals=0,
            bytes_accessed=int(bytes_accessed)),
    )(x_nhwc.astype(jnp.float32),
      w1_hwio.astype(jnp.bfloat16),
      b1.reshape(1, Cmid).astype(jnp.float32),
      w2_hwio.astype(jnp.bfloat16),
      b2.reshape(1, Cout).astype(jnp.float32))


def basic_block_forward_nhwc(x_nhwc, params, *, eps=1e-5):
    """BasicBlock forward, NHWC in / NHWC out (stride=1, no downsample)."""
    # Fold eval-mode BatchNorm into per-channel scale (-> weights) and bias.
    s1 = params["bn1_g"] * jax.lax.rsqrt(params["bn1_v"] + eps)
    b1 = params["bn1_b"] - params["bn1_m"] * s1
    s2 = params["bn2_g"] * jax.lax.rsqrt(params["bn2_v"] + eps)
    b2 = params["bn2_b"] - params["bn2_m"] * s2
    w1 = params["w1"] * s1          # (3,3,Cin,Cmid) * (Cmid,) broadcast
    w2 = params["w2"] * s2
    return _fused_basic_block_nhwc(x_nhwc, w1, b1, w2, b2)


def basic_block_forward(x_nchw, params):
    """PyTorch-layout wrapper: NCHW in / NCHW out.

    When stacking many blocks, prefer `basic_block_forward_nhwc` to avoid the
    per-block NCHW<->NHWC transposes (full-tensor HBM round trips).
    """
    x = jnp.transpose(x_nchw, (0, 2, 3, 1))        # NCHW -> NHWC
    y = basic_block_forward_nhwc(x, params)
    return jnp.transpose(y, (0, 3, 1, 2))          # NHWC -> NCHW


# ----------------------------- reference (JAX) ------------------------------ #

def _reference_forward(x_nchw, params, eps=1e-5):
    x = jnp.transpose(x_nchw, (0, 2, 3, 1))
    dn = ("NHWC", "HWIO", "NHWC")

    h = jax.lax.conv_general_dilated(x, params["w1"], (1, 1), "SAME",
                                     dimension_numbers=dn)
    h = (h - params["bn1_m"]) * jax.lax.rsqrt(params["bn1_v"] + eps) \
        * params["bn1_g"] + params["bn1_b"]
    h = jnp.maximum(h, 0.0)

    y = jax.lax.conv_general_dilated(h, params["w2"], (1, 1), "SAME",
                                     dimension_numbers=dn)
    y = (y - params["bn2_m"]) * jax.lax.rsqrt(params["bn2_v"] + eps) \
        * params["bn2_g"] + params["bn2_b"]
    y = jnp.maximum(y + x, 0.0)
    return jnp.transpose(y, (0, 3, 1, 2))


# ---------------------------------- main ------------------------------------ #

if __name__ == "__main__":
    N, C, H, W = 2, 4, 16, 16          # in_channels == out_channels, stride=1
    k = jax.random.split(jax.random.PRNGKey(0), 11)

    params = {
        # conv weights in HWIO layout (3, 3, Cin, Cout), bias=False.
        # (PyTorch OIHW weights convert via w.transpose(2, 3, 1, 0).)
        "w1": jax.random.normal(k[0], (3, 3, C, C), jnp.float32) * 0.1,
        "w2": jax.random.normal(k[1], (3, 3, C, C), jnp.float32) * 0.1,
        # BatchNorm parameters / running stats (deterministic, non-trivial)
        "bn1_g": jax.random.uniform(k[2], (C,), jnp.float32, 0.8, 1.2),
        "bn1_b": jax.random.normal(k[3], (C,), jnp.float32) * 0.05,
        "bn1_m": jax.random.normal(k[4], (C,), jnp.float32) * 0.05,
        "bn1_v": jax.random.uniform(k[5], (C,), jnp.float32, 0.5, 1.5),
        "bn2_g": jax.random.uniform(k[6], (C,), jnp.float32, 0.8, 1.2),
        "bn2_b": jax.random.normal(k[7], (C,), jnp.float32) * 0.05,
        "bn2_m": jax.random.normal(k[8], (C,), jnp.float32) * 0.05,
        "bn2_v": jax.random.uniform(k[9], (C,), jnp.float32, 0.5, 1.5),
    }

    x = jax.random.normal(k[10], (N, C, H, W), jnp.float32)

    out = jax.block_until_ready(basic_block_forward(x, params))
    ref = jax.block_until_ready(_reference_forward(x, params))

    assert out.shape == (N, C, H, W)
    # bf16 MXU matmuls vs f32 XLA reference -> loosened tolerance.
    assert jnp.allclose(out, ref, atol=2e-2, rtol=2e-2), "mismatch vs reference"

    print("KERNEL_OK")
</pallas_src>

<mosaic_0001>
module attributes {stable_mosaic.version = 11 : i64} {
  func.func @_basic_block_kernel(%arg0: i32, %arg1: memref<1x16x16x4xf32, #tpu.memory_space<vmem>>, %arg2: memref<3x3x4x4xbf16, #tpu.memory_space<vmem>>, %arg3: memref<1x4xf32, #tpu.memory_space<vmem>>, %arg4: memref<3x3x4x4xbf16, #tpu.memory_space<vmem>>, %arg5: memref<1x4xf32, #tpu.memory_space<vmem>>, %arg6: memref<1x16x16x4xf32, #tpu.memory_space<vmem>>, %arg7: memref<18x32x4xf32, #tpu.memory_space<vmem>>, %arg8: memref<18x32x4xf32, #tpu.memory_space<vmem>>) attributes {dimension_semantics = [#tpu.dimension_semantics<parallel>], iteration_bounds = array<i64: 2>, scalar_prefetch = 0 : i64, scratch_operands = 2 : i64, tpu.core_type = #tpu.core_type<tc>, window_params = [{transform_indices = @transform_0, window_bounds = array<i64: 1, 16, 16, 4>}, {pipeline_mode = #tpu.pipeline_mode<synchronous>, transform_indices = @transform_1, window_bounds = array<i64: 3, 3, 4, 4>}, {pipeline_mode = #tpu.pipeline_mode<synchronous>, transform_indices = @transform_2, window_bounds = array<i64: 1, 4>}, {pipeline_mode = #tpu.pipeline_mode<synchronous>, transform_indices = @transform_3, window_bounds = array<i64: 3, 3, 4, 4>}, {pipeline_mode = #tpu.pipeline_mode<synchronous>, transform_indices = @transform_4, window_bounds = array<i64: 1, 4>}, {transform_indices = @transform_5, window_bounds = array<i64: 1, 16, 16, 4>}]} {
    %c0 = arith.constant 0 : index
    %c0_0 = arith.constant 0 : index
    %c0_1 = arith.constant 0 : index
    %c0_2 = arith.constant 0 : index
    %0 = vector.load %arg1[%c0, %c0_0, %c0_1, %c0_2] : memref<1x16x16x4xf32, #tpu.memory_space<vmem>>, vector<1x16x16x4xf32>
    %1 = vector.shape_cast %0 : vector<1x16x16x4xf32> to vector<16x16x4xf32>
    %c0_3 = arith.constant 0 : index
    %c0_4 = arith.constant 0 : index
    %c0_5 = arith.constant 0 : index
    %c0_6 = arith.constant 0 : index
    %2 = vector.load %arg2[%c0_3, %c0_4, %c0_5, %c0_6] : memref<3x3x4x4xbf16, #tpu.memory_space<vmem>>, vector<3x3x4x4xbf16>
    %cst = arith.constant 0.000000e+00 : f32
    %3 = vector.broadcast %cst : f32 to vector<18x32x4xf32>
    %c0_7 = arith.constant 0 : index
    %c0_8 = arith.constant 0 : index
    %c0_9 = arith.constant 0 : index
    %4 = vector.load %arg7[%c0_7, %c0_8, %c0_9] : memref<18x32x4xf32, #tpu.memory_space<vmem>>, vector<18x32x4xf32>
    tpu.vector_store %arg7[%c0_7, %c0_8, %c0_9], %3 {strides = array<i32>} : memref<18x32x4xf32, #tpu.memory_space<vmem>>, vector<18x32x4xf32>,
    %c1 = arith.constant 1 : index
    %c8 = arith.constant 8 : index
    %c0_10 = arith.constant 0 : index
    %5 = vector.load %arg7[%c1, %c8, %c0_10] : memref<18x32x4xf32, #tpu.memory_space<vmem>>, vector<16x16x4xf32>
    tpu.vector_store %arg7[%c1, %c8, %c0_10], %1 {strides = array<i32>} : memref<18x32x4xf32, #tpu.memory_space<vmem>>, vector<16x16x4xf32>,
    %c0_11 = arith.constant 0 : index
    %c0_12 = arith.constant 0 : index
    %c0_13 = arith.constant 0 : index
    %6 = vector.load %arg7[%c0_11, %c0_12, %c0_13] : memref<18x32x4xf32, #tpu.memory_space<vmem>>, vector<18x32x4xf32>
    %cst_14 = arith.constant 0.000000e+00 : f32
    %7 = vector.broadcast %cst_14 : f32 to vector<256x4xf32>
    %8 = vector.extract_strided_slice %6 {offsets = [0, 7, 0], sizes = [16, 16, 4], strides = [1, 1, 1]} : vector<18x32x4xf32> to vector<16x16x4xf32>
    %9 = vector.shape_cast %8 : vector<16x16x4xf32> to vector<256x4xf32>
    %10 = arith.truncf %9 : vector<256x4xf32> to vector<256x4xbf16>
    %11 = vector.extract_strided_slice %2 {offsets = [0, 0, 0, 0], sizes = [1, 1, 4, 4], strides = [1, 1, 1, 1]} : vector<3x3x4x4xbf16> to vector<1x1x4x4xbf16>
    %12 = vector.shape_cast %11 : vector<1x1x4x4xbf16> to vector<4x4xbf16>
    %cst_15 = arith.constant dense<0.000000e+00> : vector<256x4xf32>
    %13 = tpu.matmul %10, %12, %cst_15 {dimension_numbers = #tpu.dot_dimension_numbers<[1], [0], [0], [1], [0, 0, 1, 1], [], []>} : vector<256x4xbf16>, vector<4x4xbf16>, vector<256x4xf32> -> vector<256x4xf32>
    %14 = arith.addf %7, %13 : vector<256x4xf32>
    %15 = vector.extract_strided_slice %6 {offsets = [0, 8, 0], sizes = [16, 16, 4], strides = [1, 1, 1]} : vector<18x32x4xf32> to vector<16x16x4xf32>
    %16 = vector.shape_cast %15 : vector<16x16x4xf32> to vector<256x4xf32>
    %17 = arith.truncf %16 : vector<256x4xf32> to vector<256x4xbf16>
    %18 = vector.extract_strided_slice %2 {offsets = [0, 1, 0, 0], sizes = [1, 1, 4, 4], strides = [1, 1, 1, 1]} : vector<3x3x4x4xbf16> to vector<1x1x4x4xbf16>
    %19 = vector.shape_cast %18 : vector<1x1x4x4xbf16> to vector<4x4xbf16>
    %cst_16 = arith.constant dense<0.000000e+00> : vector<256x4xf32>
    %20 = tpu.matmul %17, %19, %cst_16 {dimension_numbers = #tpu.dot_dimension_numbers<[1], [0], [0], [1], [0, 0, 1, 1], [], []>} : vector<256x4xbf16>, vector<4x4xbf16>, vector<256x4xf32> -> vector<256x4xf32>
    %21 = arith.addf %14, %20 : vector<256x4xf32>
    %22 = vector.extract_strided_slice %6 {offsets = [0, 9, 0], sizes = [16, 16, 4], strides = [1, 1, 1]} : vector<18x32x4xf32> to vector<16x16x4xf32>
    %23 = vector.shape_cast %22 : vector<16x16x4xf32> to vector<256x4xf32>
    %24 = arith.truncf %23 : vector<256x4xf32> to vector<256x4xbf16>
    %25 = vector.extract_strided_slice %2 {offsets = [0, 2, 0, 0], sizes = [1, 1, 4, 4], strides = [1, 1, 1, 1]} : vector<3x3x4x4xbf16> to vector<1x1x4x4xbf16>
    %26 = vector.shape_cast %25 : vector<1x1x4x4xbf16> to vector<4x4xbf16>
    %cst_17 = arith.constant dense<0.000000e+00> : vector<256x4xf32>
    %27 = tpu.matmul %24, %26, %cst_17 {dimension_numbers = #tpu.dot_dimension_numbers<[1], [0], [0], [1], [0, 0, 1, 1], [], []>} : vector<256x4xbf16>, vector<4x4xbf16>, vector<256x4xf32> -> vector<256x4xf32>
    %28 = arith.addf %21, %27 : vector<256x4xf32>
    %29 = vector.extract_strided_slice %6 {offsets = [1, 7, 0], sizes = [16, 16, 4], strides = [1, 1, 1]} : vector<18x32x4xf32> to vector<16x16x4xf32>
    %30 = vector.shape_cast %29 : vector<16x16x4xf32> to vector<256x4xf32>
    %31 = arith.truncf %30 : vector<256x4xf32> to vector<256x4xbf16>
    %32 = vector.extract_strided_slice %2 {offsets = [1, 0, 0, 0], sizes = [1, 1, 4, 4], strides = [1, 1, 1, 1]} : vector<3x3x4x4xbf16> to vector<1x1x4x4xbf16>
    %33 = vector.shape_cast %32 : vector<1x1x4x4xbf16> to vector<4x4xbf16>
    %cst_18 = arith.constant dense<0.000000e+00> : vector<256x4xf32>
    %34 = tpu.matmul %31, %33, %cst_18 {dimension_numbers = #tpu.dot_dimension_numbers<[1], [0], [0], [1], [0, 0, 1, 1], [], []>} : vector<256x4xbf16>, vector<4x4xbf16>, vector<256x4xf32> -> vector<256x4xf32>
    %35 = arith.addf %28, %34 : vector<256x4xf32>
    %36 = vector.extract_strided_slice %6 {offsets = [1, 8, 0], sizes = [16, 16, 4], strides = [1, 1, 1]} : vector<18x32x4xf32> to vector<16x16x4xf32>
    %37 = vector.shape_cast %36 : vector<16x16x4xf32> to vector<256x4xf32>
    %38 = arith.truncf %37 : vector<256x4xf32> to vector<256x4xbf16>
    %39 = vector.extract_strided_slice %2 {offsets = [1, 1, 0, 0], sizes = [1, 1, 4, 4], strides = [1, 1, 1, 1]} : vector<3x3x4x4xbf16> to vector<1x1x4x4xbf16>
    %40 = vector.shape_cast %39 : vector<1x1x4x4xbf16> to vector<4x4xbf16>
    %cst_19 = arith.constant dense<0.000000e+00> : vector<256x4xf32>
    %41 = tpu.matmul %38, %40, %cst_19 {dimension_numbers = #tpu.dot_dimension_numbers<[1], [0], [0], [1], [0, 0, 1, 1], [], []>} : vector<256x4xbf16>, vector<4x4xbf16>, vector<256x4xf32> -> vector<256x4xf32>
    %42 = arith.addf %35, %41 : vector<256x4xf32>
    %43 = vector.extract_strided_slice %6 {offsets = [1, 9, 0], sizes = [16, 16, 4], strides = [1, 1, 1]} : vector<18x32x4xf32> to vector<16x16x4xf32>
    %44 = vector.shape_cast %43 : vector<16x16x4xf32> to vector<256x4xf32>
    %45 = arith.truncf %44 : vector<256x4xf32> to vector<256x4xbf16>
    %46 = vector.extract_strided_slice %2 {offsets = [1, 2, 0, 0], sizes = [1, 1, 4, 4], strides = [1, 1, 1, 1]} : vector<3x3x4x4xbf16> to vector<1x1x4x4xbf16>
    %47 = vector.shape_cast %46 : vector<1x1x4x4xbf16> to vector<4x4xbf16>
    %cst_20 = arith.constant dense<0.000000e+00> : vector<256x4xf32>
    %48 = tpu.matmul %45, %47, %cst_20 {dimension_numbers = #tpu.dot_dimension_numbers<[1], [0], [0], [1], [0, 0, 1, 1], [], []>} : vector<256x4xbf16>, vector<4x4xbf16>, vector<256x4xf32> -> vector<256x4xf32>
    %49 = arith.addf %42, %48 : vector<256x4xf32>
    %50 = vector.extract_strided_slice %6 {offsets = [2, 7, 0], sizes = [16, 16, 4], strides = [1, 1, 1]} : vector<18x32x4xf32> to vector<16x16x4xf32>
    %51 = vector.shape_cast %50 : vector<16x16x4xf32> to vector<256x4xf32>
    %52 = arith.truncf %51 : vector<256x4xf32> to vector<256x4xbf16>
    %53 = vector.extract_strided_slice %2 {offsets = [2, 0, 0, 0], sizes = [1, 1, 4, 4], strides = [1, 1, 1, 1]} : vector<3x3x4x4xbf16> to vector<1x1x4x4xbf16>
    %54 = vector.shape_cast %53 : vector<1x1x4x4xbf16> to vector<4x4xbf16>
    %cst_21 = arith.constant dense<0.000000e+00> : vector<256x4xf32>
    %55 = tpu.matmul %52, %54, %cst_21 {dimension_numbers = #tpu.dot_dimension_numbers<[1], [0], [0], [1], [0, 0, 1, 1], [], []>} : vector<256x4xbf16>, vector<4x4xbf16>, vector<256x4xf32> -> vector<256x4xf32>
    %56 = arith.addf %49, %55 : vector<256x4xf32>
    %57 = vector.extract_strided_slice %6 {offsets = [2, 8, 0], sizes = [16, 16, 4], strides = [1, 1, 1]} : vector<18x32x4xf32> to vector<16x16x4xf32>
    %58 = vector.shape_cast %57 : vector<16x16x4xf32> to vector<256x4xf32>
    %59 = arith.truncf %58 : vector<256x4xf32> to vector<256x4xbf16>
    %60 = vector.extract_strided_slice %2 {offsets = [2, 1, 0, 0], sizes = [1, 1, 4, 4], strides = [1, 1, 1, 1]} : vector<3x3x4x4xbf16> to vector<1x1x4x4xbf16>
    %61 = vector.shape_cast %60 : vector<1x1x4x4xbf16> to vector<4x4xbf16>
    %cst_22 = arith.constant dense<0.000000e+00> : vector<256x4xf32>
    %62 = tpu.matmul %59, %61, %cst_22 {dimension_numbers = #tpu.dot_dimension_numbers<[1], [0], [0], [1], [0, 0, 1, 1], [], []>} : vector<256x4xbf16>, vector<4x4xbf16>, vector<256x4xf32> -> vector<256x4xf32>
    %63 = arith.addf %56, %62 : vector<256x4xf32>
    %64 = vector.extract_strided_slice %6 {offsets = [2, 9, 0], sizes = [16, 16, 4], strides = [1, 1, 1]} : vector<18x32x4xf32> to vector<16x16x4xf32>
    %65 = vector.shape_cast %64 : vector<16x16x4xf32> to vector<256x4xf32>
    %66 = arith.truncf %65 : vector<256x4xf32> to vector<256x4xbf16>
    %67 = vector.extract_strided_slice %2 {offsets = [2, 2, 0, 0], sizes = [1, 1, 4, 4], strides = [1, 1, 1, 1]} : vector<3x3x4x4xbf16> to vector<1x1x4x4xbf16>
    %68 = vector.shape_cast %67 : vector<1x1x4x4xbf16> to vector<4x4xbf16>
    %cst_23 = arith.constant dense<0.000000e+00> : vector<256x4xf32>
    %69 = tpu.matmul %66, %68, %cst_23 {dimension_numbers = #tpu.dot_dimension_numbers<[1], [0], [0], [1], [0, 0, 1, 1], [], []>} : vector<256x4xbf16>, vector<4x4xbf16>, vector<256x4xf32> -> vector<256x4xf32>
    %70 = arith.addf %63, %69 : vector<256x4xf32>
    %c0_24 = arith.constant 0 : index
    %c0_25 = arith.constant 0 : index
    %71 = vector.load %arg3[%c0_24, %c0_25] : memref<1x4xf32, #tpu.memory_space<vmem>>, vector<1x4xf32>
    %72 = vector.broadcast %71 : vector<1x4xf32> to vector<256x4xf32>
    %73 = arith.addf %70, %72 : vector<256x4xf32>
    %cst_26 = arith.constant 0.000000e+00 : f32
    %74 = vector.broadcast %cst_26 : f32 to vector<256x4xf32>
    %75 = arith.maximumf %73, %74 : vector<256x4xf32>
    %76 = vector.shape_cast %75 : vector<256x4xf32> to vector<16x16x4xf32>
    %c0_27 = arith.constant 0 : index
    %c0_28 = arith.constant 0 : index
    %c0_29 = arith.constant 0 : index
    %c0_30 = arith.constant 0 : index
    %77 = vector.load %arg4[%c0_27, %c0_28, %c0_29, %c0_30] : memref<3x3x4x4xbf16, #tpu.memory_space<vmem>>, vector<3x3x4x4xbf16>
    %cst_31 = arith.constant 0.000000e+00 : f32
    %78 = vector.broadcast %cst_31 : f32 to vector<18x32x4xf32>
    %c0_32 = arith.constant 0 : index
    %c0_33 = arith.constant 0 : index
    %c0_34 = arith.constant 0 : index
    %79 = vector.load %arg8[%c0_32, %c0_33, %c0_34] : memref<18x32x4xf32, #tpu.memory_space<vmem>>, vector<18x32x4xf32>
    tpu.vector_store %arg8[%c0_32, %c0_33, %c0_34], %78 {strides = array<i32>} : memref<18x32x4xf32, #tpu.memory_space<vmem>>, vector<18x32x4xf32>,
    %c1_35 = arith.constant 1 : index
    %c8_36 = arith.constant 8 : index
    %c0_37 = arith.constant 0 : index
    %80 = vector.load %arg8[%c1_35, %c8_36, %c0_37] : memref<18x32x4xf32, #tpu.memory_space<vmem>>, vector<16x16x4xf32>
    tpu.vector_store %arg8[%c1_35, %c8_36, %c0_37], %76 {strides = array<i32>} : memref<18x32x4xf32, #tpu.memory_space<vmem>>, vector<16x16x4xf32>,
    %c0_38 = arith.constant 0 : index
    %c0_39 = arith.constant 0 : index
    %c0_40 = arith.constant 0 : index
    %81 = vector.load %arg8[%c0_38, %c0_39, %c0_40] : memref<18x32x4xf32, #tpu.memory_space<vmem>>, vector<18x32x4xf32>
    %cst_41 = arith.constant 0.000000e+00 : f32
    %82 = vector.broadcast %cst_41 : f32 to vector<256x4xf32>
    %83 = vector.extract_strided_slice %81 {offsets = [0, 7, 0], sizes = [16, 16, 4], strides = [1, 1, 1]} : vector<18x32x4xf32> to vector<16x16x4xf32>
    %84 = vector.shape_cast %83 : vector<16x16x4xf32> to vector<256x4xf32>
    %85 = arith.truncf %84 : vector<256x4xf32> to vector<256x4xbf16>
    %86 = vector.extract_strided_slice %77 {offsets = [0, 0, 0, 0], sizes = [1, 1, 4, 4], strides = [1, 1, 1, 1]} : vector<3x3x4x4xbf16> to vector<1x1x4x4xbf16>
    %87 = vector.shape_cast %86 : vector<1x1x4x4xbf16> to vector<4x4xbf16>
    %cst_42 = arith.constant dense<0.000000e+00> : vector<256x4xf32>
    %88 = tpu.matmul %85, %87, %cst_42 {dimension_numbers = #tpu.dot_dimension_numbers<[1], [0], [0], [1], [0, 0, 1, 1], [], []>} : vector<256x4xbf16>, vector<4x4xbf16>, vector<256x4xf32> -> vector<256x4xf32>
    %89 = arith.addf %82, %88 : vector<256x4xf32>
    %90 = vector.extract_strided_slice %81 {offsets = [0, 8, 0], sizes = [16, 16, 4], strides = [1, 1, 1]} : vector<18x32x4xf32> to vector<16x16x4xf32>
    %91 = vector.shape_cast %90 : vector<16x16x4xf32> to vector<256x4xf32>
    %92 = arith.truncf %91 : vector<256x4xf32> to vector<256x4xbf16>
    %93 = vector.extract_strided_slice %77 {offsets = [0, 1, 0, 0], sizes = [1, 1, 4, 4], strides = [1, 1, 1, 1]} : vector<3x3x4x4xbf16> to vector<1x1x4x4xbf16>
    %94 = vector.shape_cast %93 : vector<1x1x4x4xbf16> to vector<4x4xbf16>
    %cst_43 = arith.constant dense<0.000000e+00> : vector<256x4xf32>
    %95 = tpu.matmul %92, %94, %cst_43 {dimension_numbers = #tpu.dot_dimension_numbers<[1], [0], [0], [1], [0, 0, 1, 1], [], []>} : vector<256x4xbf16>, vector<4x4xbf16>, vector<256x4xf32> -> vector<256x4xf32>
    %96 = arith.addf %89, %95 : vector<256x4xf32>
    %97 = vector.extract_strided_slice %81 {offsets = [0, 9, 0], sizes = [16, 16, 4], strides = [1, 1, 1]} : vector<18x32x4xf32> to vector<16x16x4xf32>
    %98 = vector.shape_cast %97 : vector<16x16x4xf32> to vector<256x4xf32>
    %99 = arith.truncf %98 : vector<256x4xf32> to vector<256x4xbf16>
    %100 = vector.extract_strided_slice %77 {offsets = [0, 2, 0, 0], sizes = [1, 1, 4, 4], strides = [1, 1, 1, 1]} : vector<3x3x4x4xbf16> to vector<1x1x4x4xbf16>
    %101 = vector.shape_cast %100 : vector<1x1x4x4xbf16> to vector<4x4xbf16>
    %cst_44 = arith.constant dense<0.000000e+00> : vector<256x4xf32>
    %102 = tpu.matmul %99, %101, %cst_44 {dimension_numbers = #tpu.dot_dimension_numbers<[1], [0], [0], [1], [0, 0, 1, 1], [], []>} : vector<256x4xbf16>, vector<4x4xbf16>, vector<256x4xf32> -> vector<256x4xf32>
    %103 = arith.addf %96, %102 : vector<256x4xf32>
    %104 = vector.extract_strided_slice %81 {offsets = [1, 7, 0], sizes = [16, 16, 4], strides = [1, 1, 1]} : vector<18x32x4xf32> to vector<16x16x4xf32>
    %105 = vector.shape_cast %104 : vector<16x16x4xf32> to vector<256x4xf32>
    %106 = arith.truncf %105 : vector<256x4xf32> to vector<256x4xbf16>
    %107 = vector.extract_strided_slice %77 {offsets = [1, 0, 0, 0], sizes = [1, 1, 4, 4], strides = [1, 1, 1, 1]} : vector<3x3x4x4xbf16> to vector<1x1x4x4xbf16>
    %108 = vector.shape_cast %107 : vector<1x1x4x4xbf16> to vector<4x4xbf16>
    %cst_45 = arith.constant dense<0.000000e+00> : vector<256x4xf32>
    %109 = tpu.matmul %106, %108, %cst_45 {dimension_numbers = #tpu.dot_dimension_numbers<[1], [0], [0], [1], [0, 0, 1, 1], [], []>} : vector<256x4xbf16>, vector<4x4xbf16>, vector<256x4xf32> -> vector<256x4xf32>
    %110 = arith.addf %103, %109 : vector<256x4xf32>
    %111 = vector.extract_strided_slice %81 {offsets = [1, 8, 0], sizes = [16, 16, 4], strides = [1, 1, 1]} : vector<18x32x4xf32> to vector<16x16x4xf32>
    %112 = vector.shape_cast %111 : vector<16x16x4xf32> to vector<256x4xf32>
    %113 = arith.truncf %112 : vector<256x4xf32> to vector<256x4xbf16>
    %114 = vector.extract_strided_slice %77 {offsets = [1, 1, 0, 0], sizes = [1, 1, 4, 4], strides = [1, 1, 1, 1]} : vector<3x3x4x4xbf16> to vector<1x1x4x4xbf16>
    %115 = vector.shape_cast %114 : vector<1x1x4x4xbf16> to vector<4x4xbf16>
    %cst_46 = arith.constant dense<0.000000e+00> : vector<256x4xf32>
    %116 = tpu.matmul %113, %115, %cst_46 {dimension_numbers = #tpu.dot_dimension_numbers<[1], [0], [0], [1], [0, 0, 1, 1], [], []>} : vector<256x4xbf16>, vector<4x4xbf16>, vector<256x4xf32> -> vector<256x4xf32>
    %117 = arith.addf %110, %116 : vector<256x4xf32>
    %118 = vector.extract_strided_slice %81 {offsets = [1, 9, 0], sizes = [16, 16, 4], strides = [1, 1, 1]} : vector<18x32x4xf32> to vector<16x16x4xf32>
    %119 = vector.shape_cast %118 : vector<16x16x4xf32> to vector<256x4xf32>
    %120 = arith.truncf %119 : vector<256x4xf32> to vector<256x4xbf16>
    %121 = vector.extract_strided_slice %77 {offsets = [1, 2, 0, 0], sizes = [1, 1, 4, 4], strides = [1, 1, 1, 1]} : vector<3x3x4x4xbf16> to vector<1x1x4x4xbf16>
    %122 = vector.shape_cast %121 : vector<1x1x4x4xbf16> to vector<4x4xbf16>
    %cst_47 = arith.constant dense<0.000000e+00> : vector<256x4xf32>
    %123 = tpu.matmul %120, %122, %cst_47 {dimension_numbers = #tpu.dot_dimension_numbers<[1], [0], [0], [1], [0, 0, 1, 1], [], []>} : vector<256x4xbf16>, vector<4x4xbf16>, vector<256x4xf32> -> vector<256x4xf32>
    %124 = arith.addf %117, %123 : vector<256x4xf32>
    %125 = vector.extract_strided_slice %81 {offsets = [2, 7, 0], sizes = [16, 16, 4], strides = [1, 1, 1]} : vector<18x32x4xf32> to vector<16x16x4xf32>
    %126 = vector.shape_cast %125 : vector<16x16x4xf32> to vector<256x4xf32>
    %127 = arith.truncf %126 : vector<256x4xf32> to vector<256x4xbf16>
    %128 = vector.extract_strided_slice %77 {offsets = [2, 0, 0, 0], sizes = [1, 1, 4, 4], strides = [1, 1, 1, 1]} : vector<3x3x4x4xbf16> to vector<1x1x4x4xbf16>
    %129 = vector.shape_cast %128 : vector<1x1x4x4xbf16> to vector<4x4xbf16>
    %cst_48 = arith.constant dense<0.000000e+00> : vector<256x4xf32>
    %130 = tpu.matmul %127, %129, %cst_48 {dimension_numbers = #tpu.dot_dimension_numbers<[1], [0], [0], [1], [0, 0, 1, 1], [], []>} : vector<256x4xbf16>, vector<4x4xbf16>, vector<256x4xf32> -> vector<256x4xf32>
    %131 = arith.addf %124, %130 : vector<256x4xf32>
    %132 = vector.extract_strided_slice %81 {offsets = [2, 8, 0], sizes = [16, 16, 4], strides = [1, 1, 1]} : vector<18x32x4xf32> to vector<16x16x4xf32>
    %133 = vector.shape_cast %132 : vector<16x16x4xf32> to vector<256x4xf32>
    %134 = arith.truncf %133 : vector<256x4xf32> to vector<256x4xbf16>
    %135 = vector.extract_strided_slice %77 {offsets = [2, 1, 0, 0], sizes = [1, 1, 4, 4], strides = [1, 1, 1, 1]} : vector<3x3x4x4xbf16> to vector<1x1x4x4xbf16>
    %136 = vector.shape_cast %135 : vector<1x1x4x4xbf16> to vector<4x4xbf16>
    %cst_49 = arith.constant dense<0.000000e+00> : vector<256x4xf32>
    %137 = tpu.matmul %134, %136, %cst_49 {dimension_numbers = #tpu.dot_dimension_numbers<[1], [0], [0], [1], [0, 0, 1, 1], [], []>} : vector<256x4xbf16>, vector<4x4xbf16>, vector<256x4xf32> -> vector<256x4xf32>
    %138 = arith.addf %131, %137 : vector<256x4xf32>
    %139 = vector.extract_strided_slice %81 {offsets = [2, 9, 0], sizes = [16, 16, 4], strides = [1, 1, 1]} : vector<18x32x4xf32> to vector<16x16x4xf32>
    %140 = vector.shape_cast %139 : vector<16x16x4xf32> to vector<256x4xf32>
    %141 = arith.truncf %140 : vector<256x4xf32> to vector<256x4xbf16>
    %142 = vector.extract_strided_slice %77 {offsets = [2, 2, 0, 0], sizes = [1, 1, 4, 4], strides = [1, 1, 1, 1]} : vector<3x3x4x4xbf16> to vector<1x1x4x4xbf16>
    %143 = vector.shape_cast %142 : vector<1x1x4x4xbf16> to vector<4x4xbf16>
    %cst_50 = arith.constant dense<0.000000e+00> : vector<256x4xf32>
    %144 = tpu.matmul %141, %143, %cst_50 {dimension_numbers = #tpu.dot_dimension_numbers<[1], [0], [0], [1], [0, 0, 1, 1], [], []>} : vector<256x4xbf16>, vector<4x4xbf16>, vector<256x4xf32> -> vector<256x4xf32>
    %145 = arith.addf %138, %144 : vector<256x4xf32>
    %c0_51 = arith.constant 0 : index
    %c0_52 = arith.constant 0 : index
    %146 = vector.load %arg5[%c0_51, %c0_52] : memref<1x4xf32, #tpu.memory_space<vmem>>, vector<1x4xf32>
    %147 = vector.broadcast %146 : vector<1x4xf32> to vector<256x4xf32>
    %148 = arith.addf %145, %147 : vector<256x4xf32>
    %149 = vector.shape_cast %1 : vector<16x16x4xf32> to vector<256x4xf32>
    %150 = arith.addf %148, %149 : vector<256x4xf32>
    %cst_53 = arith.constant 0.000000e+00 : f32
    %151 = vector.broadcast %cst_53 : f32 to vector<256x4xf32>
    %152 = arith.maximumf %150, %151 : vector<256x4xf32>
    %153 = vector.shape_cast %152 : vector<256x4xf32> to vector<1x16x16x4xf32>
    %c0_54 = arith.constant 0 : index
    %c0_55 = arith.constant 0 : index
    %c0_56 = arith.constant 0 : index
    %c0_57 = arith.constant 0 : index
    %154 = vector.load %arg6[%c0_54, %c0_55, %c0_56, %c0_57] : memref<1x16x16x4xf32, #tpu.memory_space<vmem>>, vector<1x16x16x4xf32>
    tpu.vector_store %arg6[%c0_54, %c0_55, %c0_56, %c0_57], %153 {strides = array<i32>} : memref<1x16x16x4xf32, #tpu.memory_space<vmem>>, vector<1x16x16x4xf32>,
    return
  }
  func.func @transform_0(%arg0: i32) -> (i32, i32, i32, i32) {
    %c0_i32 = arith.constant 0 : i32
    %c0_i32_0 = arith.constant 0 : i32
    %c0_i32_1 = arith.constant 0 : i32
    %c0_i32_2 = arith.constant 0 : i32
    return %arg0, %c0_i32, %c0_i32_0, %c0_i32_1 : i32, i32, i32, i32
  }
  func.func @transform_1(%arg0: i32) -> (i32, i32, i32, i32) {
    %c0_i32 = arith.constant 0 : i32
    %c0_i32_0 = arith.constant 0 : i32
    %c0_i32_1 = arith.constant 0 : i32
    %c0_i32_2 = arith.constant 0 : i32
    %c0_i32_3 = arith.constant 0 : i32
    return %c0_i32, %c0_i32_0, %c0_i32_1, %c0_i32_2 : i32, i32, i32, i32
  }
  func.func @transform_2(%arg0: i32) -> (i32, i32) {
    %c0_i32 = arith.constant 0 : i32
    %c0_i32_0 = arith.constant 0 : i32
    %c0_i32_1 = arith.constant 0 : i32
    return %c0_i32, %c0_i32_0 : i32, i32
  }
  func.func @transform_3(%arg0: i32) -> (i32, i32, i32, i32) {
    %c0_i32 = arith.constant 0 : i32
    %c0_i32_0 = arith.constant 0 : i32
    %c0_i32_1 = arith.constant 0 : i32
    %c0_i32_2 = arith.constant 0 : i32
    %c0_i32_3 = arith.constant 0 : i32
    return %c0_i32, %c0_i32_0, %c0_i32_1, %c0_i32_2 : i32, i32, i32, i32
  }
  func.func @transform_4(%arg0: i32) -> (i32, i32) {
    %c0_i32 = arith.constant 0 : i32
    %c0_i32_0 = arith.constant 0 : i32
    %c0_i32_1 = arith.constant 0 : i32
    return %c0_i32, %c0_i32_0 : i32, i32
  }
  func.func @transform_5(%arg0: i32) -> (i32, i32, i32, i32) {
    %c0_i32 = arith.constant 0 : i32
    %c0_i32_0 = arith.constant 0 : i32
    %c0_i32_1 = arith.constant 0 : i32
    %c0_i32_2 = arith.constant 0 : i32
    return %arg0, %c0_i32, %c0_i32_0, %c0_i32_1 : i32, i32, i32, i32
  }
}

</mosaic_0001>

<bundles_post_ra>
// kernel: tpu_custom_call.1
= control target key start
LH: loop header
LB: loop body
LE: loop exit
PB: predicated region body
PF: predicated region fallthrough
CT: control target
= control target key end

     0   :  { %s7174_s18 = smov 0   ;;  %s9285_s0 = inlined_call_operand.vmem [shape: f32[2,16,16,4], index: 0, kind: input, shape index: {}]   ;;  %s9286_s1 = inlined_call_operand.vmem [shape: bf16[3,3,4,4], index: 1, kind: input, shape index: {}]   ;;  %s9287_s2 = inlined_call_operand.vmem [shape: f32[1,4], index: 2, kind: input, shape index: {}]   ;;  %s9288_s3 = inlined_call_operand.vmem [shape: bf16[3,3,4,4], index: 3, kind: input, shape index: {}]   ;;  %s9289_s4 = inlined_call_operand.vmem [shape: f32[1,4], index: 4, kind: input, shape index: {}]   ;;  %s9290_s5 = inlined_call_operand.vmem [shape: f32[2,16,16,4], index: 5, kind: output, shape index: {}]  }
   0x1 LB: > { %s5375_s19 = sadd.s32 4294967295, %s7141_s18   ;;  %p5379_p0 = scmp.ge.s32.totalorder %s7141_s18, 1  ;;  %s7141_s18 = sphi %s7174_s18, %s15_s18  }
   0x2   : > { %p187_p1 = scmp.lt.s32.totalorder %s7141_s18, 3 }
   0x4   : > { %p188_p2 = pnand %p5379_p0, %p187_p1 }
   0x6   : > { %191 = sbr.rel (%p188_p2) target bundleno = 1629 (0x65d), region = 40 }
   0xd   : > { %v259_v0 = vld [vmem:[%s9286_s1 + $0x2] sm:$0x3]  ;;  %vm686_vm0 = vcmask 1041408   ;;  %vm267_vm1 = vcmask 31744   ;;  %p7187_p3 = scmp.lt.s32.totalorder %s5375_s19, 1  ;;  %v7143_v2 = vmov 0.0  }
   0xe   : > { %7108 = vmatprep.subr.msk.bf16.mxu0 %vm686_vm0, %v259_v0  ;;  %v7193_v1 = vsel %vm686_vm0, %v259_v0, 0  ;;  %269 = vst.msk [vmem:[#allocation2 + $0x8] sm:$0xff] %vm267_vm1, %v7143_v2  ;;  %270 = vst.msk [vmem:[#allocation2 + $0x10] sm:$0xff] %vm267_vm1, %v7143_v2  ;;  %v258_v3 = vld [vmem:[%s9286_s1] sm:$0x3]  ;;  %vm1079_vm2 = vcmask 1046528  }
   0xf   : > { %268 = vst.msk [vmem:[#allocation2] sm:$0xff] %vm267_vm1, %v7143_v2  ;;  %271 = vst.msk [vmem:[#allocation2 + $0x18] sm:$0xff] %vm267_vm1, %v7143_v2  ;;  %5985 = vmatpush3.bf16.msra.mxu0 %v7193_v1  ;;  %s9562_s19 = smov (!%p7187_p3, %s5375_s19), 1  ;;  %v900_v35 = vsel %vm686_vm0, %v258_v3, 0  ;;  %v7633_v37 = vld [vmem:[%s9286_s1 + $0x4] sm:$0x3] }
  0x10   : > { %272 = vst.msk [vmem:[#allocation2 + $0x20] sm:$0xff] %vm267_vm1, %v7143_v2  ;;  %273 = vst.msk [vmem:[#allocation2 + $0x28] sm:$0xff] %vm267_vm1, %v7143_v2  ;;  %7109 = vmatprep.subr.msk.bf16.mxu0 %vm686_vm0, %v258_v3  ;;  %s5676_s25 = sshll.u32 %s9562_s19, 8  ;;  %vm493_vm3 = vcmask 1040384  }
  0x11   : > { %274 = vst.msk [vmem:[#allocation2 + $0x30] sm:$0xff] %vm267_vm1, %v7143_v2  ;;  %275 = vst.msk [vmem:[#allocation2 + $0x38] sm:$0xff] %vm267_vm1, %v7143_v2  ;;  %s7500_s28 = scalar_lea.vmem %s9285_s0, %s5676_s25  ;;  %s9156_s22 = scalar_lea.vmem %s9290_s5, %s5676_s25 }
  0x12   : > { %276 = vst.msk [vmem:[#allocation2 + $0x40] sm:$0xff] %vm267_vm1, %v7143_v2  ;;  %277 = vst.msk [vmem:[#allocation2 + $0x48] sm:$0xff] %vm267_vm1, %v7143_v2  ;;  %v7503_v4 = vld [vmem:[%s7500_s28] sm:$0xff]  ;;  %v7506_v5 = vld [vmem:[%s7500_s28 + $0x8] sm:$0xff] }
  0x13   : > { %278 = vst.msk [vmem:[#allocation2 + $0x50] sm:$0xff] %vm267_vm1, %v7143_v2  ;;  %279 = vst.msk [vmem:[#allocation2 + $0x58] sm:$0xff] %vm267_vm1, %v7143_v2  ;;  %v7509_v6 = vld [vmem:[%s7500_s28 + $0x10] sm:$0xff]  ;;  %v7516_v7 = vld [vmem:[%s7500_s28 + $0x18] sm:$0xff] }
  0x14   : > { %280 = vst.msk [vmem:[#allocation2 + $0x60] sm:$0xff] %vm267_vm1, %v7143_v2  ;;  %281 = vst.msk [vmem:[#allocation2 + $0x68] sm:$0xff] %vm267_vm1, %v7143_v2  ;;  %v7521_v8 = vld [vmem:[%s7500_s28 + $0x20] sm:$0xff]  ;;  %v7524_v9 = vld [vmem:[%s7500_s28 + $0x28] sm:$0xff] }
  0x15   : > { %282 = vst.msk [vmem:[#allocation2 + $0x70] sm:$0xff] %vm267_vm1, %v7143_v2  ;;  %283 = vst.msk [vmem:[#allocation2 + $0x78] sm:$0xff] %vm267_vm1, %v7143_v2  ;;  %v7526_v10 = vld [vmem:[#allocation2 + $0x8] sm:$0xff]  ;;  %v7528_v11 = vld [vmem:[#allocation2 + $0x10] sm:$0xff] }
  0x16   : > { %284 = vst.msk [vmem:[#allocation2 + $0x80] sm:$0xff] %vm267_vm1, %v7143_v2  ;;  %285 = vst.msk [vmem:[#allocation2 + $0x88] sm:$0xff] %vm267_vm1, %v7143_v2  ;;  %v622_v12 = vpack.c.bf16 %v7528_v11, %v7526_v10  ;;  %v1080_v13 = vrot.slane %v7526_v10, 1  ;;  %v7540_v14 = vld [vmem:[%s7500_s28 + $0x30] sm:$0xff]  ;;  %v7543_v15 = vld [vmem:[%s7500_s28 + $0x38] sm:$0xff]  ;;  %v9291_v16 = vrot.slane %v7528_v11, 1 }
  0x17   : > { %286 = vst.msk [vmem:[#allocation2 + $0x90] sm:$0xff] %vm267_vm1, %v7143_v2  ;;  %287 = vst.msk [vmem:[#allocation2 + $0x98] sm:$0xff] %vm267_vm1, %v7143_v2  ;;  %v7551_v17 = vld [vmem:[%s7500_s28 + $0x40] sm:$0xff]  ;;  %v7554_v18 = vld [vmem:[%s7500_s28 + $0x48] sm:$0xff] }
  0x18   : > { %288 = vst.msk [vmem:[#allocation2 + $0xa0] sm:$0xff] %vm267_vm1, %v7143_v2  ;;  %289 = vst.msk [vmem:[#allocation2 + $0xa8] sm:$0xff] %vm267_vm1, %v7143_v2  ;;  %v7557_v19 = vld [vmem:[%s7500_s28 + $0x50] sm:$0xff]  ;;  %5986 = vmatprep.mubr.msk.bf16.mxu0 %vm267_vm1, %v622_v12  ;;  %v7565_v20 = vld [vmem:[%s7500_s28 + $0x58] sm:$0xff]  ;;  %v7593_v26 = vsel %vm1079_vm2, %v1080_v13, %v9291_v16 }
  0x19   : > { %290 = vst.msk [vmem:[#allocation2 + $0xb0] sm:$0xff] %vm267_vm1, %v7143_v2  ;;  %291 = vst.msk [vmem:[#allocation2 + $0xb8] sm:$0xff] %vm267_vm1, %v7143_v2  ;;  %v7570_v21 = vld [vmem:[%s7500_s28 + $0x60] sm:$0xff]  ;;  %v7573_v22 = vld [vmem:[%s7500_s28 + $0x68] sm:$0xff] }
  0x1a   : > { %292 = vst.msk [vmem:[#allocation2 + $0xc0] sm:$0xff] %vm267_vm1, %v7143_v2  ;;  %293 = vst.msk [vmem:[#allocation2 + $0xc8] sm:$0xff] %vm267_vm1, %v7143_v2  ;;  %v7582_v23 = vld [vmem:[%s7500_s28 + $0x70] sm:$0xff]  ;;  %v7585_v24 = vld [vmem:[%s7500_s28 + $0x78] sm:$0xff] }
  0x1b   : > { %294 = vst.msk [vmem:[#allocation2 + $0xd0] sm:$0xff] %vm267_vm1, %v7143_v2  ;;  %295 = vst.msk [vmem:[#allocation2 + $0xd8] sm:$0xff] %vm267_vm1, %v7143_v2  ;;  %v7588_v25 = vld [vmem:[%s7500_s28 + $0x80] sm:$0xff]  ;;  %v7600_v27 = vld [vmem:[%s7500_s28 + $0x88] sm:$0xff] }
  0x1c   : > { %296 = vst.msk [vmem:[#allocation2 + $0xe0] sm:$0xff] %vm267_vm1, %v7143_v2  ;;  %297 = vst.msk [vmem:[#allocation2 + $0xe8] sm:$0xff] %vm267_vm1, %v7143_v2  ;;  %v7605_v28 = vld [vmem:[%s7500_s28 + $0x90] sm:$0xff]  ;;  %v7608_v29 = vld [vmem:[%s7500_s28 + $0x98] sm:$0xff] }
  0x1d   : > { %298 = vst.msk [vmem:[#allocation2 + $0xf0] sm:$0xff] %vm267_vm1, %v7143_v2  ;;  %299 = vst.msk [vmem:[#allocation2 + $0xf8] sm:$0xff] %vm267_vm1, %v7143_v2  ;;  %v7641_v40 = vld [vmem:[%s7500_s28 + $0xa0] sm:$0xff]  ;;  %v7644_v41 = vld [vmem:[%s7500_s28 + $0xa8] sm:$0xff] }
  0x1e   : > { %300 = vst.msk [vmem:[#allocation2 + $0x100] sm:$0xff] %vm267_vm1, %v7143_v2  ;;  %301 = vst.msk [vmem:[#allocation2 + $0x108] sm:$0xff] %vm267_vm1, %v7143_v2  ;;  %v7647_v42 = vld [vmem:[%s7500_s28 + $0xb0] sm:$0xff]  ;;  %v7656_v43 = vld [vmem:[%s7500_s28 + $0xb8] sm:$0xff] }
  0x1f   : > { %302 = vst.msk [vmem:[#allocation2 + $0x110] sm:$0xff] %vm267_vm1, %v7143_v2  ;;  %303 = vst.msk [vmem:[#allocation2 + $0x118] sm:$0xff] %vm267_vm1, %v7143_v2  ;;  %v7688_v51 = vld [vmem:[%s7500_s28 + $0xc0] sm:$0xff]  ;;  %v7691_v52 = vld [vmem:[%s7500_s28 + $0xc8] sm:$0xff] }
  0x20   : > { %304 = vst.msk [vmem:[#allocation2 + $0x120] sm:$0xff] %vm267_vm1, %v7143_v2  ;;  %305 = vst.msk [vmem:[#allocation2 + $0x128] sm:$0xff] %vm267_vm1, %v7143_v2  ;;  %v7694_v53 = vld [vmem:[%s7500_s28 + $0xd0] sm:$0xff]  ;;  %v7701_v54 = vld [vmem:[%s7500_s28 + $0xd8] sm:$0xff] }
  0x21   : > { %306 = vst.msk [vmem:[#allocation2 + $0x130] sm:$0xff] %vm267_vm1, %v7143_v2  ;;  %307 = vst.msk [vmem:[#allocation2 + $0x138] sm:$0xff] %vm267_vm1, %v7143_v2  ;;  %v7706_v55 = vld [vmem:[%s7500_s28 + $0xe0] sm:$0xff]  ;;  %v7715_v56 = vld [vmem:[%s7500_s28 + $0xe8] sm:$0xff] }
  0x22   : > { %308 = vst.msk [vmem:[#allocation2 + $0x140] sm:$0xff] %vm267_vm1, %v7143_v2  ;;  %309 = vst.msk [vmem:[#allocation2 + $0x148] sm:$0xff] %vm267_vm1, %v7143_v2  ;;  %v380_v3 = vld [vmem:[#allocation2 + $0x38] sm:$0xff] }
  0x23   : > { %310 = vst.msk [vmem:[#allocation2 + $0x150] sm:$0xff] %vm267_vm1, %v7143_v2  ;;  %311 = vst.msk [vmem:[#allocation2 + $0x158] sm:$0xff] %vm267_vm1, %v7143_v2 }
  0x24   : > { %312 = vst.msk [vmem:[#allocation2 + $0x160] sm:$0xff] %vm267_vm1, %v7143_v2  ;;  %313 = vst.msk [vmem:[#allocation2 + $0x168] sm:$0xff] %vm267_vm1, %v7143_v2 }
  0x25   : > { %314 = vst.msk [vmem:[#allocation2 + $0x170] sm:$0xff] %vm267_vm1, %v7143_v2  ;;  %315 = vst.msk [vmem:[#allocation2 + $0x178] sm:$0xff] %vm267_vm1, %v7143_v2 }
  0x26   : > { %316 = vst.msk [vmem:[#allocation2 + $0x180] sm:$0xff] %vm267_vm1, %v7143_v2  ;;  %317 = vst.msk [vmem:[#allocation2 + $0x188] sm:$0xff] %vm267_vm1, %v7143_v2 }
  0x27   : > { %318 = vst.msk [vmem:[#allocation2 + $0x190] sm:$0xff] %vm267_vm1, %v7143_v2  ;;  %319 = vst.msk [vmem:[#allocation2 + $0x198] sm:$0xff] %vm267_vm1, %v7143_v2 }
  0x28   : > { %320 = vst.msk [vmem:[#allocation2 + $0x1a0] sm:$0xff] %vm267_vm1, %v7143_v2  ;;  %321 = vst.msk [vmem:[#allocation2 + $0x1a8] sm:$0xff] %vm267_vm1, %v7143_v2 }
  0x29   : > { %322 = vst.msk [vmem:[#allocation2 + $0x1b0] sm:$0xff] %vm267_vm1, %v7143_v2  ;;  %323 = vst.msk [vmem:[#allocation2 + $0x1b8] sm:$0xff] %vm267_vm1, %v7143_v2 }
  0x2a   : > { %324 = vst.msk [vmem:[#allocation2 + $0x1c0] sm:$0xff] %vm267_vm1, %v7143_v2  ;;  %325 = vst.msk [vmem:[#allocation2 + $0x1c8] sm:$0xff] %vm267_vm1, %v7143_v2 }
  0x2b   : > { %326 = vst.msk [vmem:[#allocation2 + $0x1d0] sm:$0xff] %vm267_vm1, %v7143_v2  ;;  %327 = vst.msk [vmem:[#allocation2 + $0x1d8] sm:$0xff] %vm267_vm1, %v7143_v2 }
  0x2c   : > { %328 = vst.msk [vmem:[#allocation2 + $0x1e0] sm:$0xff] %vm267_vm1, %v7143_v2  ;;  %329 = vst.msk [vmem:[#allocation2 + $0x1e8] sm:$0xff] %vm267_vm1, %v7143_v2 }
  0x2d   : > { %330 = vst.msk [vmem:[#allocation2 + $0x1f0] sm:$0xff] %vm267_vm1, %v7143_v2  ;;  %331 = vst.msk [vmem:[#allocation2 + $0x1f8] sm:$0xff] %vm267_vm1, %v7143_v2 }
  0x2e   : > { %332 = vst.msk [vmem:[#allocation2 + $0x200] sm:$0xff] %vm267_vm1, %v7143_v2  ;;  %333 = vst.msk [vmem:[#allocation2 + $0x208] sm:$0xff] %vm267_vm1, %v7143_v2 }
  0x2f   : > { %334 = vst.msk [vmem:[#allocation2 + $0x210] sm:$0xff] %vm267_vm1, %v7143_v2  ;;  %335 = vst.msk [vmem:[#allocation2 + $0x218] sm:$0xff] %vm267_vm1, %v7143_v2 }
  0x30   : > { %336 = vst.msk [vmem:[#allocation2 + $0x220] sm:$0xff] %vm267_vm1, %v7143_v2  ;;  %337 = vst.msk [vmem:[#allocation2 + $0x228] sm:$0xff] %vm267_vm1, %v7143_v2 }
  0x31   : > { %338 = vst.msk [vmem:[#allocation2 + $0x230] sm:$0xff] %vm267_vm1, %v7143_v2  ;;  %339 = vst.msk [vmem:[#allocation2 + $0x238] sm:$0xff] %vm267_vm1, %v7143_v2 }
  0x32   : > { %2768 = vst.msk [vmem:[#allocation3] sm:$0xff] %vm267_vm1, %v7143_v2  ;;  %2769 = vst.msk [vmem:[#allocation3 + $0x8] sm:$0xff] %vm267_vm1, %v7143_v2 }
  0x33   : > { %2770 = vst.msk [vmem:[#allocation3 + $0x10] sm:$0xff] %vm267_vm1, %v7143_v2  ;;  %2771 = vst.msk [vmem:[#allocation3 + $0x18] sm:$0xff] %vm267_vm1, %v7143_v2 }
  0x34   : > { %2772 = vst.msk [vmem:[#allocation3 + $0x20] sm:$0xff] %vm267_vm1, %v7143_v2  ;;  %2773 = vst.msk [vmem:[#allocation3 + $0x28] sm:$0xff] %vm267_vm1, %v7143_v2 }
  0x35   : > { %2774 = vst.msk [vmem:[#allocation3 + $0x30] sm:$0xff] %vm267_vm1, %v7143_v2  ;;  %2775 = vst.msk [vmem:[#allocation3 + $0x38] sm:$0xff] %vm267_vm1, %v7143_v2 }
  0x36   : > { %2776 = vst.msk [vmem:[#allocation3 + $0x40] sm:$0xff] %vm267_vm1, %v7143_v2  ;;  %2777 = vst.msk [vmem:[#allocation3 + $0x48] sm:$0xff] %vm267_vm1, %v7143_v2 }
  0x37   : > { %2778 = vst.msk [vmem:[#allocation3 + $0x50] sm:$0xff] %vm267_vm1, %v7143_v2  ;;  %2779 = vst.msk [vmem:[#allocation3 + $0x58] sm:$0xff] %vm267_vm1, %v7143_v2 }
  0x38   : > { %2780 = vst.msk [vmem:[#allocation3 + $0x60] sm:$0xff] %vm267_vm1, %v7143_v2  ;;  %2781 = vst.msk [vmem:[#allocation3 + $0x68] sm:$0xff] %vm267_vm1, %v7143_v2 }
  0x39   : > { %2782 = vst.msk [vmem:[#allocation3 + $0x70] sm:$0xff] %vm267_vm1, %v7143_v2  ;;  %2783 = vst.msk [vmem:[#allocation3 + $0x78] sm:$0xff] %vm267_vm1, %v7143_v2 }
  0x3a   : > { %2784 = vst.msk [vmem:[#allocation3 + $0x80] sm:$0xff] %vm267_vm1, %v7143_v2  ;;  %2785 = vst.msk [vmem:[#allocation3 + $0x88] sm:$0xff] %vm267_vm1, %v7143_v2 }
  0x3b   : > { %2786 = vst.msk [vmem:[#allocation3 + $0x90] sm:$0xff] %vm267_vm1, %v7143_v2  ;;  %2787 = vst.msk [vmem:[#allocation3 + $0x98] sm:$0xff] %vm267_vm1, %v7143_v2 }
  0x3c   : > { %2788 = vst.msk [vmem:[#allocation3 + $0xa0] sm:$0xff] %vm267_vm1, %v7143_v2  ;;  %2789 = vst.msk [vmem:[#allocation3 + $0xa8] sm:$0xff] %vm267_vm1, %v7143_v2 }
  0x3d   : > { %2790 = vst.msk [vmem:[#allocation3 + $0xb0] sm:$0xff] %vm267_vm1, %v7143_v2  ;;  %2791 = vst.msk [vmem:[#allocation3 + $0xb8] sm:$0xff] %vm267_vm1, %v7143_v2 }
  0x3e   : > { %2792 = vst.msk [vmem:[#allocation3 + $0xc0] sm:$0xff] %vm267_vm1, %v7143_v2  ;;  %2793 = vst.msk [vmem:[#allocation3 + $0xc8] sm:$0xff] %vm267_vm1, %v7143_v2 }
  0x3f   : > { %2794 = vst.msk [vmem:[#allocation3 + $0xd0] sm:$0xff] %vm267_vm1, %v7143_v2  ;;  %2795 = vst.msk [vmem:[#allocation3 + $0xd8] sm:$0xff] %vm267_vm1, %v7143_v2 }
  0x40   : > { %2796 = vst.msk [vmem:[#allocation3 + $0xe0] sm:$0xff] %vm267_vm1, %v7143_v2  ;;  %2797 = vst.msk [vmem:[#allocation3 + $0xe8] sm:$0xff] %vm267_vm1, %v7143_v2 }
  0x41   : > { %2798 = vst.msk [vmem:[#allocation3 + $0xf0] sm:$0xff] %vm267_vm1, %v7143_v2  ;;  %2799 = vst.msk [vmem:[#allocation3 + $0xf8] sm:$0xff] %vm267_vm1, %v7143_v2 }
  0x42   : > { %2800 = vst.msk [vmem:[#allocation3 + $0x100] sm:$0xff] %vm267_vm1, %v7143_v2  ;;  %2801 = vst.msk [vmem:[#allocation3 + $0x108] sm:$0xff] %vm267_vm1, %v7143_v2 }
  0x43   : > { %2802 = vst.msk [vmem:[#allocation3 + $0x110] sm:$0xff] %vm267_vm1, %v7143_v2  ;;  %2803 = vst.msk [vmem:[#allocation3 + $0x118] sm:$0xff] %vm267_vm1, %v7143_v2 }
  0x44   : > { %2804 = vst.msk [vmem:[#allocation3 + $0x120] sm:$0xff] %vm267_vm1, %v7143_v2  ;;  %2805 = vst.msk [vmem:[#allocation3 + $0x128] sm:$0xff] %vm267_vm1, %v7143_v2 }
  0x45   : > { %2806 = vst.msk [vmem:[#allocation3 + $0x130] sm:$0xff] %vm267_vm1, %v7143_v2  ;;  %2807 = vst.msk [vmem:[#allocation3 + $0x138] sm:$0xff] %vm267_vm1, %v7143_v2 }
  0x46   : > { %2808 = vst.msk [vmem:[#allocation3 + $0x140] sm:$0xff] %vm267_vm1, %v7143_v2  ;;  %2809 = vst.msk [vmem:[#allocation3 + $0x148] sm:$0xff] %vm267_vm1, %v7143_v2 }
  0x47   : > { %2810 = vst.msk [vmem:[#allocation3 + $0x150] sm:$0xff] %vm267_vm1, %v7143_v2  ;;  %2811 = vst.msk [vmem:[#allocation3 + $0x158] sm:$0xff] %vm267_vm1, %v7143_v2 }
  0x48   : > { %2812 = vst.msk [vmem:[#allocation3 + $0x160] sm:$0xff] %vm267_vm1, %v7143_v2  ;;  %2813 = vst.msk [vmem:[#allocation3 + $0x168] sm:$0xff] %vm267_vm1, %v7143_v2 }
  0x49   : > { %2814 = vst.msk [vmem:[#allocation3 + $0x170] sm:$0xff] %vm267_vm1, %v7143_v2  ;;  %2815 = vst.msk [vmem:[#allocation3 + $0x178] sm:$0xff] %vm267_vm1, %v7143_v2 }
  0x4a   : > { %2816 = vst.msk [vmem:[#allocation3 + $0x180] sm:$0xff] %vm267_vm1, %v7143_v2  ;;  %2817 = vst.msk [vmem:[#allocation3 + $0x188] sm:$0xff] %vm267_vm1, %v7143_v2 }
  0x4b   : > { %2818 = vst.msk [vmem:[#allocation3 + $0x190] sm:$0xff] %vm267_vm1, %v7143_v2  ;;  %2819 = vst.msk [vmem:[#allocation3 + $0x198] sm:$0xff] %vm267_vm1, %v7143_v2 }
  0x4c   : > { %2820 = vst.msk [vmem:[#allocation3 + $0x1a0] sm:$0xff] %vm267_vm1, %v7143_v2  ;;  %2821 = vst.msk [vmem:[#allocation3 + $0x1a8] sm:$0xff] %vm267_vm1, %v7143_v2 }
  0x4d   : > { %2822 = vst.msk [vmem:[#allocation3 + $0x1b0] sm:$0xff] %vm267_vm1, %v7143_v2  ;;  %2823 = vst.msk [vmem:[#allocation3 + $0x1b8] sm:$0xff] %vm267_vm1, %v7143_v2 }
  0x4e   : > { %2824 = vst.msk [vmem:[#allocation3 + $0x1c0] sm:$0xff] %vm267_vm1, %v7143_v2  ;;  %2825 = vst.msk [vmem:[#allocation3 + $0x1c8] sm:$0xff] %vm267_vm1, %v7143_v2 }
  0x4f   : > { %2826 = vst.msk [vmem:[#allocation3 + $0x1d0] sm:$0xff] %vm267_vm1, %v7143_v2  ;;  %2827 = vst.msk [vmem:[#allocation3 + $0x1d8] sm:$0xff] %vm267_vm1, %v7143_v2 }
  0x50   : > { %2828 = vst.msk [vmem:[#allocation3 + $0x1e0] sm:$0xff] %vm267_vm1, %v7143_v2  ;;  %2829 = vst.msk [vmem:[#allocation3 + $0x1e8] sm:$0xff] %vm267_vm1, %v7143_v2 }
  0x51   : > { %2830 = vst.msk [vmem:[#allocation3 + $0x1f0] sm:$0xff] %vm267_vm1, %v7143_v2  ;;  %2831 = vst.msk [vmem:[#allocation3 + $0x1f8] sm:$0xff] %vm267_vm1, %v7143_v2 }
  0x52   : > { %2832 = vst.msk [vmem:[#allocation3 + $0x200] sm:$0xff] %vm267_vm1, %v7143_v2  ;;  %2833 = vst.msk [vmem:[#allocation3 + $0x208] sm:$0xff] %vm267_vm1, %v7143_v2 }
  0x53   : > { %2834 = vst.msk [vmem:[#allocation3 + $0x210] sm:$0xff] %vm267_vm1, %v7143_v2  ;;  %2835 = vst.msk [vmem:[#allocation3 + $0x218] sm:$0xff] %vm267_vm1, %v7143_v2 }
  0x54   : > { %2836 = vst.msk [vmem:[#allocation3 + $0x220] sm:$0xff] %vm267_vm1, %v7143_v2  ;;  %2837 = vst.msk [vmem:[#allocation3 + $0x228] sm:$0xff] %vm267_vm1, %v7143_v2 }
  0x55   : > { %2838 = vst.msk [vmem:[#allocation3 + $0x230] sm:$0xff] %vm267_vm1, %v7143_v2  ;;  %2839 = vst.msk [vmem:[#allocation3 + $0x238] sm:$0xff] %vm267_vm1, %v7143_v2 }
  0x56   : > { %9391 = vst [vmem:[#allocation4_spill] sm:$0xff] %v7503_v4  ;;  %9392 = vst [vmem:[#allocation5_spill] sm:$0xff] %v7506_v5 }
  0x57   : > { %9393 = vst [vmem:[#allocation6_spill] sm:$0xff] %v7509_v6  ;;  %341 = vst.msk [vmem:[#allocation2 + $0x28] sm:$0xff] %vm267_vm1, %v7503_v4 }
  0x58   : > { %342 = vst.msk [vmem:[#allocation2 + $0x30] sm:$0xff] %vm267_vm1, %v7506_v5  ;;  %9394 = vst [vmem:[#allocation7_spill] sm:$0xff] %v7516_v7 }
  0x59   : > { %343 = vst.msk [vmem:[#allocation2 + $0x48] sm:$0xff] %vm267_vm1, %v7509_v6  ;;  %9395 = vst [vmem:[#allocation8_spill] sm:$0xff] %v7521_v8  ;;  %v9440_v6 = vrot.slane %v7528_v11, 1 }
  0x5a   : > { %9396 = vst [vmem:[#allocation9_spill] sm:$0xff] %v7524_v9  ;;  %344 = vst.msk [vmem:[#allocation2 + $0x50] sm:$0xff] %vm267_vm1, %v7516_v7 }
  0x5b   : > { %345 = vst.msk [vmem:[#allocation2 + $0x68] sm:$0xff] %vm267_vm1, %v7521_v8  ;;  %346 = vst.msk [vmem:[#allocation2 + $0x70] sm:$0xff] %vm267_vm1, %v7524_v9  ;;  %v388_v9 = vld [vmem:[#allocation2 + $0x78] sm:$0xff] }
  0x5c   : > { %9397 = vst [vmem:[#allocation10_spill] sm:$0xff] %v7540_v14  ;;  %9398 = vst [vmem:[#allocation11_spill] sm:$0xff] %v7543_v15 }
  0x5d   : > { %347 = vst.msk [vmem:[#allocation2 + $0x88] sm:$0xff] %vm267_vm1, %v7540_v14  ;;  %348 = vst.msk [vmem:[#allocation2 + $0x90] sm:$0xff] %vm267_vm1, %v7543_v15  ;;  %v384_v14 = vld [vmem:[#allocation2 + $0x58] sm:$0xff] }
  0x5e   : > { %9399 = vst [vmem:[#allocation12_spill] sm:$0xff] %v7551_v17  ;;  %9400 = vst [vmem:[#allocation13_spill] sm:$0xff] %v7554_v18  ;;  %v7610_v30 = vld [vmem:[#allocation2 + $0x28] sm:$0xff] }
  0x5f   : > { %9401 = vst [vmem:[#allocation14_spill] sm:$0xff] %v7557_v19  ;;  %349 = vst.msk [vmem:[#allocation2 + $0xa8] sm:$0xff] %vm267_vm1, %v7551_v17  ;;  %v7612_v31 = vld [vmem:[#allocation2 + $0x30] sm:$0xff]  ;;  %v1085_v34 = vrot.slane %v7610_v30, 1 }
  0x60   : > { %350 = vst.msk [vmem:[#allocation2 + $0xb0] sm:$0xff] %vm267_vm1, %v7554_v18  ;;  %9402 = vst [vmem:[#allocation15_spill] sm:$0xff] %v7565_v20  ;;  %v7614_v32 = vld [vmem:[#allocation2 + $0x48] sm:$0xff]  ;;  %v7624_v33 = vpack.c.bf16 %v7612_v31, %v7610_v30  ;;  %v9292_v38 = vrot.slane %v7612_v31, 1 }
  0x61   : > { %351 = vst.msk [vmem:[#allocation2 + $0xc8] sm:$0xff] %vm267_vm1, %v7557_v19  ;;  %9403 = vst [vmem:[#allocation16_spill] sm:$0xff] %v7570_v21  ;;  %v7628_v36 = vld [vmem:[#allocation2 + $0x50] sm:$0xff]  ;;  %v1090_v16 = vrot.slane %v7614_v32, 1 }
  0x62   : > { %9404 = vst [vmem:[#allocation17_spill] sm:$0xff] %v7573_v22  ;;  %352 = vst.msk [vmem:[#allocation2 + $0xd0] sm:$0xff] %vm267_vm1, %v7565_v20  ;;  %v7638_v39 = vpack.c.bf16 %v7628_v36, %v7614_v32  ;;  %5987 = vmatmul.mubr.msk.bf16.vlgmr.msra.gmra.mrb[0].mxu0 %vm267_vm1, %v7624_v33  ;;  %v7663_v44 = vsel %vm1079_vm2, %v1085_v34, %v9292_v38  ;;  %v7667_v45 = vld [vmem:[#allocation2 + $0x68] sm:$0xff]  ;;  %v7669_v46 = vld [vmem:[#allocation2 + $0x70] sm:$0xff]  ;;  %v1088_v34 = vrot.slane %v380_v3, 1  ;;  %v1091_v38 = vrot.slane %v7628_v36, 1 }
  0x63   : > { %353 = vst.msk [vmem:[#allocation2 + $0xe8] sm:$0xff] %vm267_vm1, %v7570_v21  ;;  %354 = vst.msk [vmem:[#allocation2 + $0xf0] sm:$0xff] %vm267_vm1, %v7573_v22  ;;  %6019 = vmatpush3.bf16.msra.mxu0 %v900_v35  ;;  %v7681_v49 = vpack.c.bf16 %v7669_v46, %v7667_v45  ;;  %v376_v20 = vld [vmem:[#allocation2 + $0x18] sm:$0xff] }
  0x64   : > { %9405 = vst [vmem:[#allocation18_spill] sm:$0xff] %v7582_v23  ;;  %9406 = vst [vmem:[#allocation19_spill] sm:$0xff] %v7585_v24  ;;  %5990 = vmatprep.mubr.msk.bf16.mxu0 %vm267_vm1, %v7638_v39  ;;  %v7673_v47 = vld [vmem:[#allocation2 + $0x88] sm:$0xff]  ;;  %v7675_v48 = vld [vmem:[#allocation2 + $0x90] sm:$0xff]  ;;  %7110 = vmatprep.subr.msk.bf16.mxu0 %vm686_vm0, %v7633_v37 }
  0x65   : > { %9407 = vst [vmem:[#allocation20_spill] sm:$0xff] %v7588_v25  ;;  %9408 = vst [vmem:[#allocation21_spill] sm:$0xff] %v7593_v26  ;;  %v7685_v50 = vpack.c.bf16 %v7675_v48, %v7673_v47  ;;  %v1100_v3 = vrot.slane %v7673_v47, 1 }
  0x66   : > { %355 = vst.msk [vmem:[#allocation2 + $0x108] sm:$0xff] %vm267_vm1, %v7582_v23  ;;  %356 = vst.msk [vmem:[#allocation2 + $0x110] sm:$0xff] %vm267_vm1, %v7585_v24  ;;  %v7719_v57 = vld [vmem:[#allocation2 + $0xa8] sm:$0xff] }
  0x67   : > { %9409 = vst [vmem:[#allocation22_spill] sm:$0xff] %v7600_v27  ;;  %357 = vst.msk [vmem:[#allocation2 + $0x128] sm:$0xff] %vm267_vm1, %v7588_v25  ;;  %v7721_v58 = vld [vmem:[#allocation2 + $0xb0] sm:$0xff] }
  0x68   : > { %9410 = vst [vmem:[#allocation23_spill] sm:$0xff] %v7605_v28  ;;  %9411 = vst [vmem:[#allocation24_spill] sm:$0xff] %v7608_v29  ;;  %v7725_v59 = vld [vmem:[#allocation2 + $0xc8] sm:$0xff]  ;;  %v7731_v61 = vpack.c.bf16 %v7721_v58, %v7719_v57 }
  0x69   : > { %358 = vst.msk [vmem:[#allocation2 + $0x130] sm:$0xff] %vm267_vm1, %v7600_v27  ;;  %359 = vst.msk [vmem:[#allocation2 + $0x148] sm:$0xff] %vm267_vm1, %v7605_v28  ;;  %v7727_v60 = vld [vmem:[#allocation2 + $0xd0] sm:$0xff] }
  0x6a   : > { %360 = vst.msk [vmem:[#allocation2 + $0x150] sm:$0xff] %vm267_vm1, %v7608_v29  ;;  %9412 = vst [vmem:[#allocation25_spill] sm:$0xff] %v7624_v33  ;;  %5991 = vmatmul.mubr.msk.bf16.gmra.mrb[4].mxu0 %vm267_vm1, %v7681_v49  ;;  %v7735_v62 = vpack.c.bf16 %v7727_v60, %v7725_v59  ;;  %v7741_v63 = vld [vmem:[#allocation2 + $0xe8] sm:$0xff]  ;;  %v7743_v0 = vld [vmem:[#allocation2 + $0xf0] sm:$0xff] }
  0x6b   : > { %9413 = vst [vmem:[#allocation26_spill] sm:$0xff] %v7638_v39  ;;  %9414 = vst [vmem:[#allocation27_spill] sm:$0xff] %v7641_v40  ;;  %5994 = vmatprep.mubr.msk.bf16.mxu0 %vm267_vm1, %v7685_v50  ;;  %v7751_v12 = vpack.c.bf16 %v7743_v0, %v7741_v63  ;;  %v1115_v29 = vrot.slane %v7741_v63, 1  ;;  %v9442_v39 = vrot.slane %v7675_v48, 1 }
  0x6c   : > { %9415 = vst [vmem:[#allocation28_spill] sm:$0xff] %v7644_v41  ;;  %9416 = vst [vmem:[#allocation29_spill] sm:$0xff] %v7647_v42 }
  0x6d   : > { %361 = vst.msk [vmem:[#allocation2 + $0x168] sm:$0xff] %vm267_vm1, %v7641_v40  ;;  %362 = vst.msk [vmem:[#allocation2 + $0x170] sm:$0xff] %vm267_vm1, %v7644_v41  ;;  %v7745_v1 = vld [vmem:[#allocation2 + $0x108] sm:$0xff]  ;;  %v7747_v2 = vld [vmem:[#allocation2 + $0x110] sm:$0xff]  ;;  %v1102_v33 = vsel %vm1079_vm2, %v1100_v3, %v9442_v39  ;;  %v9445_v39 = vrot.slane %v7727_v60, 1 }
  0x6e   : > { %9417 = vst [vmem:[#allocation30_spill] sm:$0xff] %v7656_v43  ;;  %363 = vst.msk [vmem:[#allocation2 + $0x188] sm:$0xff] %vm267_vm1, %v7647_v42  ;;  %v7755_v13 = vpack.c.bf16 %v7747_v2, %v7745_v1  ;;  %v1110_v42 = vrot.slane %v7725_v59, 1  ;;  %v1120_v22 = vrot.slane %v7745_v1, 1 }
  0x6f   : > { %364 = vst.msk [vmem:[#allocation2 + $0x190] sm:$0xff] %vm267_vm1, %v7656_v43  ;;  %9418 = vst [vmem:[#allocation31_spill] sm:$0xff] %v7681_v49  ;;  %v396_v49 = vld [vmem:[#allocation2 + $0xb8] sm:$0xff] }
  0x70   : > { %9419 = vst [vmem:[#allocation32_spill] sm:$0xff] %v7685_v50  ;;  %9420 = vst [vmem:[#allocation33_spill] sm:$0xff] %v7688_v51  ;;  %v7774_v41 = vld [vmem:[#allocation2 + $0x148] sm:$0xff]  ;;  %v1093_v50 = vrot.slane %v384_v14, 1  ;;  %v1112_v3 = vsel %vm1079_vm2, %v1110_v42, %v9445_v39 }
  0x71   : > { %9421 = vst [vmem:[#allocation34_spill] sm:$0xff] %v7691_v52  ;;  %9422 = vst [vmem:[#allocation35_spill] sm:$0xff] %v7694_v53  ;;  %v7776_v43 = vld [vmem:[#allocation2 + $0x150] sm:$0xff]  ;;  %v1130_v24 = vrot.slane %v7774_v41, 1 }
  0x72   : > { %365 = vst.msk [vmem:[#allocation2 + $0x1a8] sm:$0xff] %vm267_vm1, %v7688_v51  ;;  %366 = vst.msk [vmem:[#allocation2 + $0x1b0] sm:$0xff] %vm267_vm1, %v7691_v52  ;;  %5995 = vmatmul.mubr.msk.bf16.gmra.mrb[8].mxu0 %vm267_vm1, %v7731_v61  ;;  %v7766_v52 = vld [vmem:[#allocation2 + $0x128] sm:$0xff]  ;;  %v1105_v51 = vrot.slane %v7719_v57, 1  ;;  %v1094_v14 = vsel %vm1079_vm2, %v1091_v38, %v1093_v50 }
  0x73   : > { %9423 = vst [vmem:[#allocation36_spill] sm:$0xff] %v7701_v54  ;;  %367 = vst.msk [vmem:[#allocation2 + $0x1c8] sm:$0xff] %vm267_vm1, %v7694_v53  ;;  %5998 = vmatprep.mubr.msk.bf16.mxu0 %vm267_vm1, %v7735_v62  ;;  %v1125_v23 = vrot.slane %v7766_v52, 1  ;;  %v7807_v53 = vpack.c.bf16 %v7776_v43, %v7774_v41 }
  0x74   : > { %9424 = vst [vmem:[#allocation37_spill] sm:$0xff] %v7706_v55  ;;  %368 = vst.msk [vmem:[#allocation2 + $0x1d0] sm:$0xff] %vm267_vm1, %v7701_v54  ;;  %v7768_v54 = vld [vmem:[#allocation2 + $0x130] sm:$0xff]  ;;  %v7784_v25 = vld [vmem:[#allocation2 + $0x168] sm:$0xff] }
  0x75   : > { %369 = vst.msk [vmem:[#allocation2 + $0x1e8] sm:$0xff] %vm267_vm1, %v7706_v55  ;;  %9425 = vst [vmem:[#allocation38_spill] sm:$0xff] %v7715_v56  ;;  %v9430_v55 = vrot.slane %v7612_v31, 1  ;;  %v7786_v35 = vld [vmem:[#allocation2 + $0x170] sm:$0xff]  ;;  %v7788_v28 = vld [vmem:[#allocation2 + $0x188] sm:$0xff] }
  0x76   : > { %370 = vst.msk [vmem:[#allocation2 + $0x1f0] sm:$0xff] %vm267_vm1, %v7715_v56  ;;  %9426 = vst [vmem:[#allocation39_spill] sm:$0xff] %v7731_v61  ;;  %v1095_v56 = vrot.slane %v7667_v45, 1  ;;  %v7813_v19 = vpack.c.bf16 %v7786_v35, %v7784_v25  ;;  %v1140_v7 = vrot.slane %v7788_v28, 1 }
  0x77   : > { %9427 = vst [vmem:[#allocation40_spill] sm:$0xff] %v7735_v62  ;;  %9428 = vst [vmem:[#allocation41_spill] sm:$0xff] %v7751_v12  ;;  %v1089_v40 = vsel %vm1079_vm2, %v9430_v55, %v1088_v34  ;;  %v7795_v55 = vpack.c.bf16 %v7768_v54, %v7766_v52  ;;  %v7797_v34 = vld [vmem:[#allocation2 + $0x190] sm:$0xff]  ;;  %v392_v62 = vld [vmem:[#allocation2 + $0x98] sm:$0xff] }
  0x78   : > { %9429 = vst [vmem:[#allocation42_spill] sm:$0xff] %v7755_v13  ;;  %9431 = vst [vmem:[#allocation43_spill] sm:$0xff] %v7788_v28  ;;  %v7823_v5 = vpack.c.bf16 %v7797_v34, %v7788_v28  ;;  %v1103_v61 = vrot.slane %v392_v62, 1 }
  0x79   : > { %9432 = vst [vmem:[#allocation44_spill] sm:$0xff] %v7795_v55  ;;  %v7799_v27 = vld [vmem:[#allocation2 + $0x1a8] sm:$0xff]  ;;  %v7801_v21 = vld [vmem:[#allocation2 + $0x1b0] sm:$0xff]  ;;  %9434 = vst [vmem:[#allocation46_spill] sm:$0xff] %v7807_v53 }
  0x7a   : > { %5999 = vmatmul.mubr.msk.bf16.gmra.mrb[12].mxu0 %vm267_vm1, %v7751_v12  ;;  %9433 = vst [vmem:[#allocation45_spill] sm:$0xff] %v7799_v27  ;;  %9435 = vst [vmem:[#allocation47_spill] sm:$0xff] %v7813_v19  ;;  %v7817_v8 = vld [vmem:[#allocation2 + $0x1c8] sm:$0xff]  ;;  %v7829_v4 = vpack.c.bf16 %v7801_v21, %v7799_v27  ;;  %v1145_v15 = vrot.slane %v7799_v27, 1  ;;  %v7836_v12 = vpack.c.bf16 %v1089_v40, %v7663_v44  ;;  %v9441_v40 = vrot.slane %v7669_v46, 1 }
  0x7b   : > { %6002 = vmatprep.mubr.msk.bf16.mxu0 %vm267_vm1, %v7755_v13  ;;  %v7819_v18 = vld [vmem:[#allocation2 + $0x1d0] sm:$0xff]  ;;  %9436 = vst [vmem:[#allocation48_spill] sm:$0xff] %v7823_v5  ;;  %v1083_v13 = vrot.slane %v376_v20, 1  ;;  %v9443_v27 = vrot.slane %v7721_v58, 1 }
  0x7c   : > { %9437 = vst [vmem:[#allocation49_spill] sm:$0xff] %v7829_v4  ;;  %9438 = vst [vmem:[#allocation50_spill] sm:$0xff] %v7836_v12  ;;  %v7842_v17 = vpack.c.bf16 %v7819_v18, %v7817_v8  ;;  %v1097_v44 = vsel %vm1079_vm2, %v1095_v56, %v9441_v40  ;;  %v400_v12 = vld [vmem:[#allocation2 + $0xd8] sm:$0xff] }
  0x7d   : > { %v7849_v20 = vsel %vm1079_vm2, %v9440_v6, %v1083_v13  ;;  %v1107_v6 = vsel %vm1079_vm2, %v1105_v51, %v9443_v27  ;;  %v404_v13 = vld [vmem:[#allocation2 + $0xf8] sm:$0xff]  ;;  %v1113_v27 = vrot.slane %v400_v12, 1  ;;  %v9447_v51 = vrot.slane %v7743_v0, 1 }
  0x7e   : > { %9439 = vst [vmem:[#allocation51_spill] sm:$0xff] %v7842_v17  ;;  %v1118_v42 = vrot.slane %v404_v13, 1 }
  0x7f   : > { %v1117_v62 = vsel %vm1079_vm2, %v1115_v29, %v9447_v51 }
  0x82   : > { %6003 = vmatmul.mubr.msk.bf16.gmra.mrb[16].mxu0 %vm267_vm1, %v7795_v55  ;;  %v1092_v55 = vsel %vm1079_vm2, %v1090_v16, %v1091_v38  ;;  %v408_v16 = vld [vmem:[#allocation2 + $0x118] sm:$0xff]  ;;  %v9446_v38 = vrot.slane %v7675_v48, 1 }
  0x83   : > { %6006 = vmatprep.mubr.msk.bf16.mxu0 %vm267_vm1, %v7807_v53  ;;  %v1098_v53 = vrot.slane %v388_v9, 1  ;;  %v7863_v28 = vpack.c.bf16 %v1094_v14, %v1092_v55  ;;  %v9444_v9 = vmov %v9441_v40  ;;  %v1108_v40 = vrot.slane %v396_v49, 1  ;;  %v412_v55 = vld [vmem:[#allocation2 + $0x138] sm:$0xff] }
  0x84   : > { %v1104_v50 = vsel %vm1079_vm2, %v9446_v38, %v1103_v61  ;;  %v9448_v49 = vrot.slane %v7721_v58, 1  ;;  %v9450_v61 = vrot.slane %v7727_v60, 1  ;;  %v1123_v29 = vrot.slane %v408_v16, 1  ;;  %v424_v16 = vld [vmem:[#allocation2 + $0x198] sm:$0xff] }
  0x85   : > { %v1099_v56 = vsel %vm1079_vm2, %v9444_v9, %v1098_v53  ;;  %v7879_v14 = vpack.c.bf16 %v1104_v50, %v1102_v33  ;;  %v9451_v33 = vrot.slane %v7768_v54, 1  ;;  %v420_v50 = vld [vmem:[#allocation2 + $0x178] sm:$0xff] }
  0x86   : > { %v7871_v26 = vpack.c.bf16 %v1099_v56, %v1097_v44  ;;  %v1109_v53 = vsel %vm1079_vm2, %v9448_v49, %v1108_v40  ;;  %v9449_v44 = vrot.slane %v7747_v2, 1  ;;  %v416_v56 = vld [vmem:[#allocation2 + $0x158] sm:$0xff]  ;;  %v1114_v12 = vsel %vm1079_vm2, %v9450_v61, %v1113_v27 }
  0x87   : > { %v7887_v39 = vpack.c.bf16 %v1109_v53, %v1107_v6  ;;  %v1127_v38 = vsel %vm1079_vm2, %v1125_v23, %v9451_v33  ;;  %v7897_v13 = vpack.c.bf16 %v1114_v12, %v1112_v3  ;;  %v1128_v40 = vrot.slane %v412_v55, 1  ;;  %v428_v61 = vld [vmem:[#allocation2 + $0x1b8] sm:$0xff] }
  0x88   : > { %v1122_v9 = vsel %vm1079_vm2, %v1120_v22, %v9449_v44  ;;  %v9452_v22 = vmov %v9447_v51  ;;  %v9453_v51 = vrot.slane %v7776_v43, 1  ;;  %v9454_v49 = vmov %v9449_v44 }
  0x89   : > { %v1119_v6 = vsel %vm1079_vm2, %v9452_v22, %v1118_v42  ;;  %v1124_v3 = vsel %vm1079_vm2, %v9454_v49, %v1123_v29  ;;  %v1133_v53 = vrot.slane %v416_v56, 1  ;;  %v9455_v44 = vrot.slane %v7786_v35, 1  ;;  %v373_v29 = vld [vmem:[#allocation2] sm:$0xff] }
  0x8a   : > { %6007 = vmatmul.mubr.msk.bf16.gmra.mrb[20].mxu0 %vm267_vm1, %v7813_v19  ;;  %v1132_v27 = vsel %vm1079_vm2, %v1130_v24, %v9453_v51  ;;  %v7907_v23 = vpack.c.bf16 %v1119_v6, %v1117_v62  ;;  %v9456_v42 = vrot.slane %v7784_v25, 1  ;;  %v7917_v12 = vpack.c.bf16 %v1124_v3, %v1122_v9 }
  0x8b   : > { %6010 = vmatprep.mubr.msk.bf16.mxu0 %vm267_vm1, %v7823_v5  ;;  %v9457_v24 = vmov %v9451_v33  ;;  %v1138_v62 = vrot.slane %v420_v50, 1  ;;  %v9458_v22 = vrot.slane %v7797_v34, 1  ;;  %v1134_v49 = vsel %vm1079_vm2, %v9453_v51, %v1133_v53  ;;  %v7936_v50 = vld [vmem:[#allocation2 + $0x1f0] sm:$0xff] }
  0x8c   : > { %v1137_v55 = vsel %vm1079_vm2, %v9456_v42, %v9455_v44  ;;  %v1129_v33 = vsel %vm1079_vm2, %v9457_v24, %v1128_v40  ;;  %v1143_v44 = vrot.slane %v424_v16, 1  ;;  %v9459_v9 = vrot.slane %v7801_v21, 1  ;;  %v7934_v40 = vld [vmem:[#allocation2 + $0x1e8] sm:$0xff] }
  0x8d   : > { %v1142_v6 = vsel %vm1079_vm2, %v1140_v7, %v9458_v22  ;;  %v7925_v56 = vpack.c.bf16 %v1129_v33, %v1127_v38  ;;  %v1151_v42 = vrot.slane %v7819_v18, 1  ;;  %v7938_v24 = vpack.c.bf16 %v1134_v49, %v1132_v27 }
  0x8e   : > { %v1147_v3 = vsel %vm1079_vm2, %v1145_v15, %v9459_v9  ;;  %v9460_v7 = vrot.slane %v7786_v35, 1  ;;  %v1148_v33 = vrot.slane %v428_v61, 1  ;;  %v1155_v53 = vrot.slane %v7934_v40, 1 }
  0x8f   : > { %v1156_v16 = vrot.slane %v7936_v50, 1  ;;  %v9461_v15 = vrot.slane %v7797_v34, 1  ;;  %v497_v9 = vrot.slane %v7528_v11, 7  ;;  %v494_v5 = vrot.slane %v373_v29, 7 }
  0x90   : > { %v1139_v38 = vsel %vm1079_vm2, %v9460_v7, %v1138_v62  ;;  %v9462_v49 = vrot.slane %v7801_v21, 1  ;;  %v9463_v7 = vrot.slane %v7817_v8, 1  ;;  %v500_v19 = vrot.slane %v7610_v30, 7 }
  0x91   : > { %v7945_v22 = vpack.c.bf16 %v1139_v38, %v1137_v55  ;;  %v1144_v51 = vsel %vm1079_vm2, %v9461_v15, %v1143_v44  ;;  %v432_v55 = vld [vmem:[#allocation2 + $0x1d8] sm:$0xff]  ;;  %v377_v38 = vld [vmem:[#allocation2 + $0x20] sm:$0xff]  ;;  %v1157_v29 = vsel %vm1079_vm2, %v1155_v53, %v1156_v16 }
  0x92   : > { %v7951_v27 = vpack.c.bf16 %v1144_v51, %v1142_v6  ;;  %v1149_v62 = vsel %vm1079_vm2, %v9462_v49, %v1148_v33  ;;  %6011 = vmatmul.mubr.msk.bf16.gmra.mrb[24].mxu0 %vm267_vm1, %v7829_v4  ;;  %v1152_v44 = vsel %vm1079_vm2, %v9463_v7, %v1151_v42  ;;  %v1153_v11 = vrot.slane %v432_v55, 1  ;;  %v436_v6 = vld [vmem:[#allocation2 + $0x1f8] sm:$0xff] }
  0x93   : > { %v7956_v61 = vpack.c.bf16 %v1149_v62, %v1147_v3  ;;  %6014 = vmatprep.mubr.msk.bf16.mxu0 %vm267_vm1, %v7842_v17  ;;  %v9464_v33 = vrot.slane %v7526_v10, 7  ;;  %v1158_v49 = vrot.slane %v436_v6, 1  ;;  %v381_v62 = vld [vmem:[#allocation2 + $0x40] sm:$0xff]  ;;  %v499_v4 = vrot.slane %v377_v38, 7 }
  0x94   : > { %v1154_v7 = vsel %vm1079_vm2, %v1151_v42, %v1153_v11  ;;  %v7975_v17 = vpack.c.bf16 %v7936_v50, %v7934_v40  ;;  %v507_v42 = vrot.slane %v7628_v36, 7  ;;  %v504_v38 = vrot.slane %v381_v62, 7  ;;  %v389_v6 = vld [vmem:[#allocation2 + $0x80] sm:$0xff] }
  0x95   : > { %v496_v3 = vsel %vm493_vm3, %v494_v5, %v9464_v33  ;;  %v9465_v15 = vmov %v9464_v33  ;;  %v7977_v55 = vpack.c.bf16 %v1154_v7, %v1152_v44  ;;  %v1159_v53 = vsel %vm1079_vm2, %v1156_v16, %v1158_v49  ;;  %v385_v16 = vld [vmem:[#allocation2 + $0x60] sm:$0xff] }
  0x96   : > { %v498_v51 = vsel %vm493_vm3, %v9465_v15, %v497_v9  ;;  %v502_v5 = vrot.slane %v7612_v31, 7  ;;  %v7982_v33 = vpack.c.bf16 %v1159_v53, %v1157_v29  ;;  %v505_v9 = vrot.slane %v7614_v32, 7  ;;  %v8006_v62 = vld [vmem:[%s9286_s1 + $0x6] sm:$0x3] }
  0x97   : > { %v606_v10 = vpack.c.bf16 %v498_v51, %v496_v3  ;;  %v501_v44 = vsel %vm493_vm3, %v499_v4, %v500_v19  ;;  %v510_v32 = vrot.slane %v7667_v45, 7  ;;  %v512_v36 = vrot.slane %v7669_v46, 7  ;;  %v397_v7 = vld [vmem:[#allocation2 + $0xc0] sm:$0xff] }
  0x98   : > { %v503_v11 = vsel %vm493_vm3, %v500_v19, %v502_v5  ;;  %v506_v30 = vsel %vm493_vm3, %v504_v38, %v505_v9  ;;  %v508_v31 = vsel %vm493_vm3, %v505_v9, %v507_v42  ;;  %v509_v15 = vrot.slane %v385_v16, 7  ;;  %v401_v16 = vld [vmem:[#allocation2 + $0xe0] sm:$0xff] }
  0x99   : > { %v7993_v29 = vpack.c.bf16 %v503_v11, %v501_v44  ;;  %v7997_v3 = vpack.c.bf16 %v508_v31, %v506_v30  ;;  %v515_v4 = vrot.slane %v7673_v47, 7  ;;  %v517_v19 = vrot.slane %v7675_v48, 7  ;;  %v393_v48 = vld [vmem:[#allocation2 + $0xa0] sm:$0xff] }
  0x9a   : > { %6015 = vmatmul.mubr.msk.bf16.gmra.mrb[28].mxu0 %vm267_vm1, %v7975_v17  ;;  %v1257_v51 = vsel %vm686_vm0, %v7633_v37, 0  ;;  %v514_v49 = vrot.slane %v389_v6, 7  ;;  %v511_v45 = vsel %vm493_vm3, %v509_v15, %v510_v32  ;;  %v513_v46 = vsel %vm493_vm3, %v510_v32, %v512_v36  ;;  %v405_v6 = vld [vmem:[#allocation2 + $0x100] sm:$0xff] }
  0x9b   : > { %6020 = vmatprep.mubr.msk.bf16.mxu0 %vm267_vm1, %v606_v10  ;;  %v518_v37 = vsel %vm493_vm3, %v515_v4, %v517_v19  ;;  %v8018_v53 = vpack.c.bf16 %v513_v46, %v511_v45  ;;  %v520_v5 = vrot.slane %v7719_v57, 7  ;;  %v522_v10 = vrot.slane %v7721_v58, 7  ;;  %v409_v46 = vld [vmem:[#allocation2 + $0x120] sm:$0xff] }
  0x9c   : > { %v516_v47 = vsel %vm493_vm3, %v514_v49, %v515_v4  ;;  %v519_v42 = vrot.slane %v393_v48, 7  ;;  %v525_v38 = vrot.slane %v7725_v59, 7  ;;  %v527_v44 = vrot.slane %v7727_v60, 7 }
  0x9d   : > { %v8022_v9 = vpack.c.bf16 %v518_v37, %v516_v47  ;;  %v524_v11 = vrot.slane %v397_v7, 7  ;;  %v523_v57 = vsel %vm493_vm3, %v520_v5, %v522_v10  ;;  %v530_v60 = vrot.slane %v7741_v63, 7  ;;  %v413_v47 = vld [vmem:[#allocation2 + $0x140] sm:$0xff] }
  0x9e   : > { %v521_v30 = vsel %vm493_vm3, %v519_v42, %v520_v5  ;;  %v528_v31 = vsel %vm493_vm3, %v525_v38, %v527_v44  ;;  %v532_v32 = vrot.slane %v7743_v0, 7  ;;  %v529_v15 = vrot.slane %v401_v16, 7  ;;  %v9466_v16 = vld [vmem:[#allocation43_spill] sm:$0xff] }
  0x9f   : > { %v526_v58 = vsel %vm493_vm3, %v524_v11, %v525_v38  ;;  %v8034_v59 = vpack.c.bf16 %v523_v57, %v521_v30  ;;  %v535_v4 = vrot.slane %v7745_v1, 7  ;;  %v537_v19 = vrot.slane %v7747_v2, 7  ;;  %v417_v11 = vld [vmem:[#allocation2 + $0x160] sm:$0xff] }
  0xa0   : > { %v8038_v36 = vpack.c.bf16 %v528_v31, %v526_v58  ;;  %v531_v49 = vsel %vm493_vm3, %v529_v15, %v530_v60  ;;  %v533_v63 = vsel %vm493_vm3, %v530_v60, %v532_v32  ;;  %v540_v2 = vrot.slane %v7766_v52, 7  ;;  %v421_v30 = vld [vmem:[#allocation2 + $0x180] sm:$0xff] }
  0xa1   : > { %v538_v45 = vsel %vm493_vm3, %v535_v4, %v537_v19  ;;  %v8050_v1 = vpack.c.bf16 %v533_v63, %v531_v49  ;;  %v542_v37 = vrot.slane %v7768_v54, 7  ;;  %v539_v7 = vrot.slane %v409_v46, 7  ;;  %v425_v19 = vld [vmem:[#allocation2 + $0x1a0] sm:$0xff] }
  0xa2   : > { %6021 = vmatmul.mubr.msk.bf16.vlgmr.msra.gmra.mrb[0].mxu0 %vm267_vm1, %v7993_v29  ;;  %v545_v5 = vrot.slane %v7774_v41, 7  ;;  %v547_v10 = vrot.slane %v7776_v43, 7  ;;  %v544_v42 = vrot.slane %v413_v47, 7  ;;  %v550_v43 = vrot.slane %v7784_v25, 7 }
  0xa3   : > { %6053 = vmatpush3.bf16.msra.mxu0 %v1257_v51  ;;  %6024 = vmatprep.mubr.msk.bf16.mxu0 %vm267_vm1, %v7997_v3  ;;  %v534_v51 = vrot.slane %v405_v6, 7  ;;  %v541_v38 = vsel %vm493_vm3, %v539_v7, %v540_v2  ;;  %v543_v52 = vsel %vm493_vm3, %v540_v2, %v542_v37  ;;  %v552_v57 = vrot.slane %v7786_v35, 7 }
  0xa4   : > { %7111 = vmatprep.subr.msk.bf16.mxu0 %vm686_vm0, %v8006_v62  ;;  %v546_v54 = vsel %vm493_vm3, %v544_v42, %v545_v5  ;;  %v548_v44 = vsel %vm493_vm3, %v545_v5, %v547_v10  ;;  %v8066_v41 = vpack.c.bf16 %v543_v52, %v541_v38  ;;  %v549_v31 = vrot.slane %v417_v11, 7  ;;  %v433_v42 = vld [vmem:[#allocation2 + $0x1e0] sm:$0xff]  ;;  %v8099_v38 = vld [vmem:[%s7500_s28 + $0xf0] sm:$0xff] }
  0xa5   : > { %v536_v0 = vsel %vm493_vm3, %v534_v51, %v535_v4  ;;  %v8070_v58 = vpack.c.bf16 %v548_v44, %v546_v54  ;;  %v555_v6 = vrot.slane %v9466_v16, 7  ;;  %v557_v60 = vrot.slane %v7797_v34, 7  ;;  %v429_v51 = vld [vmem:[#allocation2 + $0x1c0] sm:$0xff]  ;;  %v9467_v34 = vld [vmem:[#allocation45_spill] sm:$0xff]  ;;  %9468 = vst [vmem:[#allocation43_spill] sm:$0xff] %v8099_v38  ;;  %371 = vst.msk [vmem:[#allocation2 + $0x208] sm:$0xff] %vm267_vm1, %v8099_v38 }
  0xa6   : > { %v8054_v48 = vpack.c.bf16 %v538_v45, %v536_v0  ;;  %v554_v32 = vrot.slane %v421_v30, 7  ;;  %v551_v15 = vsel %vm493_vm3, %v549_v31, %v550_v43  ;;  %v553_v25 = vsel %vm493_vm3, %v550_v43, %v552_v57  ;;  %v262_v16 = vld [vmem:[%s9286_s1 + $0x8] sm:$0x3] }
  0xa7   : > { %v558_v4 = vsel %vm493_vm3, %v555_v6, %v557_v60  ;;  %v8082_v49 = vpack.c.bf16 %v553_v25, %v551_v15  ;;  %v560_v63 = vrot.slane %v9467_v34, 7  ;;  %v562_v0 = vrot.slane %v7801_v21, 7  ;;  %v9473_v34 = vld [vmem:[#allocation25_spill] sm:$0xff] }
  0xa8   : > { %v556_v35 = vsel %vm493_vm3, %v554_v32, %v555_v6  ;;  %v559_v46 = vrot.slane %v425_v19, 7  ;;  %v565_v47 = vrot.slane %v7817_v8, 7  ;;  %v567_v2 = vrot.slane %v7819_v18, 7  ;;  %v8102_v8 = vld [vmem:[%s7500_s28 + $0xf8] sm:$0xff]  ;;  %v9472_v6 = vld [vmem:[#allocation50_spill] sm:$0xff] }
  0xa9   : > { %v8086_v45 = vpack.c.bf16 %v558_v4, %v556_v35  ;;  %v564_v37 = vrot.slane %v429_v51, 7  ;;  %v563_v5 = vsel %vm493_vm3, %v560_v63, %v562_v0  ;;  %9469 = vst [vmem:[#allocation45_spill] sm:$0xff] %v8102_v8  ;;  %372 = vst.msk [vmem:[#allocation2 + $0x210] sm:$0xff] %vm267_vm1, %v8102_v8  ;;  %v570_v52 = vrot.slane %v7934_v40, 7  ;;  %v9470_v40 = vld [vmem:[#allocation21_spill] sm:$0xff] }
  0xaa   : > { %6025 = vmatmul.mubr.msk.bf16.gmra.mrb[4].mxu0 %vm267_vm1, %v8018_v53  ;;  %v561_v7 = vsel %vm493_vm3, %v559_v46, %v560_v63  ;;  %v568_v10 = vsel %vm493_vm3, %v565_v47, %v567_v2  ;;  %v572_v54 = vrot.slane %v7936_v50, 7  ;;  %v569_v11 = vrot.slane %v433_v42, 7  ;;  %v264_v0 = vld [vmem:[%s9286_s1 + $0xc] sm:$0x3]  ;;  %v9474_v46 = vld [vmem:[#allocation26_spill] sm:$0xff]  ;;  %v9476_v2 = vld [vmem:[#allocation32_spill] sm:$0xff] }
  0xab   : > { %6028 = vmatprep.mubr.msk.bf16.mxu0 %vm267_vm1, %v8022_v9  ;;  %v566_v21 = vsel %vm493_vm3, %v564_v37, %v565_v47  ;;  %v8108_v18 = vpack.c.bf16 %v563_v5, %v561_v7  ;;  %v9471_v50 = vpack.c.bf16 %v7849_v20, %v9470_v40  ;;  %v1467_v31 = vsel %vm686_vm0, %v8006_v62, 0  ;;  %v263_v62 = vld [vmem:[%s9286_s1 + $0xa] sm:$0x3]  ;;  %v9475_v47 = vld [vmem:[#allocation31_spill] sm:$0xff]  ;;  %v9478_v7 = vld [vmem:[#allocation40_spill] sm:$0xff] }
  0xac   : > { %v8112_v44 = vpack.c.bf16 %v568_v10, %v566_v21  ;;  %v571_v30 = vsel %vm493_vm3, %v569_v11, %v570_v52  ;;  %v573_v43 = vsel %vm493_vm3, %v570_v52, %v572_v54  ;;  %v1667_v20 = vsel %vm686_vm0, %v262_v16, 0  ;;  %v438_v60 = vld [vmem:[#allocation2 + $0x208] sm:$0xff]  ;;  %v9477_v37 = vld [vmem:[#allocation39_spill] sm:$0xff]  ;;  %v9480_v21 = vld [vmem:[#allocation42_spill] sm:$0xff] }
  0xad   : > { %v8120_v57 = vpack.c.bf16 %v573_v43, %v571_v30  ;;  %v1456_v25 = vrot.slane %v438_v60, 7  ;;  %v1875_v63 = vsel %vm686_vm0, %v263_v62, 0  ;;  %v9479_v5 = vld [vmem:[#allocation41_spill] sm:$0xff]  ;;  %v9481_v10 = vld [vmem:[#allocation44_spill] sm:$0xff]  ;;  %v9482_v42 = vld [vmem:[#allocation46_spill] sm:$0xff]  ;;  %v2085_v40 = vsel %vm686_vm0, %v264_v0, 0 }
  0xae   : > { %v9483_v52 = vld [vmem:[#allocation47_spill] sm:$0xff]  ;;  %v9484_v54 = vld [vmem:[#allocation48_spill] sm:$0xff]  ;;  %v9485_v11 = vld [vmem:[#allocation49_spill] sm:$0xff] }
  0xaf   : > { %v9486_v30 = vld [vmem:[#allocation51_spill] sm:$0xff] }
  0xb0   : > { %v439_v32 = vld [vmem:[#allocation2 + $0x210] sm:$0xff] }
  0xb1   : > { %v1458_v35 = vrot.slane %v439_v32, 7  ;;  %v8240_v43 = vpack.c.bf16 %v439_v32, %v438_v60 }
  0xb2   : > { %6029 = vmatmul.mubr.msk.bf16.gmra.mrb[8].mxu0 %vm267_vm1, %v8034_v59 }
  0xb3   : > { %6032 = vmatprep.mubr.msk.bf16.mxu0 %vm267_vm1, %v8038_v36  ;;  %v1459_v19 = vsel %vm493_vm3, %v1456_v25, %v1458_v35 }
  0xba   : > { %6033 = vmatmul.mubr.msk.bf16.gmra.mrb[12].mxu0 %vm267_vm1, %v8050_v1 }
  0xbb   : > { %6036 = vmatprep.mubr.msk.bf16.mxu0 %vm267_vm1, %v8054_v48 }
  0xc2   : > { %6037 = vmatmul.mubr.msk.bf16.gmra.mrb[16].mxu0 %vm267_vm1, %v8066_v41 }
  0xc3   : > { %6040 = vmatprep.mubr.msk.bf16.mxu0 %vm267_vm1, %v8070_v58 }
  0xca   : > { %6041 = vmatmul.mubr.msk.bf16.gmra.mrb[20].mxu0 %vm267_vm1, %v8082_v49 }
  0xcb   : > { %6044 = vmatprep.mubr.msk.bf16.mxu0 %vm267_vm1, %v8086_v45 }
  0xd2   : > { %6045 = vmatmul.mubr.msk.bf16.gmra.mrb[24].mxu0 %vm267_vm1, %v8108_v18 }
  0xd3   : > { %6048 = vmatprep.mubr.msk.bf16.mxu0 %vm267_vm1, %v8112_v44 }
  0xda   : > { %6049 = vmatmul.mubr.msk.bf16.gmra.mrb[28].mxu0 %vm267_vm1, %v8120_v57 }
  0xdb   : > { %6054 = vmatprep.mubr.msk.bf16.mxu0 %vm267_vm1, %v9471_v50  ;;  %v265_v50 = vld [vmem:[%s9286_s1 + $0xe] sm:$0x3] }
  0xe2   : > { %6055 = vmatmul.mubr.msk.bf16.vlgmr.msra.gmra.mrb[0].mxu0 %vm267_vm1, %v9472_v6 }
  0xe3   : > { %6087 = vmatpush3.bf16.msra.mxu0 %v1467_v31  ;;  %6058 = vmatprep.mubr.msk.bf16.mxu0 %vm267_vm1, %v7863_v28  ;;  %v440_v31 = vld [vmem:[#allocation2 + $0x218] sm:$0xff] }
  0xe4   : > { %7112 = vmatprep.subr.msk.bf16.mxu0 %vm686_vm0, %v262_v16  ;;  %v1863_v16 = vrot.slane %v438_v60, 1  ;;  %v2285_v60 = vsel %vm686_vm0, %v265_v50, 0 }
  0xea   : > { %6059 = vmatmul.mubr.msk.bf16.gmra.mrb[4].mxu0 %vm267_vm1, %v7871_v26 }
  0xeb   : > { %6062 = vmatprep.mubr.msk.bf16.mxu0 %vm267_vm1, %v7879_v14 }
  0xf2   : > { %6063 = vmatmul.mubr.msk.bf16.gmra.mrb[8].mxu0 %vm267_vm1, %v7887_v39 }
  0xf3   : > { %6066 = vmatprep.mubr.msk.bf16.mxu0 %vm267_vm1, %v7897_v13 }
  0xfa   : > { %6067 = vmatmul.mubr.msk.bf16.gmra.mrb[12].mxu0 %vm267_vm1, %v7907_v23 }
  0xfb   : > { %6070 = vmatprep.mubr.msk.bf16.mxu0 %vm267_vm1, %v7917_v12 }
 0x102   : > { %6071 = vmatmul.mubr.msk.bf16.gmra.mrb[16].mxu0 %vm267_vm1, %v7925_v56 }
 0x103   : > { %6074 = vmatprep.mubr.msk.bf16.mxu0 %vm267_vm1, %v7938_v24 }
 0x10a   : > { %6075 = vmatmul.mubr.msk.bf16.gmra.mrb[20].mxu0 %vm267_vm1, %v7945_v22 }
 0x10b   : > { %6078 = vmatprep.mubr.msk.bf16.mxu0 %vm267_vm1, %v7951_v27 }
 0x112   : > { %6079 = vmatmul.mubr.msk.bf16.gmra.mrb[24].mxu0 %vm267_vm1, %v7956_v61 }
 0x113   : > { %6082 = vmatprep.mubr.msk.bf16.mxu0 %vm267_vm1, %v7977_v55 }
 0x11a   : > { %6083 = vmatmul.mubr.msk.bf16.gmra.mrb[28].mxu0 %vm267_vm1, %v7982_v33 }
 0x11b   : > { %6088 = vmatprep.mubr.msk.bf16.mxu0 %vm267_vm1, %v7993_v29  ;;  %v437_v29 = vld [vmem:[#allocation2 + $0x200] sm:$0xff] }
 0x11c   : > { %v1455_v15 = vrot.slane %v437_v29, 7 }
 0x11e   : > { %v1457_v4 = vsel %vm493_vm3, %v1455_v15, %v1456_v25 }
 0x11f   : > { %v8201_v51 = vpack.c.bf16 %v1459_v19, %v1457_v4  ;;  %v8412_v4 = vld [vmem:[%s9287_s2] ss:$0 sm:$0xff] }
 0x122   : > { %6089 = vmatmul.mubr.msk.bf16.vlgmr.msra.gmra.mrb[0].mxu0 %vm267_vm1, %v7997_v3 }
 0x123   : > { %6121 = vmatpush3.bf16.msra.mxu0 %v1667_v20  ;;  %6092 = vmatprep.mubr.msk.bf16.mxu0 %vm267_vm1, %v8018_v53  ;;  %v1866_v20 = vrot.slane %v440_v31, 1 }
 0x124   : > { %7113 = vmatprep.subr.msk.bf16.mxu0 %vm686_vm0, %v263_v62 }
 0x12a   : > { %6093 = vmatmul.mubr.msk.bf16.gmra.mrb[4].mxu0 %vm267_vm1, %v8022_v9 }
 0x12b   : > { %6096 = vmatprep.mubr.msk.bf16.mxu0 %vm267_vm1, %v8034_v59 }
 0x132   : > { %6097 = vmatmul.mubr.msk.bf16.gmra.mrb[8].mxu0 %vm267_vm1, %v8038_v36 }
 0x133   : > { %6100 = vmatprep.mubr.msk.bf16.mxu0 %vm267_vm1, %v8050_v1 }
 0x13a   : > { %6101 = vmatmul.mubr.msk.bf16.gmra.mrb[12].mxu0 %vm267_vm1, %v8054_v48 }
 0x13b   : > { %6104 = vmatprep.mubr.msk.bf16.mxu0 %vm267_vm1, %v8066_v41 }
 0x142   : > { %6105 = vmatmul.mubr.msk.bf16.gmra.mrb[16].mxu0 %vm267_vm1, %v8070_v58 }
 0x143   : > { %6108 = vmatprep.mubr.msk.bf16.mxu0 %vm267_vm1, %v8082_v49 }
 0x14a   : > { %6109 = vmatmul.mubr.msk.bf16.gmra.mrb[20].mxu0 %vm267_vm1, %v8086_v45 }
 0x14b   : > { %6112 = vmatprep.mubr.msk.bf16.mxu0 %vm267_vm1, %v8108_v18 }
 0x152   : > { %6113 = vmatmul.mubr.msk.bf16.gmra.mrb[24].mxu0 %vm267_vm1, %v8112_v44 }
 0x153   : > { %6116 = vmatprep.mubr.msk.bf16.mxu0 %vm267_vm1, %v8120_v57 }
 0x15a   : > { %6117 = vmatmul.mubr.msk.bf16.gmra.mrb[28].mxu0 %vm267_vm1, %v8201_v51 }
 0x15b   : > { %6122 = vmatprep.mubr.msk.bf16.mxu0 %vm267_vm1, %v9473_v34 }
 0x162   : > { %6123 = vmatmul.mubr.msk.bf16.vlgmr.msra.gmra.mrb[0].mxu0 %vm267_vm1, %v9474_v46 }
 0x163   : > { %6155 = vmatpush3.bf16.msra.mxu0 %v1875_v63  ;;  %6126 = vmatprep.mubr.msk.bf16.mxu0 %vm267_vm1, %v9475_v47 }
 0x164   : > { %7114 = vmatprep.subr.msk.bf16.mxu0 %vm686_vm0, %v264_v0 }
 0x16a   : > { %6127 = vmatmul.mubr.msk.bf16.gmra.mrb[4].mxu0 %vm267_vm1, %v9476_v2 }
 0x16b   : > { %6130 = vmatprep.mubr.msk.bf16.mxu0 %vm267_vm1, %v9477_v37 }
 0x172   : > { %6131 = vmatmul.mubr.msk.bf16.gmra.mrb[8].mxu0 %vm267_vm1, %v9478_v7 }
 0x173   : > { %6134 = vmatprep.mubr.msk.bf16.mxu0 %vm267_vm1, %v9479_v5 }
 0x17a   : > { %6135 = vmatmul.mubr.msk.bf16.gmra.mrb[12].mxu0 %vm267_vm1, %v9480_v21 }
 0x17b   : > { %6138 = vmatprep.mubr.msk.bf16.mxu0 %vm267_vm1, %v9481_v10 }
 0x182   : > { %6139 = vmatmul.mubr.msk.bf16.gmra.mrb[16].mxu0 %vm267_vm1, %v9482_v42 }
 0x183   : > { %6142 = vmatprep.mubr.msk.bf16.mxu0 %vm267_vm1, %v9483_v52 }
 0x18a   : > { %6143 = vmatmul.mubr.msk.bf16.gmra.mrb[20].mxu0 %vm267_vm1, %v9484_v54 }
 0x18b   : > { %6146 = vmatprep.mubr.msk.bf16.mxu0 %vm267_vm1, %v9485_v11 }
 0x192   : > { %6147 = vmatmul.mubr.msk.bf16.gmra.mrb[24].mxu0 %vm267_vm1, %v9486_v30 }
 0x193   : > { %6150 = vmatprep.mubr.msk.bf16.mxu0 %vm267_vm1, %v7975_v17 }
 0x19a   : > { %6151 = vmatmul.mubr.msk.bf16.gmra.mrb[28].mxu0 %vm267_vm1, %v8240_v43 }
 0x19b   : > { %6156 = vmatprep.mubr.msk.bf16.mxu0 %vm267_vm1, %v9472_v6  ;;  %v1864_v6 = vrot.slane %v439_v32, 1  ;;  %v266_v32 = vld [vmem:[%s9286_s1 + $0x10] sm:$0x3] }
 0x19d   : > { %v1865_v62 = vsel %vm1079_vm2, %v1863_v16, %v1864_v6  ;;  %v1867_v29 = vsel %vm1079_vm2, %v1864_v6, %v1866_v20  ;;  %v2880_v20 = vld [vmem:[#allocation3 + $0x38] sm:$0xff] }
 0x19e   : > { %v8281_v15 = vpack.c.bf16 %v1867_v29, %v1865_v62  ;;  %v2884_v29 = vld [vmem:[#allocation3 + $0x58] sm:$0xff] }
 0x1a2   : > { %6157 = vmatmul.mubr.msk.bf16.vlgmr.msra.gmra.mrb[0].mxu0 %vm267_vm1, %v7863_v28 }
 0x1a3   : > { %6189 = vmatpush3.bf16.msra.mxu0 %v2085_v40  ;;  %6160 = vmatprep.mubr.msk.bf16.mxu0 %vm267_vm1, %v7871_v26  ;;  %v2876_v40 = vld [vmem:[#allocation3 + $0x18] sm:$0xff] }
 0x1a4   : > { %7115 = vmatprep.subr.msk.bf16.mxu0 %vm686_vm0, %v265_v50  ;;  %v3580_v62 = vrot.slane %v2876_v40, 1 }
 0x1aa   : > { %6161 = vmatmul.mubr.msk.bf16.gmra.mrb[4].mxu0 %vm267_vm1, %v7879_v14 }
 0x1ab   : > { %6164 = vmatprep.mubr.msk.bf16.mxu0 %vm267_vm1, %v7887_v39 }
 0x1b2   : > { %6165 = vmatmul.mubr.msk.bf16.gmra.mrb[8].mxu0 %vm267_vm1, %v7897_v13 }
 0x1b3   : > { %6168 = vmatprep.mubr.msk.bf16.mxu0 %vm267_vm1, %v7907_v23 }
 0x1ba   : > { %6169 = vmatmul.mubr.msk.bf16.gmra.mrb[12].mxu0 %vm267_vm1, %v7917_v12 }
 0x1bb   : > { %6172 = vmatprep.mubr.msk.bf16.mxu0 %vm267_vm1, %v7925_v56 }
 0x1c2   : > { %6173 = vmatmul.mubr.msk.bf16.gmra.mrb[16].mxu0 %vm267_vm1, %v7938_v24 }
 0x1c3   : > { %6176 = vmatprep.mubr.msk.bf16.mxu0 %vm267_vm1, %v7945_v22 }
 0x1ca   : > { %6177 = vmatmul.mubr.msk.bf16.gmra.mrb[20].mxu0 %vm267_vm1, %v7951_v27 }
 0x1cb   : > { %6180 = vmatprep.mubr.msk.bf16.mxu0 %vm267_vm1, %v7956_v61 }
 0x1d2   : > { %6181 = vmatmul.mubr.msk.bf16.gmra.mrb[24].mxu0 %vm267_vm1, %v7977_v55 }
 0x1d3   : > { %6184 = vmatprep.mubr.msk.bf16.mxu0 %vm267_vm1, %v7982_v33 }
 0x1da   : > { %6185 = vmatmul.mubr.msk.bf16.gmra.mrb[28].mxu0 %vm267_vm1, %v8281_v15 }
 0x1db   : > { %6190 = vmatprep.mubr.msk.bf16.mxu0 %vm267_vm1, %v7997_v3  ;;  %v441_v3 = vld [vmem:[#allocation2 + $0x220] sm:$0xff] }
 0x1e2   : > { %6191 = vmatmul.mubr.msk.bf16.vlgmr.msra.gmra.mrb[0].mxu0 %vm267_vm1, %v8018_v53  ;;  %v442_v53 = vld [vmem:[#allocation2 + $0x228] sm:$0xff] }
 0x1e3   : > { %6223 = vmatpush3.bf16.msra.mxu0 %v2285_v60  ;;  %6194 = vmatprep.mubr.msk.bf16.mxu0 %vm267_vm1, %v8022_v9  ;;  %v443_v9 = vld [vmem:[#allocation2 + $0x230] sm:$0xff] }
 0x1e4   : > { %7116 = vmatprep.subr.msk.bf16.mxu0 %vm686_vm0, %v266_v32 }
 0x1ea   : > { %6195 = vmatmul.mubr.msk.bf16.gmra.mrb[4].mxu0 %vm267_vm1, %v8034_v59  ;;  %v2073_v59 = vrot.slane %v441_v3, 7 }
 0x1eb   : > { %6198 = vmatprep.mubr.msk.bf16.mxu0 %vm267_vm1, %v8038_v36  ;;  %v2074_v36 = vrot.slane %v442_v53, 7 }
 0x1f2   : > { %6199 = vmatmul.mubr.msk.bf16.gmra.mrb[8].mxu0 %vm267_vm1, %v8050_v1  ;;  %v2076_v1 = vrot.slane %v443_v9, 7 }
 0x1f3   : > { %6202 = vmatprep.mubr.msk.bf16.mxu0 %vm267_vm1, %v8054_v48  ;;  %v2075_v48 = vsel %vm493_vm3, %v2073_v59, %v2074_v36 }
 0x1fa   : > { %6203 = vmatmul.mubr.msk.bf16.gmra.mrb[12].mxu0 %vm267_vm1, %v8066_v41  ;;  %v2077_v41 = vsel %vm493_vm3, %v2074_v36, %v2076_v1  ;;  %v3585_v36 = vrot.slane %v2880_v20, 1 }
 0x1fb   : > { %6206 = vmatprep.mubr.msk.bf16.mxu0 %vm267_vm1, %v8070_v58  ;;  %v2080_v58 = vpack.c.bf16 %v2077_v41, %v2075_v48  ;;  %v3590_v41 = vrot.slane %v2884_v29, 1 }
 0x202   : > { %6207 = vmatmul.mubr.msk.bf16.gmra.mrb[16].mxu0 %vm267_vm1, %v8082_v49  ;;  %v2493_v49 = vsel %vm686_vm0, %v266_v32, 0 }
 0x203   : > { %6210 = vmatprep.mubr.msk.bf16.mxu0 %vm267_vm1, %v8086_v45  ;;  %v2280_v45 = vpack.c.bf16 %v443_v9, %v442_v53 }
 0x20a   : > { %6211 = vmatmul.mubr.msk.bf16.gmra.mrb[20].mxu0 %vm267_vm1, %v8108_v18  ;;  %v2873_v18 = vld [vmem:[#allocation3] sm:$0xff] }
 0x20b   : > { %6214 = vmatprep.mubr.msk.bf16.mxu0 %vm267_vm1, %v8112_v44 }
 0x212   : > { %6215 = vmatmul.mubr.msk.bf16.gmra.mrb[24].mxu0 %vm267_vm1, %v8120_v57  ;;  %v2993_v57 = vrot.slane %v2873_v18, 7  ;;  %v2892_v18 = vld [vmem:[#allocation3 + $0x98] sm:$0xff] }
 0x213   : > { %6218 = vmatprep.mubr.msk.bf16.mxu0 %vm267_vm1, %v8201_v51 }
 0x21a   : > { %6219 = vmatmul.mubr.msk.bf16.gmra.mrb[28].mxu0 %vm267_vm1, %v2080_v58 }
 0x21b   : > { %6224 = vmatprep.mubr.msk.bf16.mxu0 %vm267_vm1, %v9474_v46 }
 0x222   : > { %6225 = vmatmul.mubr.msk.bf16.vlgmr.msra.gmra.mrb[0].mxu0 %vm267_vm1, %v9475_v47 }
 0x223   : > { %6257 = vmatpush3.bf16.msra.mxu0 %v2493_v49  ;;  %6228 = vmatprep.mubr.msk.bf16.mxu0 %vm267_vm1, %v9476_v2 }
 0x22a   : > { %6229 = vmatmul.mubr.msk.bf16.gmra.mrb[4].mxu0 %vm267_vm1, %v9477_v37 }
 0x22b   : > { %6232 = vmatprep.mubr.msk.bf16.mxu0 %vm267_vm1, %v9478_v7 }
 0x232   : > { %6233 = vmatmul.mubr.msk.bf16.gmra.mrb[8].mxu0 %vm267_vm1, %v9479_v5 }
 0x233   : > { %6236 = vmatprep.mubr.msk.bf16.mxu0 %vm267_vm1, %v9480_v21 }
 0x23a   : > { %6237 = vmatmul.mubr.msk.bf16.gmra.mrb[12].mxu0 %vm267_vm1, %v9481_v10 }
 0x23b   : > { %6240 = vmatprep.mubr.msk.bf16.mxu0 %vm267_vm1, %v9482_v42 }
 0x242   : > { %6241 = vmatmul.mubr.msk.bf16.gmra.mrb[16].mxu0 %vm267_vm1, %v9483_v52 }
 0x243   : > { %6244 = vmatprep.mubr.msk.bf16.mxu0 %vm267_vm1, %v9484_v54 }
 0x24a   : > { %6245 = vmatmul.mubr.msk.bf16.gmra.mrb[20].mxu0 %vm267_vm1, %v9485_v11 }
 0x24b   : > { %6248 = vmatprep.mubr.msk.bf16.mxu0 %vm267_vm1, %v9486_v30 }
 0x252   : > { %6249 = vmatmul.mubr.msk.bf16.gmra.mrb[24].mxu0 %vm267_vm1, %v7975_v17  ;;  %v444_v17 = vld [vmem:[#allocation2 + $0x238] sm:$0xff] }
 0x253   : > { %6252 = vmatprep.mubr.msk.bf16.mxu0 %vm267_vm1, %v8240_v43 }
 0x25a   : > { %6253 = vmatmul.mubr.msk.bf16.gmra.mrb[28].mxu0 %vm267_vm1, %v2280_v45 }
 0x25b   : > { %6258 = vmatprep.mubr.msk.bf16.mxu0 %vm267_vm1, %v7863_v28  ;;  %v2482_v28 = vrot.slane %v443_v9, 1 }
 0x262   : > { %6259 = vmatmul.mubr.msk.bf16.vlgmr.msra.gmra.mrb[0].mxu0 %vm267_vm1, %v7871_v26  ;;  %v2481_v26 = vrot.slane %v442_v53, 1 }
 0x263   : > { %6262 = vmatprep.mubr.msk.bf16.mxu0 %vm267_vm1, %v7879_v14  ;;  %v2484_v14 = vrot.slane %v444_v17, 1 }
 0x26a   : > { %6263 = vmatmul.mubr.msk.bf16.gmra.mrb[4].mxu0 %vm267_vm1, %v7887_v39  ;;  %v2483_v39 = vsel %vm1079_vm2, %v2481_v26, %v2482_v28 }
 0x26b   : > { %6266 = vmatprep.mubr.msk.bf16.mxu0 %vm267_vm1, %v7897_v13  ;;  %v2485_v13 = vsel %vm1079_vm2, %v2482_v28, %v2484_v14 }
 0x272   : > { %6267 = vmatmul.mubr.msk.bf16.gmra.mrb[8].mxu0 %vm267_vm1, %v7907_v23  ;;  %v2488_v23 = vpack.c.bf16 %v2485_v13, %v2483_v39 }
 0x273   : > { %6270 = vmatprep.mubr.msk.bf16.mxu0 %vm267_vm1, %v7917_v12  ;;  %v2760_v12 = vld [vmem:[%s9288_s3 + $0x2] sm:$0x3] }
 0x274   : > { %7117 = vmatprep.subr.msk.bf16.mxu1 %vm686_vm0, %v2760_v12 }
 0x27a   : > { %6271 = vmatmul.mubr.msk.bf16.gmra.mrb[12].mxu0 %vm267_vm1, %v7925_v56  ;;  %v3186_v56 = vsel %vm686_vm0, %v2760_v12, 0 }
 0x27b   : > { %6274 = vmatprep.mubr.msk.bf16.mxu0 %vm267_vm1, %v7938_v24  ;;  %v2874_v24 = vld [vmem:[#allocation3 + $0x8] sm:$0xff]  ;;  %6291 = vmatpush3.bf16.msra.mxu1 %v3186_v56  ;;  %v8464_v56 = vld [vmem:[%s9288_s3 + $0x4] sm:$0x3] }
 0x27c   : > { %v3577_v10 = vrot.slane %v2874_v24, 1 }
 0x282   : > { %6275 = vmatmul.mubr.msk.bf16.gmra.mrb[16].mxu0 %vm267_vm1, %v7945_v22  ;;  %v2875_v22 = vld [vmem:[#allocation3 + $0x10] sm:$0xff] }
 0x283   : > { %6278 = vmatprep.mubr.msk.bf16.mxu0 %vm267_vm1, %v7951_v27  ;;  %v3121_v27 = vpack.c.bf16 %v2875_v22, %v2874_v24  ;;  %v3578_v42 = vrot.slane %v2875_v22, 1 }
 0x285   : > { %6292 = vmatprep.mubr.msk.bf16.mxu1 %vm267_vm1, %v3121_v27  ;;  %v8425_v50 = vsel %vm1079_vm2, %v3577_v10, %v3578_v42  ;;  %v8435_v9 = vsel %vm1079_vm2, %v3578_v42, %v3580_v62 }
 0x28a   : > { %6279 = vmatmul.mubr.msk.bf16.gmra.mrb[20].mxu0 %vm267_vm1, %v7956_v61  ;;  %v8397_v61 = vld [vmem:[%s9288_s3] sm:$0x3] }
 0x28b   : > { %6282 = vmatprep.mubr.msk.bf16.mxu0 %vm267_vm1, %v7977_v55  ;;  %7118 = vmatprep.subr.msk.bf16.mxu1 %vm686_vm0, %v8397_v61  ;;  %v2994_v55 = vrot.slane %v2874_v24, 7  ;;  %v3398_v39 = vsel %vm686_vm0, %v8397_v61, 0 }
 0x28d   : > { %v8405_v25 = vsel %vm493_vm3, %v2993_v57, %v2994_v55 }
 0x292   : > { %6283 = vmatmul.mubr.msk.bf16.gmra.mrb[24].mxu0 %vm267_vm1, %v7982_v33  ;;  %v2996_v33 = vrot.slane %v2875_v22, 7 }
 0x293   : > { %6286 = vmatprep.mubr.msk.bf16.mxu0 %vm267_vm1, %v8281_v15 }
 0x294   : > { %v8402_v44 = vsel %vm493_vm3, %v2994_v55, %v2996_v33 }
 0x29a   : > { %6287 = vmatmul.mubr.msk.bf16.gmra.mrb[28].mxu0 %vm267_vm1, %v2488_v23 }
 0x335   : > { %v6260_v19 = vpop.f32.mrb[0].mxu0 }
 0x336   : > { %v2697_v51 = vadd.f32 %v6260_v19, %v8412_v4  ;;  %v2529_v34 = vpop.f32.mrb[1].mxu0 }
 0x337   : > { %v2695_v63 = vadd.f32 %v8412_v4, %v2529_v34  ;;  %v6261_v0 = vpop.f32.mrb[2].mxu0 }
 0x338   : > { %v2729_v46 = vmax.f32 %v2697_v51, 0.0  ;;  %v2698_v47 = vadd.f32 %v6261_v0, %v8412_v4  ;;  %v2532_v2 = vpop.f32.mrb[3].mxu0 }
 0x339   : > { %v2727_v37 = vmax.f32 %v2695_v63, 0.0  ;;  %v2696_v7 = vadd.f32 %v8412_v4, %v2532_v2 }
 0x33a   : > { %2843 = vst.msk [vmem:[#allocation3 + $0x48] sm:$0xff] %vm267_vm1, %v2729_v46  ;;  %v2730_v5 = vmax.f32 %v2698_v47, 0.0  ;;  %v2888_v47 = vld [vmem:[#allocation3 + $0x78] sm:$0xff] }
 0x33b   : > { %2841 = vst.msk [vmem:[#allocation3 + $0x28] sm:$0xff] %vm267_vm1, %v2727_v37  ;;  %v2728_v21 = vmax.f32 %v2696_v7, 0.0 }
 0x33c   : > { %2844 = vst.msk [vmem:[#allocation3 + $0x50] sm:$0xff] %vm267_vm1, %v2730_v5  ;;  %v3600_v5 = vrot.slane %v2892_v18, 1 }
 0x33d   : > { %2842 = vst.msk [vmem:[#allocation3 + $0x30] sm:$0xff] %vm267_vm1, %v2728_v21  ;;  %v6264_v52 = vpop.f32.mrb[4].mxu0 }
 0x33e   : > { %v2701_v54 = vadd.f32 %v6264_v52, %v8412_v4  ;;  %v2545_v11 = vpop.f32.mrb[5].mxu0 }
 0x33f   : > { %v2699_v30 = vadd.f32 %v8412_v4, %v2545_v11  ;;  %v6265_v43 = vpop.f32.mrb[6].mxu0  ;;  %v3595_v11 = vrot.slane %v2888_v47, 1 }
 0x340   : > { %v2733_v31 = vmax.f32 %v2701_v54, 0.0  ;;  %v2702_v16 = vadd.f32 %v6265_v43, %v8412_v4  ;;  %v2548_v6 = vpop.f32.mrb[7].mxu0 }
 0x341   : > { %v2731_v15 = vmax.f32 %v2699_v30, 0.0  ;;  %v2700_v60 = vadd.f32 %v8412_v4, %v2548_v6  ;;  %v8429_v32 = vld [vmem:[#allocation3 + $0x48] sm:$0xff] }
 0x342   : > { %2847 = vst.msk [vmem:[#allocation3 + $0x88] sm:$0xff] %vm267_vm1, %v2733_v31  ;;  %v2734_v3 = vmax.f32 %v2702_v16, 0.0  ;;  %v8432_v53 = vld [vmem:[#allocation3 + $0x28] sm:$0xff]  ;;  %v3587_v49 = vrot.slane %v8429_v32, 1 }
 0x343   : > { %2845 = vst.msk [vmem:[#allocation3 + $0x68] sm:$0xff] %vm267_vm1, %v2731_v15  ;;  %v2732_v59 = vmax.f32 %v2700_v60, 0.0  ;;  %v8438_v1 = vld [vmem:[#allocation3 + $0x50] sm:$0xff]  ;;  %v3582_v28 = vrot.slane %v8432_v53, 1 }
 0x344   : > { %2848 = vst.msk [vmem:[#allocation3 + $0x90] sm:$0xff] %vm267_vm1, %v2734_v3  ;;  %v8443_v58 = vld [vmem:[#allocation3 + $0x30] sm:$0xff]  ;;  %v3588_v45 = vrot.slane %v8438_v1, 1  ;;  %v8459_v12 = vpack.c.bf16 %v8438_v1, %v8429_v32 }
 0x345   : > { %2846 = vst.msk [vmem:[#allocation3 + $0x70] sm:$0xff] %vm267_vm1, %v2732_v59  ;;  %v6268_v17 = vpop.f32.mrb[8].mxu0  ;;  %v8450_v26 = vpack.c.bf16 %v8443_v58, %v8432_v53  ;;  %v3583_v14 = vrot.slane %v8443_v58, 1  ;;  %v2900_v59 = vld [vmem:[#allocation3 + $0xd8] sm:$0xff] }
 0x346   : > { %v2705_v13 = vadd.f32 %v6268_v17, %v8412_v4  ;;  %v2561_v23 = vpop.f32.mrb[9].mxu0  ;;  %9488 = vst [vmem:[#allocation50_spill] sm:$0xff] %v8459_v12  ;;  %v3589_v24 = vsel %vm1079_vm2, %v3587_v49, %v3588_v45  ;;  %v3591_v33 = vsel %vm1079_vm2, %v3588_v45, %v3590_v41 }
 0x347   : > { %9487 = vst [vmem:[#allocation21_spill] sm:$0xff] %v8450_v26  ;;  %v2703_v22 = vadd.f32 %v8412_v4, %v2561_v23  ;;  %v6269_v27 = vpop.f32.mrb[10].mxu0  ;;  %6293 = vmatmul.mubr.msk.bf16.vlgmr.msra.gmra.mrb[0].mxu1 %vm267_vm1, %v8450_v26  ;;  %v3584_v61 = vsel %vm1079_vm2, %v3582_v28, %v3583_v14  ;;  %v3586_v55 = vsel %vm1079_vm2, %v3583_v14, %v3585_v36  ;;  %v2896_v23 = vld [vmem:[#allocation3 + $0xb8] sm:$0xff]  ;;  %v3006_v26 = vrot.slane %v8438_v1, 7 }
 0x348   : > { %v2737_v57 = vmax.f32 %v2705_v13, 0.0  ;;  %v2706_v19 = vadd.f32 %v6269_v27, %v8412_v4  ;;  %6325 = vmatpush3.bf16.msra.mxu1 %v3398_v39  ;;  %v2564_v51 = vpop.f32.mrb[11].mxu0  ;;  %6296 = vmatprep.mubr.msk.bf16.mxu1 %vm267_vm1, %v8459_v12  ;;  %v8481_v46 = vpack.c.bf16 %v3586_v55, %v3584_v61  ;;  %v8486_v7 = vpack.c.bf16 %v3591_v33, %v3589_v24 }
 0x349   : > { %v2735_v34 = vmax.f32 %v2703_v22, 0.0  ;;  %v2704_v63 = vadd.f32 %v8412_v4, %v2564_v51  ;;  %v8477_v0 = vld [vmem:[#allocation3 + $0x88] sm:$0xff]  ;;  %7119 = vmatprep.subr.msk.bf16.mxu1 %vm686_vm0, %v8464_v56  ;;  %v3610_v27 = vrot.slane %v2900_v59, 1  ;;  %v3004_v1 = vrot.slane %v8429_v32, 7  ;;  %v2889_v32 = vld [vmem:[#allocation3 + $0x80] sm:$0xff] }
 0x34a   : > { %2851 = vst.msk [vmem:[#allocation3 + $0xc8] sm:$0xff] %vm267_vm1, %v2737_v57  ;;  %v2738_v2 = vmax.f32 %v2706_v19, 0.0  ;;  %v8484_v37 = vld [vmem:[#allocation3 + $0x68] sm:$0xff]  ;;  %v3597_v52 = vrot.slane %v8477_v0, 1  ;;  %v3605_v19 = vrot.slane %v2896_v23, 1 }
 0x34b   : > { %2849 = vst.msk [vmem:[#allocation3 + $0xa8] sm:$0xff] %vm267_vm1, %v2735_v34  ;;  %v2736_v21 = vmax.f32 %v2704_v63, 0.0  ;;  %v8489_v10 = vld [vmem:[#allocation3 + $0x90] sm:$0xff]  ;;  %v3592_v40 = vrot.slane %v8484_v37, 1 }
 0x34c   : > { %2852 = vst.msk [vmem:[#allocation3 + $0xd0] sm:$0xff] %vm267_vm1, %v2738_v2  ;;  %v8492_v42 = vld [vmem:[#allocation3 + $0x70] sm:$0xff]  ;;  %v3598_v54 = vrot.slane %v8489_v10, 1  ;;  %v8506_v20 = vpack.c.bf16 %v8489_v10, %v8477_v0 }
 0x34d   : > { %2850 = vst.msk [vmem:[#allocation3 + $0xb0] sm:$0xff] %vm267_vm1, %v2736_v21  ;;  %v6272_v30 = vpop.f32.mrb[12].mxu0  ;;  %v8499_v43 = vpack.c.bf16 %v8492_v42, %v8484_v37  ;;  %v3593_v31 = vrot.slane %v8492_v42, 1 }
 0x34e   : > { %v2709_v16 = vadd.f32 %v6272_v30, %v8412_v4  ;;  %v2577_v6 = vpop.f32.mrb[13].mxu0  ;;  %9490 = vst [vmem:[#allocation26_spill] sm:$0xff] %v8506_v20  ;;  %v3599_v62 = vsel %vm1079_vm2, %v3597_v52, %v3598_v54  ;;  %v3601_v29 = vsel %vm1079_vm2, %v3598_v54, %v3600_v5 }
 0x34f   : > { %9489 = vst [vmem:[#allocation25_spill] sm:$0xff] %v8499_v43  ;;  %v2707_v15 = vadd.f32 %v8412_v4, %v2577_v6  ;;  %v6273_v60 = vpop.f32.mrb[14].mxu0  ;;  %6297 = vmatmul.mubr.msk.bf16.gmra.mrb[4].mxu1 %vm267_vm1, %v8499_v43  ;;  %v3594_v3 = vsel %vm1079_vm2, %v3592_v40, %v3593_v31  ;;  %v3596_v45 = vsel %vm1079_vm2, %v3593_v31, %v3595_v11  ;;  %v2908_v31 = vld [vmem:[#allocation3 + $0x118] sm:$0xff] }
 0x350   : > { %v2741_v36 = vmax.f32 %v2709_v16, 0.0  ;;  %v2710_v41 = vadd.f32 %v6273_v60, %v8412_v4  ;;  %v2580_v49 = vpop.f32.mrb[15].mxu0  ;;  %6300 = vmatprep.mubr.msk.bf16.mxu1 %vm267_vm1, %v8506_v20  ;;  %v8521_v39 = vpack.c.bf16 %v3596_v45, %v3594_v3  ;;  %v8523_v13 = vpack.c.bf16 %v3601_v29, %v3599_v62 }
 0x351   : > { %v2739_v17 = vmax.f32 %v2707_v15, 0.0  ;;  %v2708_v28 = vadd.f32 %v8412_v4, %v2580_v49  ;;  %v8519_v14 = vld [vmem:[#allocation3 + $0xc8] sm:$0xff] }
 0x352   : > { %2855 = vst.msk [vmem:[#allocation3 + $0x108] sm:$0xff] %vm267_vm1, %v2741_v36  ;;  %v2742_v24 = vmax.f32 %v2710_v41, 0.0  ;;  %v8526_v22 = vld [vmem:[#allocation3 + $0xa8] sm:$0xff]  ;;  %v3607_v18 = vrot.slane %v8519_v14, 1  ;;  %v2904_v41 = vld [vmem:[#allocation3 + $0xf8] sm:$0xff] }
 0x353   : > { %2853 = vst.msk [vmem:[#allocation3 + $0xe8] sm:$0xff] %vm267_vm1, %v2739_v17  ;;  %v2740_v61 = vmax.f32 %v2708_v28, 0.0  ;;  %v8529_v55 = vld [vmem:[#allocation3 + $0xd0] sm:$0xff]  ;;  %v3602_v63 = vrot.slane %v8526_v22, 1  ;;  %v3620_v17 = vrot.slane %v2908_v31, 1  ;;  %v2916_v31 = vld [vmem:[#allocation3 + $0x158] sm:$0xff] }
 0x354   : > { %2856 = vst.msk [vmem:[#allocation3 + $0x110] sm:$0xff] %vm267_vm1, %v2742_v24  ;;  %v8532_v33 = vld [vmem:[#allocation3 + $0xb0] sm:$0xff]  ;;  %v3608_v57 = vrot.slane %v8529_v55, 1  ;;  %v8546_v21 = vpack.c.bf16 %v8529_v55, %v8519_v14 }
 0x355   : > { %2854 = vst.msk [vmem:[#allocation3 + $0xf0] sm:$0xff] %vm267_vm1, %v2740_v61  ;;  %v6276_v51 = vpop.f32.mrb[16].mxu0  ;;  %v8539_v34 = vpack.c.bf16 %v8532_v33, %v8526_v22  ;;  %v3603_v47 = vrot.slane %v8532_v33, 1 }
 0x356   : > { %v2713_v2 = vadd.f32 %v6276_v51, %v8412_v4  ;;  %v2593_v5 = vpop.f32.mrb[17].mxu0  ;;  %9492 = vst [vmem:[#allocation32_spill] sm:$0xff] %v8546_v21  ;;  %v3609_v52 = vsel %vm1079_vm2, %v3607_v18, %v3608_v57  ;;  %v3611_v54 = vsel %vm1079_vm2, %v3608_v57, %v3610_v27  ;;  %v3615_v18 = vrot.slane %v2904_v41, 1 }
 0x357   : > { %9491 = vst [vmem:[#allocation31_spill] sm:$0xff] %v8539_v34  ;;  %v2711_v11 = vadd.f32 %v8412_v4, %v2593_v5  ;;  %v6277_v30 = vpop.f32.mrb[18].mxu0  ;;  %6301 = vmatmul.mubr.msk.bf16.gmra.mrb[8].mxu1 %vm267_vm1, %v8539_v34  ;;  %v3604_v40 = vsel %vm1079_vm2, %v3602_v63, %v3603_v47  ;;  %v3606_v29 = vsel %vm1079_vm2, %v3603_v47, %v3605_v19  ;;  %v2928_v34 = vld [vmem:[#allocation3 + $0x1b8] sm:$0xff] }
 0x358   : > { %v2745_v16 = vmax.f32 %v2713_v2, 0.0  ;;  %v2714_v6 = vadd.f32 %v6277_v30, %v8412_v4  ;;  %v2596_v62 = vpop.f32.mrb[19].mxu0  ;;  %6304 = vmatprep.mubr.msk.bf16.mxu1 %vm267_vm1, %v8546_v21  ;;  %v8561_v59 = vpack.c.bf16 %v3606_v29, %v3604_v40  ;;  %v8563_v36 = vpack.c.bf16 %v3611_v54, %v3609_v52 }
 0x359   : > { %v2743_v15 = vmax.f32 %v2711_v11, 0.0  ;;  %v2712_v60 = vadd.f32 %v8412_v4, %v2596_v62  ;;  %v8559_v3 = vld [vmem:[#allocation3 + $0x108] sm:$0xff] }
 0x35a   : > { %2859 = vst.msk [vmem:[#allocation3 + $0x148] sm:$0xff] %vm267_vm1, %v2745_v16  ;;  %v2746_v49 = vmax.f32 %v2714_v6, 0.0  ;;  %v8566_v45 = vld [vmem:[#allocation3 + $0xe8] sm:$0xff]  ;;  %v3617_v27 = vrot.slane %v8559_v3, 1 }
 0x35b   : > { %2857 = vst.msk [vmem:[#allocation3 + $0x128] sm:$0xff] %vm267_vm1, %v2743_v15  ;;  %v2744_v28 = vmax.f32 %v2712_v60, 0.0  ;;  %v8569_v23 = vld [vmem:[#allocation3 + $0x110] sm:$0xff]  ;;  %v3612_v51 = vrot.slane %v8566_v45, 1 }
 0x35c   : > { %2860 = vst.msk [vmem:[#allocation3 + $0x150] sm:$0xff] %vm267_vm1, %v2746_v49  ;;  %v8572_v24 = vld [vmem:[#allocation3 + $0xf0] sm:$0xff]  ;;  %v3618_v61 = vrot.slane %v8569_v23, 1  ;;  %v8586_v5 = vpack.c.bf16 %v8569_v23, %v8559_v3 }
 0x35d   : > { %2858 = vst.msk [vmem:[#allocation3 + $0x130] sm:$0xff] %vm267_vm1, %v2744_v28  ;;  %v6280_v57 = vpop.f32.mrb[20].mxu0  ;;  %v8579_v19 = vpack.c.bf16 %v8572_v24, %v8566_v45  ;;  %v3613_v63 = vrot.slane %v8572_v24, 1  ;;  %v2912_v28 = vld [vmem:[#allocation3 + $0x138] sm:$0xff] }
 0x35e   : > { %v2717_v47 = vadd.f32 %v6280_v57, %v8412_v4  ;;  %v2609_v2 = vpop.f32.mrb[21].mxu0  ;;  %9494 = vst [vmem:[#allocation40_spill] sm:$0xff] %v8586_v5  ;;  %v3619_v52 = vsel %vm1079_vm2, %v3617_v27, %v3618_v61  ;;  %v3621_v54 = vsel %vm1079_vm2, %v3618_v61, %v3620_v17  ;;  %v3630_v57 = vrot.slane %v2916_v31, 1 }
 0x35f   : > { %9493 = vst [vmem:[#allocation39_spill] sm:$0xff] %v8579_v19  ;;  %v2715_v11 = vadd.f32 %v8412_v4, %v2609_v2  ;;  %v6281_v30 = vpop.f32.mrb[22].mxu0  ;;  %6305 = vmatmul.mubr.msk.bf16.gmra.mrb[12].mxu1 %vm267_vm1, %v8579_v19  ;;  %v3614_v40 = vsel %vm1079_vm2, %v3612_v51, %v3613_v63  ;;  %v3616_v29 = vsel %vm1079_vm2, %v3613_v63, %v3615_v18 }
 0x360   : > { %v2749_v16 = vmax.f32 %v2717_v47, 0.0  ;;  %v2718_v6 = vadd.f32 %v6281_v30, %v8412_v4  ;;  %v2612_v62 = vpop.f32.mrb[23].mxu0  ;;  %6308 = vmatprep.mubr.msk.bf16.mxu1 %vm267_vm1, %v8586_v5  ;;  %v8601_v49 = vpack.c.bf16 %v3616_v29, %v3614_v40  ;;  %v8603_v17 = vpack.c.bf16 %v3621_v54, %v3619_v52  ;;  %v2932_v5 = vld [vmem:[#allocation3 + $0x1d8] sm:$0xff] }
 0x361   : > { %v2747_v15 = vmax.f32 %v2715_v11, 0.0  ;;  %v2716_v60 = vadd.f32 %v8412_v4, %v2612_v62  ;;  %v8599_v41 = vld [vmem:[#allocation3 + $0x148] sm:$0xff]  ;;  %v3625_v52 = vrot.slane %v2912_v28, 1 }
 0x362   : > { %2863 = vst.msk [vmem:[#allocation3 + $0x188] sm:$0xff] %vm267_vm1, %v2749_v16  ;;  %v2750_v27 = vmax.f32 %v2718_v6, 0.0  ;;  %v8606_v61 = vld [vmem:[#allocation3 + $0x128] sm:$0xff]  ;;  %v3627_v47 = vrot.slane %v8599_v41, 1 }
 0x363   : > { %2861 = vst.msk [vmem:[#allocation3 + $0x168] sm:$0xff] %vm267_vm1, %v2747_v15  ;;  %v2748_v51 = vmax.f32 %v2716_v60, 0.0  ;;  %v8609_v18 = vld [vmem:[#allocation3 + $0x150] sm:$0xff]  ;;  %v3622_v30 = vrot.slane %v8606_v61, 1 }
 0x364   : > { %2864 = vst.msk [vmem:[#allocation3 + $0x190] sm:$0xff] %vm267_vm1, %v2750_v27  ;;  %v8612_v63 = vld [vmem:[#allocation3 + $0x130] sm:$0xff]  ;;  %v3628_v2 = vrot.slane %v8609_v18, 1  ;;  %v8626_v6 = vpack.c.bf16 %v8609_v18, %v8599_v41  ;;  %v2924_v27 = vld [vmem:[#allocation3 + $0x198] sm:$0xff] }
 0x365   : > { %2862 = vst.msk [vmem:[#allocation3 + $0x170] sm:$0xff] %vm267_vm1, %v2748_v51  ;;  %v6284_v54 = vpop.f32.mrb[24].mxu0  ;;  %v8619_v11 = vpack.c.bf16 %v8612_v63, %v8606_v61  ;;  %v3623_v40 = vrot.slane %v8612_v63, 1  ;;  %v3640_v38 = vrot.slane %v2924_v27, 1 }
 0x366   : > { %v2721_v31 = vadd.f32 %v6284_v54, %v8412_v4  ;;  %v2625_v16 = vpop.f32.mrb[25].mxu0  ;;  %9496 = vst [vmem:[#allocation42_spill] sm:$0xff] %v8626_v6  ;;  %v3629_v62 = vsel %vm1079_vm2, %v3627_v47, %v3628_v2  ;;  %v3631_v29 = vsel %vm1079_vm2, %v3628_v2, %v3630_v57 }
 0x367   : > { %9495 = vst [vmem:[#allocation41_spill] sm:$0xff] %v8619_v11  ;;  %v2719_v15 = vadd.f32 %v8412_v4, %v2625_v16  ;;  %v6285_v60 = vpop.f32.mrb[26].mxu0  ;;  %6309 = vmatmul.mubr.msk.bf16.gmra.mrb[16].mxu1 %vm267_vm1, %v8619_v11  ;;  %v3624_v28 = vsel %vm1079_vm2, %v3622_v30, %v3623_v40  ;;  %v3626_v47 = vsel %vm1079_vm2, %v3623_v40, %v3625_v52  ;;  %v2920_v30 = vld [vmem:[#allocation3 + $0x178] sm:$0xff] }
 0x368   : > { %v2753_v51 = vmax.f32 %v2721_v31, 0.0  ;;  %v2722_v54 = vadd.f32 %v6285_v60, %v8412_v4  ;;  %v2628_v48 = vpop.f32.mrb[27].mxu0  ;;  %6312 = vmatprep.mubr.msk.bf16.mxu1 %vm267_vm1, %v8626_v6  ;;  %v8641_v16 = vpack.c.bf16 %v3626_v47, %v3624_v28  ;;  %v8643_v8 = vpack.c.bf16 %v3631_v29, %v3629_v62 }
 0x369   : > { %v2751_v35 = vmax.f32 %v2719_v15, 0.0  ;;  %v2720_v57 = vadd.f32 %v8412_v4, %v2628_v48  ;;  %v8639_v2 = vld [vmem:[#allocation3 + $0x188] sm:$0xff]  ;;  %v3635_v29 = vrot.slane %v2920_v30, 1 }
 0x36a   : > { %2867 = vst.msk [vmem:[#allocation3 + $0x1c8] sm:$0xff] %vm267_vm1, %v2753_v51  ;;  %v2754_v31 = vmax.f32 %v2722_v54, 0.0  ;;  %v8646_v60 = vld [vmem:[#allocation3 + $0x168] sm:$0xff]  ;;  %v3637_v40 = vrot.slane %v8639_v2, 1 }
 0x36b   : > { %2865 = vst.msk [vmem:[#allocation3 + $0x1a8] sm:$0xff] %vm267_vm1, %v2751_v35  ;;  %v2752_v6 = vmax.f32 %v2720_v57, 0.0  ;;  %v8649_v52 = vld [vmem:[#allocation3 + $0x190] sm:$0xff]  ;;  %v3632_v35 = vrot.slane %v8646_v60, 1 }
 0x36c   : > { %2868 = vst.msk [vmem:[#allocation3 + $0x1d0] sm:$0xff] %vm267_vm1, %v2754_v31  ;;  %v8652_v48 = vld [vmem:[#allocation3 + $0x170] sm:$0xff]  ;;  %v3638_v62 = vrot.slane %v8649_v52, 1  ;;  %v8666_v47 = vpack.c.bf16 %v8649_v52, %v8639_v2 }
 0x36d   : > { %2866 = vst.msk [vmem:[#allocation3 + $0x1b0] sm:$0xff] %vm267_vm1, %v2752_v6  ;;  %v6288_v15 = vpop.f32.mrb[28].mxu0  ;;  %v8659_v28 = vpack.c.bf16 %v8652_v48, %v8646_v60  ;;  %v3633_v27 = vrot.slane %v8652_v48, 1 }
 0x36e   : > { %v2725_v51 = vadd.f32 %v6288_v15, %v8412_v4  ;;  %v2641_v54 = vpop.f32.mrb[29].mxu0  ;;  %9498 = vst [vmem:[#allocation46_spill] sm:$0xff] %v8666_v47  ;;  %v3639_v57 = vsel %vm1079_vm2, %v3637_v40, %v3638_v62  ;;  %v3641_v6 = vsel %vm1079_vm2, %v3638_v62, %v3640_v38 }
 0x36f   : > { %9497 = vst [vmem:[#allocation44_spill] sm:$0xff] %v8659_v28  ;;  %v2723_v30 = vadd.f32 %v8412_v4, %v2641_v54  ;;  %v6289_v31 = vpop.f32.mrb[30].mxu0  ;;  %6313 = vmatmul.mubr.msk.bf16.gmra.mrb[20].mxu1 %vm267_vm1, %v8659_v28  ;;  %v3634_v11 = vsel %vm1079_vm2, %v3632_v35, %v3633_v27  ;;  %v3636_v40 = vsel %vm1079_vm2, %v3633_v27, %v3635_v29  ;;  %v3645_v27 = vrot.slane %v2928_v34, 1 }
 0x370   : > { %v2757_v19 = vmax.f32 %v2725_v51, 0.0  ;;  %v2726_v15 = vadd.f32 %v6289_v31, %v8412_v4  ;;  %v2644_v21 = vpop.f32.mrb[31].mxu0  ;;  %6316 = vmatprep.mubr.msk.bf16.mxu1 %vm267_vm1, %v8666_v47  ;;  %v8681_v20 = vpack.c.bf16 %v3636_v40, %v3634_v11  ;;  %v8683_v28 = vpack.c.bf16 %v3641_v6, %v3639_v57  ;;  %v2940_v40 = vld [vmem:[#allocation3 + $0x218] sm:$0xff] }
 0x371   : > { %v2755_v38 = vmax.f32 %v2723_v30, 0.0  ;;  %v2724_v62 = vadd.f32 %v8412_v4, %v2644_v21  ;;  %v8679_v54 = vld [vmem:[#allocation3 + $0x1c8] sm:$0xff]  ;;  %v3650_v31 = vrot.slane %v2932_v5, 1 }
 0x372   : > { %2871 = vst.msk [vmem:[#allocation3 + $0x208] sm:$0xff] %vm267_vm1, %v2757_v19  ;;  %v2758_v35 = vmax.f32 %v2726_v15, 0.0  ;;  %v8686_v51 = vld [vmem:[#allocation3 + $0x1a8] sm:$0xff]  ;;  %v3647_v21 = vrot.slane %v8679_v54, 1 }
 0x373   : > { %2869 = vst.msk [vmem:[#allocation3 + $0x1e8] sm:$0xff] %vm267_vm1, %v2755_v38  ;;  %v2756_v47 = vmax.f32 %v2724_v62, 0.0  ;;  %v8689_v29 = vld [vmem:[#allocation3 + $0x1d0] sm:$0xff]  ;;  %v3642_v5 = vrot.slane %v8686_v51, 1 }
 0x374   : > { %2872 = vst.msk [vmem:[#allocation3 + $0x210] sm:$0xff] %vm267_vm1, %v2758_v35  ;;  %v8692_v4 = vld [vmem:[#allocation3 + $0x1b0] sm:$0xff]  ;;  %v3648_v11 = vrot.slane %v8689_v29, 1  ;;  %v8705_v34 = vpack.c.bf16 %v8689_v29, %v8679_v54  ;;  %v2936_v35 = vld [vmem:[#allocation3 + $0x1f8] sm:$0xff] }
 0x375   : > { %2870 = vst.msk [vmem:[#allocation3 + $0x1f0] sm:$0xff] %vm267_vm1, %v2756_v47  ;;  %v8699_v19 = vpack.c.bf16 %v8692_v4, %v8686_v51  ;;  %v3643_v57 = vrot.slane %v8692_v4, 1 }
 0x376   : > { %9500 = vst [vmem:[#allocation48_spill] sm:$0xff] %v8705_v34  ;;  %v3649_v6 = vsel %vm1079_vm2, %v3647_v21, %v3648_v11  ;;  %v3651_v30 = vsel %vm1079_vm2, %v3648_v11, %v3650_v31  ;;  %v4363_v31 = vrot.slane %v2940_v40, 1  ;;  %v3655_v11 = vrot.slane %v2936_v35, 1 }
 0x377   : > { %9499 = vst [vmem:[#allocation47_spill] sm:$0xff] %v8699_v19  ;;  %6317 = vmatmul.mubr.msk.bf16.gmra.mrb[24].mxu1 %vm267_vm1, %v8699_v19  ;;  %v3644_v47 = vsel %vm1079_vm2, %v3642_v5, %v3643_v57  ;;  %v3646_v15 = vsel %vm1079_vm2, %v3643_v57, %v3645_v27  ;;  %v8717_v62 = vpack.c.bf16 %v3651_v30, %v3649_v6  ;;  %v2877_v30 = vld [vmem:[#allocation3 + $0x20] sm:$0xff]  ;;  %v3001_v35 = vrot.slane %v8443_v58, 7 }
 0x378   : > { %6320 = vmatprep.mubr.msk.bf16.mxu1 %vm267_vm1, %v8705_v34  ;;  %v8715_v38 = vpack.c.bf16 %v3646_v15, %v3644_v47  ;;  %v2881_v34 = vld [vmem:[#allocation3 + $0x40] sm:$0xff]  ;;  %v9507_v58 = vpack.c.bf16 %v8402_v44, %v8405_v25  ;;  %v3754_v44 = vsel %vm686_vm0, %v8464_v56, 0  ;;  %v3009_v56 = vrot.slane %v8484_v37, 7 }
 0x379   : > { %9502 = vst [vmem:[#allocation51_spill] sm:$0xff] %v8717_v62  ;;  %v8719_v43 = vld [vmem:[#allocation3 + $0x208] sm:$0xff]  ;;  %v2998_v62 = vrot.slane %v2877_v30, 7 }
 0x37a   : > { %9501 = vst [vmem:[#allocation49_spill] sm:$0xff] %v8715_v38  ;;  %9503 = vst [vmem:[#allocation52_spill] sm:$0xff] %v8719_v43  ;;  %v8721_v21 = vld [vmem:[#allocation3 + $0x1e8] sm:$0xff]  ;;  %v4360_v57 = vrot.slane %v8719_v43, 1  ;;  %v2999_v38 = vrot.slane %v8432_v53, 7  ;;  %v2885_v53 = vld [vmem:[#allocation3 + $0x60] sm:$0xff] }
 0x37b   : > { %v8723_v19 = vld [vmem:[#allocation3 + $0x210] sm:$0xff]  ;;  %v3652_v15 = vrot.slane %v8721_v21, 1 }
 0x37c   : > { %9504 = vst [vmem:[#allocation53_spill] sm:$0xff] %v8723_v19  ;;  %v8725_v5 = vld [vmem:[#allocation3 + $0x1f0] sm:$0xff]  ;;  %v8729_v27 = vpack.c.bf16 %v8723_v19, %v8719_v43  ;;  %v4361_v6 = vrot.slane %v8723_v19, 1 }
 0x37d   : > { %v8735_v47 = vpack.c.bf16 %v8725_v5, %v8721_v21  ;;  %v3653_v40 = vrot.slane %v8725_v5, 1 }
 0x37e   : > { %9505 = vst [vmem:[#allocation54_spill] sm:$0xff] %v8729_v27  ;;  %v4362_v12 = vsel %vm1079_vm2, %v4360_v57, %v4361_v6  ;;  %v4364_v27 = vsel %vm1079_vm2, %v4361_v6, %v4363_v31  ;;  %v3003_v6 = vrot.slane %v2881_v34, 7  ;;  %v3014_v34 = vrot.slane %v8477_v0, 7  ;;  %v2897_v0 = vld [vmem:[#allocation3 + $0xc0] sm:$0xff] }
 0x37f   : > { %9506 = vst [vmem:[#allocation55_spill] sm:$0xff] %v8735_v47  ;;  %6321 = vmatmul.mubr.msk.bf16.gmra.mrb[28].mxu1 %vm267_vm1, %v8735_v47  ;;  %v3654_v43 = vsel %vm1079_vm2, %v3652_v15, %v3653_v40  ;;  %v3656_v19 = vsel %vm1079_vm2, %v3653_v40, %v3655_v11  ;;  %v8754_v31 = vpack.c.bf16 %v4364_v27, %v4362_v12  ;;  %v3011_v12 = vrot.slane %v8492_v42, 7  ;;  %v2893_v40 = vld [vmem:[#allocation3 + $0xa0] sm:$0xff] }
 0x380   : > { %6326 = vmatprep.mubr.msk.bf16.mxu1 %vm267_vm1, %v9507_v58  ;;  %v8752_v57 = vpack.c.bf16 %v3656_v19, %v3654_v43  ;;  %v3002_v47 = vsel %vm493_vm3, %v2999_v38, %v3001_v35  ;;  %v3007_v15 = vsel %vm493_vm3, %v3004_v1, %v3006_v26  ;;  %v3000_v11 = vsel %vm493_vm3, %v2998_v62, %v2999_v38  ;;  %v8771_v19 = vld [vmem:[%s9288_s3 + $0x6] sm:$0x3] }
 0x381   : > { %v8760_v30 = vpack.c.bf16 %v3002_v47, %v3000_v11  ;;  %v3005_v25 = vsel %vm493_vm3, %v3003_v6, %v3004_v1  ;;  %v3016_v26 = vrot.slane %v8489_v10, 7  ;;  %v3008_v42 = vrot.slane %v2885_v53, 7 }
 0x382   : > { %v8766_v43 = vpack.c.bf16 %v3007_v15, %v3005_v25  ;;  %v3013_v38 = vrot.slane %v2889_v32, 7  ;;  %v3012_v62 = vsel %vm493_vm3, %v3009_v56, %v3011_v12  ;;  %v3021_v35 = vrot.slane %v8532_v33, 7  ;;  %v2901_v32 = vld [vmem:[#allocation3 + $0xe0] sm:$0xff] }
 0x383   : > { %v3017_v10 = vsel %vm493_vm3, %v3014_v34, %v3016_v26  ;;  %v3010_v27 = vsel %vm493_vm3, %v3008_v42, %v3009_v56  ;;  %v3026_v1 = vrot.slane %v8529_v55, 7  ;;  %v3019_v6 = vrot.slane %v8526_v22, 7  ;;  %v2905_v56 = vld [vmem:[#allocation3 + $0x100] sm:$0xff] }
 0x384   : > { %v8785_v47 = vpack.c.bf16 %v3012_v62, %v3010_v27  ;;  %v3015_v37 = vsel %vm493_vm3, %v3013_v38, %v3014_v34  ;;  %v3018_v15 = vrot.slane %v2893_v40, 7  ;;  %v3024_v11 = vrot.slane %v8519_v14, 7  ;;  %v2909_v40 = vld [vmem:[#allocation3 + $0x120] sm:$0xff] }
 0x385   : > { %v8789_v58 = vpack.c.bf16 %v3017_v10, %v3015_v37  ;;  %v3022_v25 = vsel %vm493_vm3, %v3019_v6, %v3021_v35  ;;  %v3031_v22 = vrot.slane %v8572_v24, 7  ;;  %v3036_v42 = vrot.slane %v8569_v23, 7 }
 0x386   : > { %v3027_v33 = vsel %vm493_vm3, %v3024_v11, %v3026_v1  ;;  %v3020_v53 = vsel %vm493_vm3, %v3018_v15, %v3019_v6  ;;  %v3029_v14 = vrot.slane %v8566_v45, 7  ;;  %v3028_v34 = vrot.slane %v2901_v32, 7  ;;  %v2921_v32 = vld [vmem:[#allocation3 + $0x180] sm:$0xff] }
 0x387   : > { %6327 = vmatmul.mubr.msk.bf16.vlgmr.msra.gmra.mrb[0].mxu1 %vm267_vm1, %v8760_v30  ;;  %v8801_v12 = vpack.c.bf16 %v3022_v25, %v3020_v53  ;;  %v3034_v38 = vrot.slane %v8559_v3, 7  ;;  %v3033_v62 = vrot.slane %v2905_v56, 7  ;;  %v3041_v45 = vrot.slane %v8612_v63, 7  ;;  %v2917_v53 = vld [vmem:[#allocation3 + $0x160] sm:$0xff] }
 0x388   : > { %6359 = vmatpush3.bf16.msra.mxu1 %v3754_v44  ;;  %6330 = vmatprep.mubr.msk.bf16.mxu1 %vm267_vm1, %v8766_v43  ;;  %v3023_v44 = vrot.slane %v2897_v0, 7  ;;  %v3032_v10 = vsel %vm493_vm3, %v3029_v14, %v3031_v22  ;;  %v3030_v27 = vsel %vm493_vm3, %v3028_v34, %v3029_v14  ;;  %v2913_v0 = vld [vmem:[#allocation3 + $0x140] sm:$0xff]  ;;  %v3046_v1 = vrot.slane %v8609_v18, 7 }
 0x389   : > { %7120 = vmatprep.subr.msk.bf16.mxu1 %vm686_vm0, %v8771_v19  ;;  %v3037_v24 = vsel %vm493_vm3, %v3034_v38, %v3036_v42  ;;  %v8817_v37 = vpack.c.bf16 %v3032_v10, %v3030_v27  ;;  %v3035_v23 = vsel %vm493_vm3, %v3033_v62, %v3034_v38  ;;  %v3039_v3 = vrot.slane %v8606_v61, 7  ;;  %v2925_v10 = vld [vmem:[#allocation3 + $0x1a0] sm:$0xff] }
 0x38a   : > { %v3025_v55 = vsel %vm493_vm3, %v3023_v44, %v3024_v11  ;;  %v8821_v35 = vpack.c.bf16 %v3037_v24, %v3035_v23  ;;  %v3038_v6 = vrot.slane %v2909_v40, 7  ;;  %v3044_v15 = vrot.slane %v8599_v41, 7  ;;  %v2929_v27 = vld [vmem:[#allocation3 + $0x1c0] sm:$0xff] }
 0x38b   : > { %v8805_v26 = vpack.c.bf16 %v3027_v33, %v3025_v55  ;;  %v3043_v11 = vrot.slane %v2913_v0, 7  ;;  %v3042_v44 = vsel %vm493_vm3, %v3039_v3, %v3041_v45  ;;  %v3051_v61 = vrot.slane %v8652_v48, 7 }
 0x38c   : > { %v3047_v63 = vsel %vm493_vm3, %v3044_v15, %v3046_v1  ;;  %v3040_v25 = vsel %vm493_vm3, %v3038_v6, %v3039_v3  ;;  %v3056_v22 = vrot.slane %v8649_v52, 7  ;;  %v3049_v41 = vrot.slane %v8646_v60, 7 }
 0x38d   : > { %v8833_v33 = vpack.c.bf16 %v3042_v44, %v3040_v25  ;;  %v3045_v18 = vsel %vm493_vm3, %v3043_v11, %v3044_v15  ;;  %v3048_v56 = vrot.slane %v2917_v53, 7  ;;  %v3054_v42 = vrot.slane %v8639_v2, 7  ;;  %v2933_v15 = vld [vmem:[#allocation3 + $0x1e0] sm:$0xff]  ;;  %v2763_v53 = vld [vmem:[%s9288_s3 + $0x8] sm:$0x3] }
 0x38e   : > { %v8837_v55 = vpack.c.bf16 %v3047_v63, %v3045_v18  ;;  %v3053_v14 = vrot.slane %v2921_v32, 7  ;;  %v3052_v34 = vsel %vm493_vm3, %v3049_v41, %v3051_v61  ;;  %v3061_v60 = vrot.slane %v8692_v4, 7  ;;  %v2764_v61 = vld [vmem:[%s9288_s3 + $0xa] sm:$0x3] }
 0x38f   : > { %6331 = vmatmul.mubr.msk.bf16.gmra.mrb[4].mxu1 %vm267_vm1, %v8785_v47  ;;  %v3057_v48 = vsel %vm493_vm3, %v3054_v42, %v3056_v22  ;;  %v3050_v38 = vsel %vm493_vm3, %v3048_v56, %v3049_v41  ;;  %v3066_v23 = vrot.slane %v8689_v29, 7  ;;  %v3059_v2 = vrot.slane %v8686_v51, 7  ;;  %v9511_v32 = vld [vmem:[#allocation53_spill] sm:$0xff]  ;;  %v9512_v56 = vld [vmem:[#allocation52_spill] sm:$0xff] }
 0x390   : > { %6334 = vmatprep.mubr.msk.bf16.mxu1 %vm267_vm1, %v8789_v58  ;;  %v8849_v62 = vpack.c.bf16 %v3052_v34, %v3050_v38  ;;  %v3055_v52 = vsel %vm493_vm3, %v3053_v14, %v3054_v42  ;;  %v3058_v40 = vrot.slane %v2925_v10, 7  ;;  %v3064_v45 = vrot.slane %v8679_v54, 7  ;;  %v9513_v38 = vld [vmem:[#allocation21_spill] sm:$0xff] }
 0x391   : > { %v8853_v24 = vpack.c.bf16 %v3057_v48, %v3055_v52  ;;  %v3063_v0 = vrot.slane %v2929_v27, 7  ;;  %v3062_v1 = vsel %vm493_vm3, %v3059_v2, %v3061_v60  ;;  %v3071_v51 = vrot.slane %v8725_v5, 7  ;;  %v2765_v10 = vld [vmem:[%s9288_s3 + $0xc] sm:$0x3]  ;;  %v9514_v60 = vld [vmem:[#allocation50_spill] sm:$0xff] }
 0x392   : > { %v3067_v4 = vsel %vm493_vm3, %v3064_v45, %v3066_v23  ;;  %v3060_v3 = vsel %vm493_vm3, %v3058_v40, %v3059_v2  ;;  %v3069_v54 = vrot.slane %v8721_v21, 7  ;;  %v3068_v44 = vrot.slane %v2933_v15, 7  ;;  %v9515_v27 = vld [vmem:[#allocation25_spill] sm:$0xff]  ;;  %v9516_v23 = vld [vmem:[#allocation26_spill] sm:$0xff]  ;;  %v9517_v2 = vld [vmem:[#allocation31_spill] sm:$0xff] }
 0x393   : > { %v8865_v6 = vpack.c.bf16 %v3062_v1, %v3060_v3  ;;  %v3065_v29 = vsel %vm493_vm3, %v3063_v0, %v3064_v45  ;;  %v9508_v5 = vpack.c.bf16 %v8435_v9, %v8425_v50  ;;  %v3964_v21 = vsel %vm686_vm0, %v8771_v19, 0  ;;  %v9509_v50 = vld [vmem:[#allocation49_spill] sm:$0xff]  ;;  %v9510_v9 = vld [vmem:[#allocation51_spill] sm:$0xff]  ;;  %v9518_v40 = vld [vmem:[#allocation32_spill] sm:$0xff] }
 0x394   : > { %v8869_v11 = vpack.c.bf16 %v3067_v4, %v3065_v29  ;;  %v3072_v63 = vsel %vm493_vm3, %v3069_v54, %v3071_v51  ;;  %v3070_v25 = vsel %vm493_vm3, %v3068_v44, %v3069_v54  ;;  %v4164_v19 = vsel %vm686_vm0, %v2763_v53, 0  ;;  %v9519_v45 = vld [vmem:[#allocation39_spill] sm:$0xff]  ;;  %v9520_v0 = vld [vmem:[#allocation40_spill] sm:$0xff]  ;;  %v9521_v1 = vld [vmem:[#allocation41_spill] sm:$0xff] }
 0x395   : > { %v8878_v18 = vpack.c.bf16 %v3072_v63, %v3070_v25  ;;  %v3955_v22 = vrot.slane %v9511_v32, 7  ;;  %v3953_v42 = vrot.slane %v9512_v56, 7  ;;  %v4372_v52 = vsel %vm686_vm0, %v2764_v61, 0  ;;  %v9522_v4 = vld [vmem:[#allocation42_spill] sm:$0xff]  ;;  %v9523_v3 = vld [vmem:[#allocation44_spill] sm:$0xff]  ;;  %v9525_v15 = vld [vmem:[#allocation47_spill] sm:$0xff] }
 0x396   : > { %v9524_v29 = vld [vmem:[#allocation46_spill] sm:$0xff]  ;;  %v9526_v51 = vld [vmem:[#allocation48_spill] sm:$0xff]  ;;  %v9527_v54 = vld [vmem:[#allocation55_spill] sm:$0xff]  ;;  %v4582_v63 = vsel %vm686_vm0, %v2765_v10, 0 }
 0x397   : > { %6335 = vmatmul.mubr.msk.bf16.gmra.mrb[8].mxu1 %vm267_vm1, %v8801_v12  ;;  %v3956_v14 = vsel %vm493_vm3, %v3953_v42, %v3955_v22  ;;  %v9528_v44 = vld [vmem:[#allocation54_spill] sm:$0xff]  ;;  %v2766_v25 = vld [vmem:[%s9288_s3 + $0xe] sm:$0x3] }
 0x398   : > { %6338 = vmatprep.mubr.msk.bf16.mxu1 %vm267_vm1, %v8805_v26  ;;  %v9532_v22 = vld [vmem:[#allocation5_spill] sm:$0xff] }
 0x39f   : > { %6339 = vmatmul.mubr.msk.bf16.gmra.mrb[12].mxu1 %vm267_vm1, %v8817_v37 }
 0x3a0   : > { %6342 = vmatprep.mubr.msk.bf16.mxu1 %vm267_vm1, %v8821_v35 }
 0x3a7   : > { %6343 = vmatmul.mubr.msk.bf16.gmra.mrb[16].mxu1 %vm267_vm1, %v8833_v33 }
 0x3a8   : > { %6346 = vmatprep.mubr.msk.bf16.mxu1 %vm267_vm1, %v8837_v55 }
 0x3af   : > { %6347 = vmatmul.mubr.msk.bf16.gmra.mrb[20].mxu1 %vm267_vm1, %v8849_v62 }
 0x3b0   : > { %6350 = vmatprep.mubr.msk.bf16.mxu1 %vm267_vm1, %v8853_v24 }
 0x3b7   : > { %6351 = vmatmul.mubr.msk.bf16.gmra.mrb[24].mxu1 %vm267_vm1, %v8865_v6 }
 0x3b8   : > { %6354 = vmatprep.mubr.msk.bf16.mxu1 %vm267_vm1, %v8869_v11 }
 0x3bf   : > { %6355 = vmatmul.mubr.msk.bf16.gmra.mrb[28].mxu1 %vm267_vm1, %v8878_v18 }
 0x3c0   : > { %6360 = vmatprep.mubr.msk.bf16.mxu1 %vm267_vm1, %v9508_v5  ;;  %v2767_v5 = vld [vmem:[%s9288_s3 + $0x10] sm:$0x3] }
 0x3c7   : > { %6361 = vmatmul.mubr.msk.bf16.vlgmr.msra.gmra.mrb[0].mxu1 %vm267_vm1, %v8481_v46 }
 0x3c8   : > { %6393 = vmatpush3.bf16.msra.mxu1 %v3964_v21  ;;  %6364 = vmatprep.mubr.msk.bf16.mxu1 %vm267_vm1, %v8486_v7 }
 0x3c9   : > { %7121 = vmatprep.subr.msk.bf16.mxu1 %vm686_vm0, %v2763_v53  ;;  %v9530_v53 = vld [vmem:[#allocation4_spill] sm:$0xff] }
 0x3cf   : > { %6365 = vmatmul.mubr.msk.bf16.gmra.mrb[4].mxu1 %vm267_vm1, %v8521_v39 }
 0x3d0   : > { %6368 = vmatprep.mubr.msk.bf16.mxu1 %vm267_vm1, %v8523_v13 }
 0x3d7   : > { %6369 = vmatmul.mubr.msk.bf16.gmra.mrb[8].mxu1 %vm267_vm1, %v8561_v59 }
 0x3d8   : > { %6372 = vmatprep.mubr.msk.bf16.mxu1 %vm267_vm1, %v8563_v36 }
 0x3df   : > { %6373 = vmatmul.mubr.msk.bf16.gmra.mrb[12].mxu1 %vm267_vm1, %v8601_v49 }
 0x3e0   : > { %6376 = vmatprep.mubr.msk.bf16.mxu1 %vm267_vm1, %v8603_v17 }
 0x3e7   : > { %6377 = vmatmul.mubr.msk.bf16.gmra.mrb[16].mxu1 %vm267_vm1, %v8641_v16 }
 0x3e8   : > { %6380 = vmatprep.mubr.msk.bf16.mxu1 %vm267_vm1, %v8643_v8 }
 0x3ef   : > { %6381 = vmatmul.mubr.msk.bf16.gmra.mrb[20].mxu1 %vm267_vm1, %v8681_v20 }
 0x3f0   : > { %6384 = vmatprep.mubr.msk.bf16.mxu1 %vm267_vm1, %v8683_v28 }
 0x3f7   : > { %6385 = vmatmul.mubr.msk.bf16.gmra.mrb[24].mxu1 %vm267_vm1, %v9509_v50 }
 0x3f8   : > { %6388 = vmatprep.mubr.msk.bf16.mxu1 %vm267_vm1, %v9510_v9 }
 0x3ff   : > { %6389 = vmatmul.mubr.msk.bf16.gmra.mrb[28].mxu1 %vm267_vm1, %v8752_v57 }
 0x400   : > { %6394 = vmatprep.mubr.msk.bf16.mxu1 %vm267_vm1, %v8760_v30  ;;  %v2937_v30 = vld [vmem:[#allocation3 + $0x200] sm:$0xff] }
 0x401   : > { %v3952_v41 = vrot.slane %v2937_v30, 7 }
 0x403   : > { %v3954_v34 = vsel %vm493_vm3, %v3952_v41, %v3953_v42 }
 0x404   : > { %v8961_v48 = vpack.c.bf16 %v3956_v14, %v3954_v34 }
 0x407   : > { %6395 = vmatmul.mubr.msk.bf16.vlgmr.msra.gmra.mrb[0].mxu1 %vm267_vm1, %v8766_v43 }
 0x408   : > { %6427 = vmatpush3.bf16.msra.mxu1 %v4164_v19  ;;  %6398 = vmatprep.mubr.msk.bf16.mxu1 %vm267_vm1, %v8785_v47 }
 0x409   : > { %7122 = vmatprep.subr.msk.bf16.mxu1 %vm686_vm0, %v2764_v61  ;;  %v9531_v61 = vld [vmem:[#allocation7_spill] sm:$0xff] }
 0x40f   : > { %6399 = vmatmul.mubr.msk.bf16.gmra.mrb[4].mxu1 %vm267_vm1, %v8789_v58 }
 0x410   : > { %6402 = vmatprep.mubr.msk.bf16.mxu1 %vm267_vm1, %v8801_v12 }
 0x417   : > { %6403 = vmatmul.mubr.msk.bf16.gmra.mrb[8].mxu1 %vm267_vm1, %v8805_v26 }
 0x418   : > { %6406 = vmatprep.mubr.msk.bf16.mxu1 %vm267_vm1, %v8817_v37 }
 0x41f   : > { %6407 = vmatmul.mubr.msk.bf16.gmra.mrb[12].mxu1 %vm267_vm1, %v8821_v35 }
 0x420   : > { %6410 = vmatprep.mubr.msk.bf16.mxu1 %vm267_vm1, %v8833_v33 }
 0x427   : > { %6411 = vmatmul.mubr.msk.bf16.gmra.mrb[16].mxu1 %vm267_vm1, %v8837_v55 }
 0x428   : > { %6414 = vmatprep.mubr.msk.bf16.mxu1 %vm267_vm1, %v8849_v62 }
 0x42f   : > { %6415 = vmatmul.mubr.msk.bf16.gmra.mrb[20].mxu1 %vm267_vm1, %v8853_v24 }
 0x430   : > { %6418 = vmatprep.mubr.msk.bf16.mxu1 %vm267_vm1, %v8865_v6 }
 0x437   : > { %6419 = vmatmul.mubr.msk.bf16.gmra.mrb[24].mxu1 %vm267_vm1, %v8869_v11 }
 0x438   : > { %6422 = vmatprep.mubr.msk.bf16.mxu1 %vm267_vm1, %v8878_v18 }
 0x43f   : > { %6423 = vmatmul.mubr.msk.bf16.gmra.mrb[28].mxu1 %vm267_vm1, %v8961_v48 }
 0x440   : > { %6428 = vmatprep.mubr.msk.bf16.mxu1 %vm267_vm1, %v9513_v38 }
 0x447   : > { %6429 = vmatmul.mubr.msk.bf16.vlgmr.msra.gmra.mrb[0].mxu1 %vm267_vm1, %v9514_v60 }
 0x448   : > { %6461 = vmatpush3.bf16.msra.mxu1 %v4372_v52  ;;  %6432 = vmatprep.mubr.msk.bf16.mxu1 %vm267_vm1, %v9515_v27 }
 0x449   : > { %7123 = vmatprep.subr.msk.bf16.mxu1 %vm686_vm0, %v2765_v10  ;;  %v9533_v10 = vld [vmem:[#allocation10_spill] sm:$0xff] }
 0x44f   : > { %6433 = vmatmul.mubr.msk.bf16.gmra.mrb[4].mxu1 %vm267_vm1, %v9516_v23 }
 0x450   : > { %6436 = vmatprep.mubr.msk.bf16.mxu1 %vm267_vm1, %v9517_v2 }
 0x457   : > { %6437 = vmatmul.mubr.msk.bf16.gmra.mrb[8].mxu1 %vm267_vm1, %v9518_v40 }
 0x458   : > { %6440 = vmatprep.mubr.msk.bf16.mxu1 %vm267_vm1, %v9519_v45 }
 0x45f   : > { %6441 = vmatmul.mubr.msk.bf16.gmra.mrb[12].mxu1 %vm267_vm1, %v9520_v0 }
 0x460   : > { %6444 = vmatprep.mubr.msk.bf16.mxu1 %vm267_vm1, %v9521_v1 }
 0x467   : > { %6445 = vmatmul.mubr.msk.bf16.gmra.mrb[16].mxu1 %vm267_vm1, %v9522_v4 }
 0x468   : > { %6448 = vmatprep.mubr.msk.bf16.mxu1 %vm267_vm1, %v9523_v3 }
 0x46f   : > { %6449 = vmatmul.mubr.msk.bf16.gmra.mrb[20].mxu1 %vm267_vm1, %v9524_v29 }
 0x470   : > { %6452 = vmatprep.mubr.msk.bf16.mxu1 %vm267_vm1, %v9525_v15 }
 0x477   : > { %6453 = vmatmul.mubr.msk.bf16.gmra.mrb[24].mxu1 %vm267_vm1, %v9526_v51 }
 0x478   : > { %6456 = vmatprep.mubr.msk.bf16.mxu1 %vm267_vm1, %v9527_v54 }
 0x47f   : > { %6457 = vmatmul.mubr.msk.bf16.gmra.mrb[28].mxu1 %vm267_vm1, %v9528_v44 }
 0x480   : > { %6462 = vmatprep.mubr.msk.bf16.mxu1 %vm267_vm1, %v8481_v46  ;;  %v4782_v46 = vsel %vm686_vm0, %v2766_v25, 0 }
 0x487   : > { %6463 = vmatmul.mubr.msk.bf16.vlgmr.msra.gmra.mrb[0].mxu1 %vm267_vm1, %v8486_v7 }
 0x488   : > { %6495 = vmatpush3.bf16.msra.mxu1 %v4582_v63  ;;  %6466 = vmatprep.mubr.msk.bf16.mxu1 %vm267_vm1, %v8521_v39 }
 0x489   : > { %7124 = vmatprep.subr.msk.bf16.mxu1 %vm686_vm0, %v2766_v25 }
 0x48f   : > { %6467 = vmatmul.mubr.msk.bf16.gmra.mrb[4].mxu1 %vm267_vm1, %v8523_v13 }
 0x490   : > { %6470 = vmatprep.mubr.msk.bf16.mxu1 %vm267_vm1, %v8561_v59 }
 0x497   : > { %6471 = vmatmul.mubr.msk.bf16.gmra.mrb[8].mxu1 %vm267_vm1, %v8563_v36 }
 0x498   : > { %6474 = vmatprep.mubr.msk.bf16.mxu1 %vm267_vm1, %v8601_v49 }
 0x49f   : > { %6475 = vmatmul.mubr.msk.bf16.gmra.mrb[12].mxu1 %vm267_vm1, %v8603_v17 }
 0x4a0   : > { %6478 = vmatprep.mubr.msk.bf16.mxu1 %vm267_vm1, %v8641_v16 }
 0x4a7   : > { %6479 = vmatmul.mubr.msk.bf16.gmra.mrb[16].mxu1 %vm267_vm1, %v8643_v8 }
 0x4a8   : > { %6482 = vmatprep.mubr.msk.bf16.mxu1 %vm267_vm1, %v8681_v20 }
 0x4af   : > { %6483 = vmatmul.mubr.msk.bf16.gmra.mrb[20].mxu1 %vm267_vm1, %v8683_v28 }
 0x4b0   : > { %6486 = vmatprep.mubr.msk.bf16.mxu1 %vm267_vm1, %v9509_v50 }
 0x4b7   : > { %6487 = vmatmul.mubr.msk.bf16.gmra.mrb[24].mxu1 %vm267_vm1, %v9510_v9 }
 0x4b8   : > { %6490 = vmatprep.mubr.msk.bf16.mxu1 %vm267_vm1, %v8752_v57 }
 0x4bf   : > { %6491 = vmatmul.mubr.msk.bf16.gmra.mrb[28].mxu1 %vm267_vm1, %v8754_v31 }
 0x4c0   : > { %6496 = vmatprep.mubr.msk.bf16.mxu1 %vm267_vm1, %v8766_v43  ;;  %v2941_v43 = vld [vmem:[#allocation3 + $0x220] sm:$0xff] }
 0x4c7   : > { %6497 = vmatmul.mubr.msk.bf16.vlgmr.msra.gmra.mrb[0].mxu1 %vm267_vm1, %v8785_v47  ;;  %v2942_v47 = vld [vmem:[#allocation3 + $0x228] sm:$0xff] }
 0x4c8   : > { %6529 = vmatpush3.bf16.msra.mxu1 %v4782_v46  ;;  %6500 = vmatprep.mubr.msk.bf16.mxu1 %vm267_vm1, %v8789_v58  ;;  %v2943_v58 = vld [vmem:[#allocation3 + $0x230] sm:$0xff] }
 0x4c9   : > { %7125 = vmatprep.subr.msk.bf16.mxu1 %vm686_vm0, %v2767_v5 }
 0x4cf   : > { %6501 = vmatmul.mubr.msk.bf16.gmra.mrb[4].mxu1 %vm267_vm1, %v8801_v12  ;;  %v4570_v12 = vrot.slane %v2941_v43, 7  ;;  %v9537_v43 = vld [vmem:[#allocation14_spill] sm:$0xff] }
 0x4d0   : > { %6504 = vmatprep.mubr.msk.bf16.mxu1 %vm267_vm1, %v8805_v26  ;;  %v4571_v26 = vrot.slane %v2942_v47, 7 }
 0x4d7   : > { %6505 = vmatmul.mubr.msk.bf16.gmra.mrb[8].mxu1 %vm267_vm1, %v8817_v37  ;;  %v4573_v37 = vrot.slane %v2943_v58, 7 }
 0x4d8   : > { %6508 = vmatprep.mubr.msk.bf16.mxu1 %vm267_vm1, %v8821_v35  ;;  %v4572_v35 = vsel %vm493_vm3, %v4570_v12, %v4571_v26 }
 0x4df   : > { %6509 = vmatmul.mubr.msk.bf16.gmra.mrb[12].mxu1 %vm267_vm1, %v8833_v33  ;;  %v4574_v33 = vsel %vm493_vm3, %v4571_v26, %v4573_v37  ;;  %v9538_v26 = vld [vmem:[#allocation12_spill] sm:$0xff] }
 0x4e0   : > { %6512 = vmatprep.mubr.msk.bf16.mxu1 %vm267_vm1, %v8837_v55  ;;  %v4577_v55 = vpack.c.bf16 %v4574_v33, %v4572_v35 }
 0x4e7   : > { %6513 = vmatmul.mubr.msk.bf16.gmra.mrb[16].mxu1 %vm267_vm1, %v8849_v62  ;;  %v4990_v62 = vsel %vm686_vm0, %v2767_v5, 0 }
 0x4e8   : > { %6516 = vmatprep.mubr.msk.bf16.mxu1 %vm267_vm1, %v8853_v24  ;;  %v4777_v24 = vpack.c.bf16 %v2943_v58, %v2942_v47 }
 0x4ef   : > { %6517 = vmatmul.mubr.msk.bf16.gmra.mrb[20].mxu1 %vm267_vm1, %v8865_v6 }
 0x4f0   : > { %6520 = vmatprep.mubr.msk.bf16.mxu1 %vm267_vm1, %v8869_v11 }
 0x4f7   : > { %6521 = vmatmul.mubr.msk.bf16.gmra.mrb[24].mxu1 %vm267_vm1, %v8878_v18 }
 0x4f8   : > { %6524 = vmatprep.mubr.msk.bf16.mxu1 %vm267_vm1, %v8961_v48 }
 0x4ff   : > { %6525 = vmatmul.mubr.msk.bf16.gmra.mrb[28].mxu1 %vm267_vm1, %v4577_v55  ;;  %v9539_v55 = vld [vmem:[#allocation15_spill] sm:$0xff] }
 0x500   : > { %6530 = vmatprep.mubr.msk.bf16.mxu1 %vm267_vm1, %v9514_v60 }
 0x507   : > { %6531 = vmatmul.mubr.msk.bf16.vlgmr.msra.gmra.mrb[0].mxu1 %vm267_vm1, %v9515_v27 }
 0x508   : > { %6563 = vmatpush3.bf16.msra.mxu1 %v4990_v62  ;;  %6534 = vmatprep.mubr.msk.bf16.mxu1 %vm267_vm1, %v9516_v23 }
 0x50f   : > { %6535 = vmatmul.mubr.msk.bf16.gmra.mrb[4].mxu1 %vm267_vm1, %v9517_v2  ;;  %v9534_v2 = vld [vmem:[#allocation8_spill] sm:$0xff] }
 0x510   : > { %6538 = vmatprep.mubr.msk.bf16.mxu1 %vm267_vm1, %v9518_v40 }
 0x517   : > { %6539 = vmatmul.mubr.msk.bf16.gmra.mrb[8].mxu1 %vm267_vm1, %v9519_v45 }
 0x518   : > { %6542 = vmatprep.mubr.msk.bf16.mxu1 %vm267_vm1, %v9520_v0 }
 0x51f   : > { %6543 = vmatmul.mubr.msk.bf16.gmra.mrb[12].mxu1 %vm267_vm1, %v9521_v1  ;;  %v9535_v1 = vld [vmem:[#allocation11_spill] sm:$0xff] }
 0x520   : > { %6546 = vmatprep.mubr.msk.bf16.mxu1 %vm267_vm1, %v9522_v4 }
 0x527   : > { %6547 = vmatmul.mubr.msk.bf16.gmra.mrb[16].mxu1 %vm267_vm1, %v9523_v3 }
 0x528   : > { %6550 = vmatprep.mubr.msk.bf16.mxu1 %vm267_vm1, %v9524_v29  ;;  %v9536_v29 = vld [vmem:[#allocation9_spill] sm:$0xff] }
 0x52f   : > { %6551 = vmatmul.mubr.msk.bf16.gmra.mrb[20].mxu1 %vm267_vm1, %v9525_v15 }
 0x530   : > { %6554 = vmatprep.mubr.msk.bf16.mxu1 %vm267_vm1, %v9526_v51 }
 0x537   : > { %6555 = vmatmul.mubr.msk.bf16.gmra.mrb[24].mxu1 %vm267_vm1, %v9527_v54 }
 0x538   : > { %6558 = vmatprep.mubr.msk.bf16.mxu1 %vm267_vm1, %v9528_v44 }
 0x53f   : > { %6559 = vmatmul.mubr.msk.bf16.gmra.mrb[28].mxu1 %vm267_vm1, %v4777_v24 }
 0x540   : > { %6564 = vmatprep.mubr.msk.bf16.mxu1 %vm267_vm1, %v8486_v7  ;;  %v2944_v7 = vld [vmem:[#allocation3 + $0x238] sm:$0xff] }
 0x547   : > { %6565 = vmatmul.mubr.msk.bf16.vlgmr.msra.gmra.mrb[0].mxu1 %vm267_vm1, %v8521_v39  ;;  %v4978_v39 = vrot.slane %v2942_v47, 1 }
 0x548   : > { %6568 = vmatprep.mubr.msk.bf16.mxu1 %vm267_vm1, %v8523_v13  ;;  %v4979_v13 = vrot.slane %v2943_v58, 1 }
 0x54f   : > { %6569 = vmatmul.mubr.msk.bf16.gmra.mrb[4].mxu1 %vm267_vm1, %v8561_v59  ;;  %v4981_v59 = vrot.slane %v2944_v7, 1  ;;  %v9540_v7 = vld [vmem:[#allocation13_spill] sm:$0xff] }
 0x550   : > { %6572 = vmatprep.mubr.msk.bf16.mxu1 %vm267_vm1, %v8563_v36 }
 0x557   : > { %6573 = vmatmul.mubr.msk.bf16.gmra.mrb[8].mxu1 %vm267_vm1, %v8601_v49  ;;  %v9145_v49 = vld [vmem:[%s9289_s4] ss:$0 sm:$0xff] }
 0x558   : > { %6576 = vmatprep.mubr.msk.bf16.mxu1 %vm267_vm1, %v8603_v17 }
 0x55f   : > { %6577 = vmatmul.mubr.msk.bf16.gmra.mrb[12].mxu1 %vm267_vm1, %v8641_v16 }
 0x560   : > { %6580 = vmatprep.mubr.msk.bf16.mxu1 %vm267_vm1, %v8643_v8  ;;  %v4980_v8 = vsel %vm1079_vm2, %v4978_v39, %v4979_v13 }
 0x567   : > { %6581 = vmatmul.mubr.msk.bf16.gmra.mrb[16].mxu1 %vm267_vm1, %v8681_v20  ;;  %v4982_v20 = vsel %vm1079_vm2, %v4979_v13, %v4981_v59 }
 0x568   : > { %6584 = vmatprep.mubr.msk.bf16.mxu1 %vm267_vm1, %v8683_v28  ;;  %v4985_v36 = vpack.c.bf16 %v4982_v20, %v4980_v8 }
 0x56f   : > { %6585 = vmatmul.mubr.msk.bf16.gmra.mrb[20].mxu1 %vm267_vm1, %v9509_v50 }
 0x570   : > { %6588 = vmatprep.mubr.msk.bf16.mxu1 %vm267_vm1, %v9510_v9 }
 0x577   : > { %6589 = vmatmul.mubr.msk.bf16.gmra.mrb[24].mxu1 %vm267_vm1, %v8752_v57 }
 0x578   : > { %6592 = vmatprep.mubr.msk.bf16.mxu1 %vm267_vm1, %v8754_v31  ;;  %v9529_v31 = vld [vmem:[#allocation6_spill] sm:$0xff] }
 0x57f   : > { %6593 = vmatmul.mubr.msk.bf16.gmra.mrb[28].mxu1 %vm267_vm1, %v4985_v36 }
 0x61a   : > { %v6566_v17 = vpop.f32.mrb[0].mxu1 }
 0x61b   : > { %v5194_v16 = vadd.f32 %v6566_v17, %v9145_v49  ;;  %v5026_v28 = vpop.f32.mrb[1].mxu1 }
 0x61c   : > { %v5192_v57 = vadd.f32 %v9145_v49, %v5026_v28  ;;  %v6567_v6 = vpop.f32.mrb[2].mxu1  ;;  %v9541_v28 = vld [vmem:[#allocation18_spill] sm:$0xff] }
 0x61d   : > { %v5226_v11 = vadd.f32 %v5194_v16, %v9529_v31  ;;  %v5195_v18 = vadd.f32 %v6567_v6, %v9145_v49  ;;  %v5029_v21 = vpop.f32.mrb[3].mxu1 }
 0x61e   : > { %v5224_v50 = vadd.f32 %v5192_v57, %v9530_v53  ;;  %v5193_v9 = vadd.f32 %v9145_v49, %v5029_v21 }
 0x61f   : > { %v5258_v19 = vmax.f32 %v5226_v11, 0.0  ;;  %v5227_v30 = vadd.f32 %v5195_v18, %v9531_v61  ;;  %v9542_v11 = vld [vmem:[#allocation16_spill] sm:$0xff]  ;;  %v9544_v61 = vld [vmem:[#allocation17_spill] sm:$0xff] }
 0x620   : > { %v5256_v32 = vmax.f32 %v5224_v50, 0.0  ;;  %v5225_v41 = vadd.f32 %v5193_v9, %v9532_v22  ;;  %v9543_v50 = vld [vmem:[#allocation19_spill] sm:$0xff] }
 0x621   : > { %5290 = vst.msk [vmem:[%s9156_s22 + $0x10] sm:$0xff] %vm267_vm1, %v5258_v19  ;;  %v5259_v56 = vmax.f32 %v5227_v30, 0.0 }
 0x622   : > { %5288 = vst.msk [vmem:[%s9156_s22] sm:$0xff] %vm267_vm1, %v5256_v32  ;;  %v5257_v42 = vmax.f32 %v5225_v41, 0.0  ;;  %v6570_v14 = vpop.f32.mrb[4].mxu1 }
 0x623   : > { %5291 = vst.msk [vmem:[%s9156_s22 + $0x18] sm:$0xff] %vm267_vm1, %v5259_v56  ;;  %v5198_v34 = vadd.f32 %v6570_v14, %v9145_v49  ;;  %v5042_v48 = vpop.f32.mrb[5].mxu1 }
 0x624   : > { %5289 = vst.msk [vmem:[%s9156_s22 + $0x8] sm:$0xff] %vm267_vm1, %v5257_v42  ;;  %v5196_v38 = vadd.f32 %v9145_v49, %v5042_v48  ;;  %v6571_v52 = vpop.f32.mrb[6].mxu1  ;;  %v9545_v48 = vld [vmem:[#allocation23_spill] sm:$0xff] }
 0x625   : > { %v5230_v60 = vadd.f32 %v5198_v34, %v9533_v10  ;;  %v5199_v27 = vadd.f32 %v6571_v52, %v9145_v49  ;;  %v5045_v23 = vpop.f32.mrb[7].mxu1 }
 0x626   : > { %v5228_v40 = vadd.f32 %v5196_v38, %v9534_v2  ;;  %v5197_v45 = vadd.f32 %v9145_v49, %v5045_v23 }
 0x627   : > { %v5262_v0 = vmax.f32 %v5230_v60, 0.0  ;;  %v5231_v4 = vadd.f32 %v5199_v27, %v9535_v1  ;;  %v9546_v60 = vld [vmem:[#allocation20_spill] sm:$0xff]  ;;  %v9548_v1 = vld [vmem:[#allocation22_spill] sm:$0xff] }
 0x628   : > { %v5260_v3 = vmax.f32 %v5228_v40, 0.0  ;;  %v5229_v15 = vadd.f32 %v5197_v45, %v9536_v29  ;;  %v9547_v40 = vld [vmem:[#allocation24_spill] sm:$0xff] }
 0x629   : > { %5294 = vst.msk [vmem:[%s9156_s22 + $0x30] sm:$0xff] %vm267_vm1, %v5262_v0  ;;  %v5263_v51 = vmax.f32 %v5231_v4, 0.0 }
 0x62a   : > { %5292 = vst.msk [vmem:[%s9156_s22 + $0x20] sm:$0xff] %vm267_vm1, %v5260_v3  ;;  %v5261_v54 = vmax.f32 %v5229_v15, 0.0  ;;  %v6574_v44 = vpop.f32.mrb[8].mxu1 }
 0x62b   : > { %5295 = vst.msk [vmem:[%s9156_s22 + $0x38] sm:$0xff] %vm267_vm1, %v5263_v51  ;;  %v5202_v63 = vadd.f32 %v6574_v44, %v9145_v49  ;;  %v5058_v25 = vpop.f32.mrb[9].mxu1 }
 0x62c   : > { %5293 = vst.msk [vmem:[%s9156_s22 + $0x28] sm:$0xff] %vm267_vm1, %v5261_v54  ;;  %v5200_v46 = vadd.f32 %v9145_v49, %v5058_v25  ;;  %v6575_v5 = vpop.f32.mrb[10].mxu1  ;;  %v9549_v25 = vld [vmem:[#allocation29_spill] sm:$0xff] }
 0x62d   : > { %v5234_v47 = vadd.f32 %v5202_v63, %v9537_v43  ;;  %v5203_v58 = vadd.f32 %v6575_v5, %v9145_v49  ;;  %v5061_v12 = vpop.f32.mrb[11].mxu1 }
 0x62e   : > { %v5232_v37 = vadd.f32 %v5200_v46, %v9538_v26  ;;  %v5201_v35 = vadd.f32 %v9145_v49, %v5061_v12 }
 0x62f   : > { %v5266_v33 = vmax.f32 %v5234_v47, 0.0  ;;  %v5235_v62 = vadd.f32 %v5203_v58, %v9539_v55  ;;  %v9550_v47 = vld [vmem:[#allocation27_spill] sm:$0xff]  ;;  %v9552_v55 = vld [vmem:[#allocation28_spill] sm:$0xff] }
 0x630   : > { %v5264_v24 = vmax.f32 %v5232_v37, 0.0  ;;  %v5233_v39 = vadd.f32 %v5201_v35, %v9540_v7  ;;  %v9551_v37 = vld [vmem:[#allocation30_spill] sm:$0xff] }
 0x631   : > { %5298 = vst.msk [vmem:[%s9156_s22 + $0x50] sm:$0xff] %vm267_vm1, %v5266_v33  ;;  %v5267_v13 = vmax.f32 %v5235_v62, 0.0 }
 0x632   : > { %5296 = vst.msk [vmem:[%s9156_s22 + $0x40] sm:$0xff] %vm267_vm1, %v5264_v24  ;;  %v5265_v59 = vmax.f32 %v5233_v39, 0.0  ;;  %v6578_v8 = vpop.f32.mrb[12].mxu1 }
 0x633   : > { %5299 = vst.msk [vmem:[%s9156_s22 + $0x58] sm:$0xff] %vm267_vm1, %v5267_v13  ;;  %v5206_v20 = vadd.f32 %v6578_v8, %v9145_v49  ;;  %v5074_v36 = vpop.f32.mrb[13].mxu1 }
 0x634   : > { %5297 = vst.msk [vmem:[%s9156_s22 + $0x48] sm:$0xff] %vm267_vm1, %v5265_v59  ;;  %v5204_v17 = vadd.f32 %v9145_v49, %v5074_v36  ;;  %v6579_v16 = vpop.f32.mrb[14].mxu1  ;;  %v9553_v36 = vld [vmem:[#allocation35_spill] sm:$0xff] }
 0x635   : > { %v5238_v57 = vadd.f32 %v5206_v20, %v9541_v28  ;;  %v5207_v6 = vadd.f32 %v6579_v16, %v9145_v49  ;;  %v5077_v31 = vpop.f32.mrb[15].mxu1 }
 0x636   : > { %v5236_v18 = vadd.f32 %v5204_v17, %v9542_v11  ;;  %v5205_v21 = vadd.f32 %v9145_v49, %v5077_v31 }
 0x637   : > { %v5270_v53 = vmax.f32 %v5238_v57, 0.0  ;;  %v5239_v9 = vadd.f32 %v5207_v6, %v9543_v50  ;;  %v9554_v57 = vld [vmem:[#allocation33_spill] sm:$0xff]  ;;  %v9556_v50 = vld [vmem:[#allocation34_spill] sm:$0xff] }
 0x638   : > { %v5268_v19 = vmax.f32 %v5236_v18, 0.0  ;;  %v5237_v30 = vadd.f32 %v5205_v21, %v9544_v61  ;;  %v9555_v18 = vld [vmem:[#allocation36_spill] sm:$0xff] }
 0x639   : > { %5302 = vst.msk [vmem:[%s9156_s22 + $0x70] sm:$0xff] %vm267_vm1, %v5270_v53  ;;  %v5271_v32 = vmax.f32 %v5239_v9, 0.0 }
 0x63a   : > { %5300 = vst.msk [vmem:[%s9156_s22 + $0x60] sm:$0xff] %vm267_vm1, %v5268_v19  ;;  %v5269_v22 = vmax.f32 %v5237_v30, 0.0  ;;  %v6582_v41 = vpop.f32.mrb[16].mxu1 }
 0x63b   : > { %5303 = vst.msk [vmem:[%s9156_s22 + $0x78] sm:$0xff] %vm267_vm1, %v5271_v32  ;;  %v5210_v56 = vadd.f32 %v6582_v41, %v9145_v49  ;;  %v5090_v42 = vpop.f32.mrb[17].mxu1 }
 0x63c   : > { %5301 = vst.msk [vmem:[%s9156_s22 + $0x68] sm:$0xff] %vm267_vm1, %v5269_v22  ;;  %v5208_v14 = vadd.f32 %v9145_v49, %v5090_v42  ;;  %v6583_v34 = vpop.f32.mrb[18].mxu1  ;;  %v9557_v42 = vld [vmem:[#allocation43_spill] sm:$0xff] }
 0x63d   : > { %v5242_v38 = vadd.f32 %v5210_v56, %v9545_v48  ;;  %v5211_v52 = vadd.f32 %v6583_v34, %v9145_v49  ;;  %v5093_v10 = vpop.f32.mrb[19].mxu1 }
 0x63e   : > { %v5240_v27 = vadd.f32 %v5208_v14, %v9546_v60  ;;  %v5209_v23 = vadd.f32 %v9145_v49, %v5093_v10 }
 0x63f   : > { %v5274_v2 = vmax.f32 %v5242_v38, 0.0  ;;  %v5243_v45 = vadd.f32 %v5211_v52, %v9547_v40  ;;  %v9558_v38 = vld [vmem:[#allocation37_spill] sm:$0xff]  ;;  %v9560_v40 = vld [vmem:[#allocation38_spill] sm:$0xff] }
 0x640   : > { %v5272_v0 = vmax.f32 %v5240_v27, 0.0  ;;  %v5241_v4 = vadd.f32 %v5209_v23, %v9548_v1  ;;  %v9559_v27 = vld [vmem:[#allocation45_spill] sm:$0xff] }
 0x641   : > { %5306 = vst.msk [vmem:[%s9156_s22 + $0x90] sm:$0xff] %vm267_vm1, %v5274_v2  ;;  %v5275_v3 = vmax.f32 %v5243_v45, 0.0 }
 0x642   : > { %5304 = vst.msk [vmem:[%s9156_s22 + $0x80] sm:$0xff] %vm267_vm1, %v5272_v0  ;;  %v5273_v29 = vmax.f32 %v5241_v4, 0.0  ;;  %v6586_v15 = vpop.f32.mrb[20].mxu1 }
 0x643   : > { %5307 = vst.msk [vmem:[%s9156_s22 + $0x98] sm:$0xff] %vm267_vm1, %v5275_v3  ;;  %v5214_v51 = vadd.f32 %v6586_v15, %v9145_v49  ;;  %v5106_v54 = vpop.f32.mrb[21].mxu1 }
 0x644   : > { %5305 = vst.msk [vmem:[%s9156_s22 + $0x88] sm:$0xff] %vm267_vm1, %v5273_v29  ;;  %v5212_v44 = vadd.f32 %v9145_v49, %v5106_v54  ;;  %v6587_v63 = vpop.f32.mrb[22].mxu1 }
 0x645   : > { %v5246_v46 = vadd.f32 %v5214_v51, %v9549_v25  ;;  %v5215_v5 = vadd.f32 %v6587_v63, %v9145_v49  ;;  %v5109_v43 = vpop.f32.mrb[23].mxu1 }
 0x646   : > { %v5244_v58 = vadd.f32 %v5212_v44, %v9550_v47  ;;  %v5213_v12 = vadd.f32 %v9145_v49, %v5109_v43 }
 0x647   : > { %v5278_v26 = vmax.f32 %v5246_v46, 0.0  ;;  %v5247_v35 = vadd.f32 %v5215_v5, %v9551_v37 }
 0x648   : > { %v5276_v33 = vmax.f32 %v5244_v58, 0.0  ;;  %v5245_v62 = vadd.f32 %v5213_v12, %v9552_v55 }
 0x649   : > { %5310 = vst.msk [vmem:[%s9156_s22 + $0xb0] sm:$0xff] %vm267_vm1, %v5278_v26  ;;  %v5279_v24 = vmax.f32 %v5247_v35, 0.0 }
 0x64a   : > { %5308 = vst.msk [vmem:[%s9156_s22 + $0xa0] sm:$0xff] %vm267_vm1, %v5276_v33  ;;  %v5277_v7 = vmax.f32 %v5245_v62, 0.0  ;;  %v6590_v39 = vpop.f32.mrb[24].mxu1 }
 0x64b   : > { %5311 = vst.msk [vmem:[%s9156_s22 + $0xb8] sm:$0xff] %vm267_vm1, %v5279_v24  ;;  %v5218_v13 = vadd.f32 %v6590_v39, %v9145_v49  ;;  %v5122_v59 = vpop.f32.mrb[25].mxu1 }
 0x64c   : > { %5309 = vst.msk [vmem:[%s9156_s22 + $0xa8] sm:$0xff] %vm267_vm1, %v5277_v7  ;;  %v5216_v8 = vadd.f32 %v9145_v49, %v5122_v59  ;;  %v6591_v20 = vpop.f32.mrb[26].mxu1 }
 0x64d   : > { %v5250_v17 = vadd.f32 %v5218_v13, %v9553_v36  ;;  %v5219_v16 = vadd.f32 %v6591_v20, %v9145_v49  ;;  %v5125_v28 = vpop.f32.mrb[27].mxu1 }
 0x64e   : > { %v5248_v6 = vadd.f32 %v5216_v8, %v9554_v57  ;;  %v5217_v31 = vadd.f32 %v9145_v49, %v5125_v28 }
 0x64f   : > { %v5282_v11 = vmax.f32 %v5250_v17, 0.0  ;;  %v5251_v21 = vadd.f32 %v5219_v16, %v9555_v18 }
 0x650   : > { %v5280_v53 = vmax.f32 %v5248_v6, 0.0  ;;  %v5249_v9 = vadd.f32 %v5217_v31, %v9556_v50 }
 0x651   : > { %5314 = vst.msk [vmem:[%s9156_s22 + $0xd0] sm:$0xff] %vm267_vm1, %v5282_v11  ;;  %v5283_v19 = vmax.f32 %v5251_v21, 0.0 }
 0x652   : > { %5312 = vst.msk [vmem:[%s9156_s22 + $0xc0] sm:$0xff] %vm267_vm1, %v5280_v53  ;;  %v5281_v61 = vmax.f32 %v5249_v9, 0.0  ;;  %v6594_v30 = vpop.f32.mrb[28].mxu1 }
 0x653   : > { %5315 = vst.msk [vmem:[%s9156_s22 + $0xd8] sm:$0xff] %vm267_vm1, %v5283_v19  ;;  %v5222_v32 = vadd.f32 %v6594_v30, %v9145_v49  ;;  %v5138_v22 = vpop.f32.mrb[29].mxu1 }
 0x654   : > { %5313 = vst.msk [vmem:[%s9156_s22 + $0xc8] sm:$0xff] %vm267_vm1, %v5281_v61  ;;  %v5220_v41 = vadd.f32 %v9145_v49, %v5138_v22  ;;  %v6595_v56 = vpop.f32.mrb[30].mxu1 }
 0x655   : > { %v5254_v14 = vadd.f32 %v5222_v32, %v9557_v42  ;;  %v5223_v34 = vadd.f32 %v6595_v56, %v9145_v49  ;;  %v5141_v48 = vpop.f32.mrb[31].mxu1 }
 0x656   : > { %v5252_v52 = vadd.f32 %v5220_v41, %v9558_v38  ;;  %v5221_v10 = vadd.f32 %v9145_v49, %v5141_v48 }
 0x657   : > { %v5286_v60 = vmax.f32 %v5254_v14, 0.0  ;;  %v5255_v23 = vadd.f32 %v5223_v34, %v9559_v27 }
 0x658   : > { %v5284_v2 = vmax.f32 %v5252_v52, 0.0  ;;  %v5253_v45 = vadd.f32 %v5221_v10, %v9560_v40 }
 0x659   : > { %5318 = vst.msk [vmem:[%s9156_s22 + $0xf0] sm:$0xff] %vm267_vm1, %v5286_v60  ;;  %v5287_v0 = vmax.f32 %v5255_v23, 0.0 }
 0x65a   : > { %5316 = vst.msk [vmem:[%s9156_s22 + $0xe0] sm:$0xff] %vm267_vm1, %v5284_v2  ;;  %v5285_v1 = vmax.f32 %v5253_v45, 0.0 }
 0x65b   : > { %5319 = vst.msk [vmem:[%s9156_s22 + $0xf8] sm:$0xff] %vm267_vm1, %v5287_v0 }
 0x65c   : > { %5317 = vst.msk [vmem:[%s9156_s22 + $0xe8] sm:$0xff] %vm267_vm1, %v5285_v1 }
 0x65d PF: > { %s15_s18 = sadd.s32 1, %s7141_s18  }
 0x65e   : > { %p12_p4 = scmp.ge.s32.totalorder %s15_s18, 4  }
 0x660   :  { %14 = sbr.rel (!%p12_p4) target bundleno = 1 (0x1), region = 72 }

</bundles_post_ra>
